<compile_context>
chip_gen: v7x
topology: tpu7x:2x2x1
jax: 0.10.0
libtpu: 0.0.40
codegen_flags: <defaults>
</compile_context>

<pallas_src>
import collections
import functools
import math

import numpy as np
import jax
import jax.numpy as jnp
from jax.experimental import pallas as pl
from jax.experimental.pallas import tpu as pltpu


# --------------------------- structural matrices ---------------------------- #

def _taps_s_matrix(L, stride, mode):
    """k=3, pad=1 tap-selection matrix (L, 3*Lo).  mode='zero' (conv: pad->0) or
    'center' (max pool: pad tap duplicates the always-valid center tap)."""
    Lo = (L - 1) // stride + 1
    S = np.zeros((L, 3 * Lo), np.float32)
    for j in range(Lo):
        for k in range(3):
            i = stride * j + k - 1
            if 0 <= i < L:
                S[i, k * Lo + j] = 1.0
            elif mode == 'center':
                S[stride * j, k * Lo + j] = 1.0
    return S, Lo


def _avg_s_matrix(L, stride):
    """k=3, pad=1 average pooling (count_include_pad=False) as one matrix (L, Lo)."""
    Lo = (L - 1) // stride + 1
    S = np.zeros((L, Lo), np.float32)
    for j in range(Lo):
        valid = [stride * j + k - 1 for k in range(3) if 0 <= stride * j + k - 1 < L]
        for i in valid:
            S[i, j] += 1.0 / len(valid)
    return S, Lo


def _evenodd_s_matrix(L):
    """FactorizedReduce even/odd stride-2 selection packed as (L, 2*Lo) = [even|odd]."""
    Lo = L // 2
    S = np.zeros((L, 2 * Lo), np.float32)
    for j in range(Lo):
        S[2 * j, j] = 1.0
        S[2 * j + 1, Lo + j] = 1.0
    return S, Lo


def _mean_s_matrix(L):
    return np.full((L, 1), 1.0 / L, np.float32), 1


class _Slab:
    """Packs 2D f32 blocks into one (rows, width) slab; block row offsets 8-aligned."""

    def __init__(self, width):
        self.width = width
        self.blocks = []
        self.index = {}
        self.rows = 0

    def add(self, name, arr):
        arr = np.asarray(arr, np.float32)
        assert arr.ndim == 2 and arr.shape[1] <= self.width, (name, arr.shape)
        r = self.rows
        self.index[name] = (r, int(arr.shape[0]), int(arr.shape[1]))
        self.blocks.append((r, arr))
        self.rows += ((arr.shape[0] + 7) // 8) * 8
        return name

    def materialize(self):
        rows = max(self.rows, 8)
        slab = np.zeros((rows, self.width), np.float32)
        for r, arr in self.blocks:
            slab[r:r + arr.shape[0], :arr.shape[1]] = arr
        return jnp.asarray(slab)


# ------------------------------ genotype ------------------------------------ #

Genotype = collections.namedtuple('Genotype', 'normal normal_concat reduce reduce_concat')

GENOTYPE = Genotype(
    normal=[('sep_conv_3', 0), ('skip_connect', 1),
            ('max_pool_3', 0), ('sep_conv_3', 1)],
    normal_concat=[2, 3],
    reduce=[('max_pool_3', 0), ('skip_connect', 1),
            ('avg_pool_3', 1), ('sep_conv_3', 0)],
    reduce_concat=[2, 3],
)


# --------------------------- network construction --------------------------- #

def build_network(C, num_classes, layers, L_in, genotype=GENOTYPE, seed=0):
    rng = np.random.default_rng(seed)
    wslab = _Slab(64)
    sslab = _Slab(3 * ((L_in - 1) // 2 + 1))        # widest packed tap matrix (stem0a)

    uid = [0]

    def fresh(tag):
        uid[0] += 1
        return f'{tag}{uid[0]}'

    def conv_w(cout, fan_in):
        return (rng.standard_normal((cout, fan_in)) / math.sqrt(fan_in)).astype(np.float32)

    def bn_fold(cout):
        # eval-mode BatchNorm folded to per-channel scale/shift (deterministic init)
        scale = (1.0 + 0.1 * rng.standard_normal((cout, 1))).astype(np.float32)
        shift = (0.05 * rng.standard_normal((cout, 1))).astype(np.float32)
        return scale, shift

    s_cache = {}

    def s_get(kind, L, stride=1, mode='zero'):
        key = (kind, L, stride, mode)
        if key not in s_cache:
            if kind == 'taps':
                S, Lo = _taps_s_matrix(L, stride, mode)
            elif kind == 'avg':
                S, Lo = _avg_s_matrix(L, stride)
            elif kind == 'eo':
                S, Lo = _evenodd_s_matrix(L)
            else:  # 'mean'
                S, Lo = _mean_s_matrix(L)
            s_cache[key] = (sslab.add(f'{kind}_{L}_{stride}_{mode}', S), Lo)
        return s_cache[key]

    def make_conv3_s2(cin, cout, L):
        scale, shift = bn_fold(cout)
        w = scale * conv_w(cout, 3 * cin)           # tap-major: [W_k0 | W_k1 | W_k2]
        sname, Lo = s_get('taps', L, 2, 'zero')
        return {'kind': 'conv3', 'cin': cin, 'Lo': Lo, 'S': sname,
                'w': wslab.add(fresh('w'), w), 'shift': wslab.add(fresh('b'), shift)}

    def make_rcb(cin, cout, L):
        scale, shift = bn_fold(cout)
        return {'kind': 'rcb', 'Lo': L,
                'w': wslab.add(fresh('w'), scale * conv_w(cout, cin)),
                'shift': wslab.add(fresh('b'), shift)}

    def make_fred(cin, cout, L):
        scale, shift = bn_fold(cout)
        h = cout // 2
        wbd = np.zeros((cout, 2 * cin), np.float32)  # block-diagonal: no misaligned writes
        wbd[:h, :cin] = conv_w(h, cin)
        wbd[h:, cin:] = conv_w(cout - h, cin)
        wbd = scale * wbd
        sname, Lo = s_get('eo', L)
        return {'kind': 'fred', 'cin': cin, 'Lo': Lo, 'S': sname,
                'w': wslab.add(fresh('w'), wbd), 'shift': wslab.add(fresh('b'), shift)}

    def make_sep(Cc, stride, L):
        s1, sh1 = bn_fold(Cc)
        s2, sh2 = bn_fold(Cc)
        sn1, L1 = s_get('taps', L, stride, 'zero')
        sn2, L2 = s_get('taps', L1, 1, 'zero')

        def dw():
            return (rng.standard_normal((Cc, 3)) / math.sqrt(3)).astype(np.float32)

        return {'kind': 'sep', 'L1': L1, 'Lo': L2, 'S1': sn1, 'S2': sn2,
                'dw1': wslab.add(fresh('w'), dw()),
                'pw1': wslab.add(fresh('w'), s1 * conv_w(Cc, Cc)),
                'sh1': wslab.add(fresh('b'), sh1),
                'dw2': wslab.add(fresh('w'), dw()),
                'pw2': wslab.add(fresh('w'), s2 * conv_w(Cc, Cc)),
                'sh2': wslab.add(fresh('b'), sh2)}

    def make_op(name, Cc, stride, L):
        if name == 'skip_connect':
            return {'kind': 'id', 'Lo': L} if stride == 1 else make_fred(Cc, Cc, L)
        if name == 'sep_conv_3':
            return make_sep(Cc, stride, L)
        if name == 'max_pool_3':
            sname, Lo = s_get('taps', L, stride, 'center')
            return {'kind': 'max', 'Lo': Lo, 'S': sname}
        if name == 'avg_pool_3':
            sname, Lo = s_get('avg', L, stride)
            return {'kind': 'avg', 'Lo': Lo, 'S': sname}
        raise ValueError(name)

    plan = {}
    L = L_in
    plan['stem0a'] = make_conv3_s2(3, C // 2, L)
    L = plan['stem0a']['Lo']
    plan['stem0b'] = make_conv3_s2(C // 2, C, L)
    L = plan['stem0b']['Lo']
    L_s0 = L
    plan['stem1'] = make_conv3_s2(C, C, L)
    L_s1 = plan['stem1']['Lo']

    C_pp, C_p, C_curr = C, C, C
    L_pp, L_p = L_s0, L_s1
    reduction_prev = True
    cells = []
    for i in range(layers):
        reduction = i in (layers // 3, 2 * layers // 3)
        if reduction:
            C_curr *= 2
        cell = {'C': C_curr}
        if reduction_prev:
            cell['pre0'] = make_fred(C_pp, C_curr, L_pp)
        else:
            cell['pre0'] = make_rcb(C_pp, C_curr, L_pp)
        cell['pre1'] = make_rcb(C_p, C_curr, L_p)
        assert cell['pre0']['Lo'] == L_p and cell['pre1']['Lo'] == L_p

        gene = genotype.reduce if reduction else genotype.normal
        concat = genotype.reduce_concat if reduction else genotype.normal_concat
        op_names, indices = zip(*gene)
        steps = len(op_names) // 2
        state_L = [L_p, L_p]
        ops = []
        for t in range(steps):
            for s in (0, 1):
                nm, idx = op_names[2 * t + s], indices[2 * t + s]
                stride = 2 if (reduction and idx < 2) else 1
                ops.append((make_op(nm, C_curr, stride, state_L[idx]), idx))
            assert ops[2 * t][0]['Lo'] == ops[2 * t + 1][0]['Lo']
            state_L.append(ops[2 * t][0]['Lo'])
        cell['ops'] = ops
        cell['steps'] = steps
        cell['concat'] = list(concat)
        cells.append(cell)

        reduction_prev = reduction
        C_out = len(concat) * C_curr
        L_out = state_L[concat[0]]
        C_pp, C_p = C_p, C_out
        L_pp, L_p = L_p, L_out
    plan['cells'] = cells

    assert L_p == 7, "reference head is AvgPool1d(7): choose L_in so the trunk ends at 7"
    sname, _ = s_get('mean', L_p)
    plan['head'] = {
        'S': sname, 'ncls': num_classes,
        'w': wslab.add('cls_w', conv_w(num_classes, C_p)),
        'b': wslab.add('cls_b',
                       (0.01 * rng.standard_normal((num_classes, 1))).astype(np.float32)),
    }

    # one identity used to channel-stack cell states via exact 0/1 matmuls
    max_oc = max(len(c['concat']) * c['C'] for c in cells)
    wslab.add('eye', np.eye(max_oc, dtype=np.float32))

    return wslab.materialize(), sslab.materialize(), plan, dict(wslab.index), dict(sslab.index)


# ------------------------------- fused kernel ------------------------------- #

def _network_kernel(x_ref, w_ref, s_ref, o_ref, *, plan, widx, sidx):
    def W(nm):
        r, nr, nc = widx[nm]
        return w_ref[r:r + nr, 0:nc]

    def S(nm):
        r, nr, nc = sidx[nm]
        return s_ref[r:r + nr, 0:nc]

    def mm(a, b):
        return jnp.dot(a, b, preferred_element_type=jnp.float32)

    def relu(v):
        return jnp.maximum(v, 0.0)

    def conv3(x, d, pre_relu=False, post_relu=False):
        # Conv1d(k=3, s=2, p=1) + folded BN; taps built by one selection matmul.
        if pre_relu:
            x = relu(x)
        cin, Lo = d['cin'], d['Lo']
        taps = mm(x, S(d['S']))                      # (cin, 3*Lo)
        w = W(d['w'])                                # (cout, 3*cin) tap-major
        y = mm(w[:, 0:cin], taps[:, 0:Lo])
        for k in (1, 2):
            y = y + mm(w[:, k * cin:(k + 1) * cin], taps[:, k * Lo:(k + 1) * Lo])
        y = y + W(d['shift'])
        return relu(y) if post_relu else y

    def rcb(x, d):                                   # ReLU -> 1x1 conv -> BN shift
        return mm(W(d['w']), relu(x)) + W(d['shift'])

    def fred(x, d):                                  # FactorizedReduce (block-diag weight)
        cin, Lo = d['cin'], d['Lo']
        eo = mm(relu(x), S(d['S']))                  # (cin, 2*Lo) = [even | odd]
        w = W(d['w'])                                # (cout, 2*cin)
        y = mm(w[:, 0:cin], eo[:, 0:Lo]) + mm(w[:, cin:2 * cin], eo[:, Lo:2 * Lo])
        return y + W(d['shift'])

    def sep_half(x, dwn, pwn, shn, sname, Lo):       # ReLU -> depthwise k3 -> pointwise -> BN
        taps = mm(relu(x), S(sname))                 # (C, 3*Lo)
        dw = W(dwn)
        acc = dw[:, 0:1] * taps[:, 0:Lo]
        for k in (1, 2):
            acc = acc + dw[:, k:k + 1] * taps[:, k * Lo:(k + 1) * Lo]
        return mm(W(pwn), acc) + W(shn)

    def sep(x, d):
        h = sep_half(x, d['dw1'], d['pw1'], d['sh1'], d['S1'], d['L1'])
        return sep_half(h, d['dw2'], d['pw2'], d['sh2'], d['S2'], d['Lo'])

    def maxp(x, d):
        Lo = d['Lo']
        taps = mm(x, S(d['S']))                      # pad taps duplicate the center tap
        return jnp.maximum(jnp.maximum(taps[:, 0:Lo], taps[:, Lo:2 * Lo]),
                           taps[:, 2 * Lo:3 * Lo])

    def avgp(x, d):
        return mm(x, S(d['S']))                      # count_include_pad=False baked in

    def apply_op(d, x):
        k = d['kind']
        if k == 'id':
            return x
        if k == 'rcb':
            return rcb(x, d)
        if k == 'fred':
            return fred(x, d)
        if k == 'sep':
            return sep(x, d)
        if k == 'max':
            return maxp(x, d)
        if k == 'avg':
            return avgp(x, d)
        raise ValueError(k)

    # ---------------- forward (fully unrolled at trace time) ---------------- #
    x = x_ref[0].astype(jnp.float32)                 # (3, L_in) for this sample

    h = conv3(x, plan['stem0a'], post_relu=True)
    s0 = conv3(h, plan['stem0b'])
    s1 = conv3(s0, plan['stem1'], pre_relu=True)

    eye = W('eye')
    for cell in plan['cells']:
        t0 = apply_op(cell['pre0'], s0)
        t1 = apply_op(cell['pre1'], s1)
        states = [t0, t1]
        for t in range(cell['steps']):
            d1, i1 = cell['ops'][2 * t]
            d2, i2 = cell['ops'][2 * t + 1]
            # drop_path skipped: eval mode / drop_path_prob == 0 (matches reference forward)
            states.append(apply_op(d1, states[i1]) + apply_op(d2, states[i2]))
        # channel concat of the selected states via exact 0/1 stacking matmuls
        Cc = cell['C']
        oc = Cc * len(cell['concat'])
        out = None
        for j, si in enumerate(cell['concat']):
            contrib = mm(eye[0:oc, j * Cc:(j + 1) * Cc], states[si])
            out = contrib if out is None else out + contrib
        s0, s1 = s1, out

    hd = plan['head']
    pooled = mm(s1, S(hd['S']))                      # global mean BEFORE the classifier
    logits = mm(W(hd['w']), pooled) + W(hd['b'])     # (ncls, 1)
    o_ref[0] = logits


# ------------------------------ forward wrapper ------------------------------ #

def build_forward(plan, widx, sidx):
    kern = functools.partial(_network_kernel, plan=plan, widx=widx, sidx=sidx)
    ncls = plan['head']['ncls']

    @jax.jit
    def forward(x, wslab, sslab):
        n = x.shape[0]
        out = pl.pallas_call(
            kern,
            out_shape=jax.ShapeDtypeStruct((n, ncls, 1), jnp.float32),
            grid=(n,),
            in_specs=[
                pl.BlockSpec((1,) + x.shape[1:], lambda i: (i, 0, 0)),
                pl.BlockSpec(wslab.shape, lambda i: (0, 0)),
                pl.BlockSpec(sslab.shape, lambda i: (0, 0)),
            ],
            out_specs=pl.BlockSpec((1, ncls, 1), lambda i: (i, 0, 0)),
            compiler_params=pltpu.CompilerParams(
                dimension_semantics=("parallel",),        # v7x: shard samples across 2 TCs
                vmem_limit_bytes=32 * 1024 * 1024,
            ),
        )(x, wslab, sslab)
        # TODO(synk): AuxiliaryHeadImageNet omitted — it only runs when training
        # (logits_aux stays None in eval) and the reference aux head uses 2D convs.
        return out[:, :, 0], None

    return forward


# ----------------------------------- main ----------------------------------- #

if __name__ == "__main__":
    C, num_classes, layers = 8, 10, 3
    # Heart-DARTS trunk is Conv1d with total downsampling /32; L=224 -> length 7
    # before AvgPool1d(7), exactly as the reference model assumes.
    N, L = 2, 224

    wslab, sslab, plan, widx, sidx = build_network(C, num_classes, layers, L, seed=0)
    forward = build_forward(plan, widx, sidx)

    key = jax.random.PRNGKey(0)
    x = jax.random.normal(key, (N, 3, L), jnp.float32)

    logits, logits_aux = forward(x, wslab, sslab)
    logits = jax.block_until_ready(logits)

    assert logits.shape == (N, num_classes), logits.shape
    assert logits_aux is None
    assert bool(jnp.all(jnp.isfinite(logits)))
    print("KERNEL_OK")
</pallas_src>

<mosaic_0001>
module attributes {stable_mosaic.version = 11 : i64} {
  func.func @_network_kernel(%arg0: i32, %arg1: memref<1x3x224xf32, #tpu.memory_space<vmem>>, %arg2: memref<848x64xf32, #tpu.memory_space<vmem>>, %arg3: memref<736x336xf32, #tpu.memory_space<vmem>>, %arg4: memref<1x10x1xf32, #tpu.memory_space<vmem>>) attributes {dimension_semantics = [#tpu.dimension_semantics<parallel>], iteration_bounds = array<i64: 2>, scalar_prefetch = 0 : i64, scratch_operands = 0 : i64, tpu.core_type = #tpu.core_type<tc>, window_params = [{transform_indices = @transform_0, window_bounds = array<i64: 1, 3, 224>}, {pipeline_mode = #tpu.pipeline_mode<synchronous>, transform_indices = @transform_1, window_bounds = array<i64: 848, 64>}, {pipeline_mode = #tpu.pipeline_mode<synchronous>, transform_indices = @transform_2, window_bounds = array<i64: 736, 336>}, {transform_indices = @transform_3, window_bounds = array<i64: 1, 10, 1>}]} {
    %c0 = arith.constant 0 : index
    %c0_0 = arith.constant 0 : index
    %c0_1 = arith.constant 0 : index
    %0 = vector.load %arg1[%c0, %c0_0, %c0_1] : memref<1x3x224xf32, #tpu.memory_space<vmem>>, vector<1x3x224xf32>
    %1 = vector.shape_cast %0 : vector<1x3x224xf32> to vector<3x224xf32>
    %c0_2 = arith.constant 0 : index
    %c0_3 = arith.constant 0 : index
    %2 = vector.load %arg3[%c0_2, %c0_3] : memref<736x336xf32, #tpu.memory_space<vmem>>, vector<224x336xf32>
    %cst = arith.constant dense<0.000000e+00> : vector<3x336xf32>
    %3 = tpu.matmul %1, %2, %cst {dimension_numbers = #tpu.dot_dimension_numbers<[1], [0], [0], [1], [0, 0, 1, 1], [], []>} : vector<3x224xf32>, vector<224x336xf32>, vector<3x336xf32> -> vector<3x336xf32>
    %c0_4 = arith.constant 0 : index
    %c0_5 = arith.constant 0 : index
    %4 = vector.load %arg2[%c0_4, %c0_5] : memref<848x64xf32, #tpu.memory_space<vmem>>, vector<4x9xf32>
    %5 = vector.extract_strided_slice %4 {offsets = [0, 0], sizes = [4, 3], strides = [1, 1]} : vector<4x9xf32> to vector<4x3xf32>
    %6 = vector.extract_strided_slice %3 {offsets = [0, 0], sizes = [3, 112], strides = [1, 1]} : vector<3x336xf32> to vector<3x112xf32>
    %cst_6 = arith.constant dense<0.000000e+00> : vector<4x112xf32>
    %7 = tpu.matmul %5, %6, %cst_6 {dimension_numbers = #tpu.dot_dimension_numbers<[1], [0], [0], [1], [0, 0, 1, 1], [], []>} : vector<4x3xf32>, vector<3x112xf32>, vector<4x112xf32> -> vector<4x112xf32>
    %8 = vector.extract_strided_slice %4 {offsets = [0, 3], sizes = [4, 3], strides = [1, 1]} : vector<4x9xf32> to vector<4x3xf32>
    %9 = vector.extract_strided_slice %3 {offsets = [0, 112], sizes = [3, 112], strides = [1, 1]} : vector<3x336xf32> to vector<3x112xf32>
    %cst_7 = arith.constant dense<0.000000e+00> : vector<4x112xf32>
    %10 = tpu.matmul %8, %9, %cst_7 {dimension_numbers = #tpu.dot_dimension_numbers<[1], [0], [0], [1], [0, 0, 1, 1], [], []>} : vector<4x3xf32>, vector<3x112xf32>, vector<4x112xf32> -> vector<4x112xf32>
    %11 = arith.addf %7, %10 : vector<4x112xf32>
    %12 = vector.extract_strided_slice %4 {offsets = [0, 6], sizes = [4, 3], strides = [1, 1]} : vector<4x9xf32> to vector<4x3xf32>
    %13 = vector.extract_strided_slice %3 {offsets = [0, 224], sizes = [3, 112], strides = [1, 1]} : vector<3x336xf32> to vector<3x112xf32>
    %cst_8 = arith.constant dense<0.000000e+00> : vector<4x112xf32>
    %14 = tpu.matmul %12, %13, %cst_8 {dimension_numbers = #tpu.dot_dimension_numbers<[1], [0], [0], [1], [0, 0, 1, 1], [], []>} : vector<4x3xf32>, vector<3x112xf32>, vector<4x112xf32> -> vector<4x112xf32>
    %15 = arith.addf %11, %14 : vector<4x112xf32>
    %c8 = arith.constant 8 : index
    %c0_9 = arith.constant 0 : index
    %16 = vector.load %arg2[%c8, %c0_9] : memref<848x64xf32, #tpu.memory_space<vmem>>, vector<4x1xf32>
    %17 = vector.broadcast %16 : vector<4x1xf32> to vector<4x112xf32>
    %18 = arith.addf %15, %17 : vector<4x112xf32>
    %cst_10 = arith.constant 0.000000e+00 : f32
    %19 = vector.broadcast %cst_10 : f32 to vector<4x112xf32>
    %20 = arith.maximumf %18, %19 : vector<4x112xf32>
    %c224 = arith.constant 224 : index
    %c0_11 = arith.constant 0 : index
    %21 = vector.load %arg3[%c224, %c0_11] : memref<736x336xf32, #tpu.memory_space<vmem>>, vector<112x168xf32>
    %cst_12 = arith.constant dense<0.000000e+00> : vector<4x168xf32>
    %22 = tpu.matmul %20, %21, %cst_12 {dimension_numbers = #tpu.dot_dimension_numbers<[1], [0], [0], [1], [0, 0, 1, 1], [], []>} : vector<4x112xf32>, vector<112x168xf32>, vector<4x168xf32> -> vector<4x168xf32>
    %c16 = arith.constant 16 : index
    %c0_13 = arith.constant 0 : index
    %23 = vector.load %arg2[%c16, %c0_13] : memref<848x64xf32, #tpu.memory_space<vmem>>, vector<8x12xf32>
    %24 = vector.extract_strided_slice %23 {offsets = [0, 0], sizes = [8, 4], strides = [1, 1]} : vector<8x12xf32> to vector<8x4xf32>
    %25 = vector.extract_strided_slice %22 {offsets = [0, 0], sizes = [4, 56], strides = [1, 1]} : vector<4x168xf32> to vector<4x56xf32>
    %cst_14 = arith.constant dense<0.000000e+00> : vector<8x56xf32>
    %26 = tpu.matmul %24, %25, %cst_14 {dimension_numbers = #tpu.dot_dimension_numbers<[1], [0], [0], [1], [0, 0, 1, 1], [], []>} : vector<8x4xf32>, vector<4x56xf32>, vector<8x56xf32> -> vector<8x56xf32>
    %27 = vector.extract_strided_slice %23 {offsets = [0, 4], sizes = [8, 4], strides = [1, 1]} : vector<8x12xf32> to vector<8x4xf32>
    %28 = vector.extract_strided_slice %22 {offsets = [0, 56], sizes = [4, 56], strides = [1, 1]} : vector<4x168xf32> to vector<4x56xf32>
    %cst_15 = arith.constant dense<0.000000e+00> : vector<8x56xf32>
    %29 = tpu.matmul %27, %28, %cst_15 {dimension_numbers = #tpu.dot_dimension_numbers<[1], [0], [0], [1], [0, 0, 1, 1], [], []>} : vector<8x4xf32>, vector<4x56xf32>, vector<8x56xf32> -> vector<8x56xf32>
    %30 = arith.addf %26, %29 : vector<8x56xf32>
    %31 = vector.extract_strided_slice %23 {offsets = [0, 8], sizes = [8, 4], strides = [1, 1]} : vector<8x12xf32> to vector<8x4xf32>
    %32 = vector.extract_strided_slice %22 {offsets = [0, 112], sizes = [4, 56], strides = [1, 1]} : vector<4x168xf32> to vector<4x56xf32>
    %cst_16 = arith.constant dense<0.000000e+00> : vector<8x56xf32>
    %33 = tpu.matmul %31, %32, %cst_16 {dimension_numbers = #tpu.dot_dimension_numbers<[1], [0], [0], [1], [0, 0, 1, 1], [], []>} : vector<8x4xf32>, vector<4x56xf32>, vector<8x56xf32> -> vector<8x56xf32>
    %34 = arith.addf %30, %33 : vector<8x56xf32>
    %c24 = arith.constant 24 : index
    %c0_17 = arith.constant 0 : index
    %35 = vector.load %arg2[%c24, %c0_17] : memref<848x64xf32, #tpu.memory_space<vmem>>, vector<8x1xf32>
    %36 = vector.broadcast %35 : vector<8x1xf32> to vector<8x56xf32>
    %37 = arith.addf %34, %36 : vector<8x56xf32>
    %cst_18 = arith.constant 0.000000e+00 : f32
    %38 = vector.broadcast %cst_18 : f32 to vector<8x56xf32>
    %39 = arith.maximumf %37, %38 : vector<8x56xf32>
    %c336 = arith.constant 336 : index
    %c0_19 = arith.constant 0 : index
    %40 = vector.load %arg3[%c336, %c0_19] : memref<736x336xf32, #tpu.memory_space<vmem>>, vector<56x84xf32>
    %cst_20 = arith.constant dense<0.000000e+00> : vector<8x84xf32>
    %41 = tpu.matmul %39, %40, %cst_20 {dimension_numbers = #tpu.dot_dimension_numbers<[1], [0], [0], [1], [0, 0, 1, 1], [], []>} : vector<8x56xf32>, vector<56x84xf32>, vector<8x84xf32> -> vector<8x84xf32>
    %c32 = arith.constant 32 : index
    %c0_21 = arith.constant 0 : index
    %42 = vector.load %arg2[%c32, %c0_21] : memref<848x64xf32, #tpu.memory_space<vmem>>, vector<8x24xf32>
    %43 = vector.extract_strided_slice %42 {offsets = [0, 0], sizes = [8, 8], strides = [1, 1]} : vector<8x24xf32> to vector<8x8xf32>
    %44 = vector.extract_strided_slice %41 {offsets = [0, 0], sizes = [8, 28], strides = [1, 1]} : vector<8x84xf32> to vector<8x28xf32>
    %cst_22 = arith.constant dense<0.000000e+00> : vector<8x28xf32>
    %45 = tpu.matmul %43, %44, %cst_22 {dimension_numbers = #tpu.dot_dimension_numbers<[1], [0], [0], [1], [0, 0, 1, 1], [], []>} : vector<8x8xf32>, vector<8x28xf32>, vector<8x28xf32> -> vector<8x28xf32>
    %46 = vector.extract_strided_slice %42 {offsets = [0, 8], sizes = [8, 8], strides = [1, 1]} : vector<8x24xf32> to vector<8x8xf32>
    %47 = vector.extract_strided_slice %41 {offsets = [0, 28], sizes = [8, 28], strides = [1, 1]} : vector<8x84xf32> to vector<8x28xf32>
    %cst_23 = arith.constant dense<0.000000e+00> : vector<8x28xf32>
    %48 = tpu.matmul %46, %47, %cst_23 {dimension_numbers = #tpu.dot_dimension_numbers<[1], [0], [0], [1], [0, 0, 1, 1], [], []>} : vector<8x8xf32>, vector<8x28xf32>, vector<8x28xf32> -> vector<8x28xf32>
    %49 = arith.addf %45, %48 : vector<8x28xf32>
    %50 = vector.extract_strided_slice %42 {offsets = [0, 16], sizes = [8, 8], strides = [1, 1]} : vector<8x24xf32> to vector<8x8xf32>
    %51 = vector.extract_strided_slice %41 {offsets = [0, 56], sizes = [8, 28], strides = [1, 1]} : vector<8x84xf32> to vector<8x28xf32>
    %cst_24 = arith.constant dense<0.000000e+00> : vector<8x28xf32>
    %52 = tpu.matmul %50, %51, %cst_24 {dimension_numbers = #tpu.dot_dimension_numbers<[1], [0], [0], [1], [0, 0, 1, 1], [], []>} : vector<8x8xf32>, vector<8x28xf32>, vector<8x28xf32> -> vector<8x28xf32>
    %53 = arith.addf %49, %52 : vector<8x28xf32>
    %c40 = arith.constant 40 : index
    %c0_25 = arith.constant 0 : index
    %54 = vector.load %arg2[%c40, %c0_25] : memref<848x64xf32, #tpu.memory_space<vmem>>, vector<8x1xf32>
    %55 = vector.broadcast %54 : vector<8x1xf32> to vector<8x28xf32>
    %56 = arith.addf %53, %55 : vector<8x28xf32>
    %c784 = arith.constant 784 : index
    %c0_26 = arith.constant 0 : index
    %57 = vector.load %arg2[%c784, %c0_26] : memref<848x64xf32, #tpu.memory_space<vmem>>, vector<64x64xf32>
    %cst_27 = arith.constant 0.000000e+00 : f32
    %58 = vector.broadcast %cst_27 : f32 to vector<8x56xf32>
    %59 = arith.maximumf %37, %58 : vector<8x56xf32>
    %c392 = arith.constant 392 : index
    %c0_28 = arith.constant 0 : index
    %60 = vector.load %arg3[%c392, %c0_28] : memref<736x336xf32, #tpu.memory_space<vmem>>, vector<56x56xf32>
    %cst_29 = arith.constant dense<0.000000e+00> : vector<8x56xf32>
    %61 = tpu.matmul %59, %60, %cst_29 {dimension_numbers = #tpu.dot_dimension_numbers<[1], [0], [0], [1], [0, 0, 1, 1], [], []>} : vector<8x56xf32>, vector<56x56xf32>, vector<8x56xf32> -> vector<8x56xf32>
    %c48 = arith.constant 48 : index
    %c0_30 = arith.constant 0 : index
    %62 = vector.load %arg2[%c48, %c0_30] : memref<848x64xf32, #tpu.memory_space<vmem>>, vector<8x16xf32>
    %63 = vector.extract_strided_slice %62 {offsets = [0, 0], sizes = [8, 8], strides = [1, 1]} : vector<8x16xf32> to vector<8x8xf32>
    %64 = vector.extract_strided_slice %61 {offsets = [0, 0], sizes = [8, 28], strides = [1, 1]} : vector<8x56xf32> to vector<8x28xf32>
    %cst_31 = arith.constant dense<0.000000e+00> : vector<8x28xf32>
    %65 = tpu.matmul %63, %64, %cst_31 {dimension_numbers = #tpu.dot_dimension_numbers<[1], [0], [0], [1], [0, 0, 1, 1], [], []>} : vector<8x8xf32>, vector<8x28xf32>, vector<8x28xf32> -> vector<8x28xf32>
    %66 = vector.extract_strided_slice %62 {offsets = [0, 8], sizes = [8, 8], strides = [1, 1]} : vector<8x16xf32> to vector<8x8xf32>
    %67 = vector.extract_strided_slice %61 {offsets = [0, 28], sizes = [8, 28], strides = [1, 1]} : vector<8x56xf32> to vector<8x28xf32>
    %cst_32 = arith.constant dense<0.000000e+00> : vector<8x28xf32>
    %68 = tpu.matmul %66, %67, %cst_32 {dimension_numbers = #tpu.dot_dimension_numbers<[1], [0], [0], [1], [0, 0, 1, 1], [], []>} : vector<8x8xf32>, vector<8x28xf32>, vector<8x28xf32> -> vector<8x28xf32>
    %69 = arith.addf %65, %68 : vector<8x28xf32>
    %c56 = arith.constant 56 : index
    %c0_33 = arith.constant 0 : index
    %70 = vector.load %arg2[%c56, %c0_33] : memref<848x64xf32, #tpu.memory_space<vmem>>, vector<8x1xf32>
    %71 = vector.broadcast %70 : vector<8x1xf32> to vector<8x28xf32>
    %72 = arith.addf %69, %71 : vector<8x28xf32>
    %c64 = arith.constant 64 : index
    %c0_34 = arith.constant 0 : index
    %73 = vector.load %arg2[%c64, %c0_34] : memref<848x64xf32, #tpu.memory_space<vmem>>, vector<8x8xf32>
    %cst_35 = arith.constant 0.000000e+00 : f32
    %74 = vector.broadcast %cst_35 : f32 to vector<8x28xf32>
    %75 = arith.maximumf %56, %74 : vector<8x28xf32>
    %cst_36 = arith.constant dense<0.000000e+00> : vector<8x28xf32>
    %76 = tpu.matmul %73, %75, %cst_36 {dimension_numbers = #tpu.dot_dimension_numbers<[1], [0], [0], [1], [0, 0, 1, 1], [], []>} : vector<8x8xf32>, vector<8x28xf32>, vector<8x28xf32> -> vector<8x28xf32>
    %c72 = arith.constant 72 : index
    %c0_37 = arith.constant 0 : index
    %77 = vector.load %arg2[%c72, %c0_37] : memref<848x64xf32, #tpu.memory_space<vmem>>, vector<8x1xf32>
    %78 = vector.broadcast %77 : vector<8x1xf32> to vector<8x28xf32>
    %79 = arith.addf %76, %78 : vector<8x28xf32>
    %cst_38 = arith.constant 0.000000e+00 : f32
    %80 = vector.broadcast %cst_38 : f32 to vector<8x28xf32>
    %81 = arith.maximumf %72, %80 : vector<8x28xf32>
    %c448 = arith.constant 448 : index
    %c0_39 = arith.constant 0 : index
    %82 = vector.load %arg3[%c448, %c0_39] : memref<736x336xf32, #tpu.memory_space<vmem>>, vector<28x84xf32>
    %cst_40 = arith.constant dense<0.000000e+00> : vector<8x84xf32>
    %83 = tpu.matmul %81, %82, %cst_40 {dimension_numbers = #tpu.dot_dimension_numbers<[1], [0], [0], [1], [0, 0, 1, 1], [], []>} : vector<8x28xf32>, vector<28x84xf32>, vector<8x84xf32> -> vector<8x84xf32>
    %c80 = arith.constant 80 : index
    %c0_41 = arith.constant 0 : index
    %84 = vector.load %arg2[%c80, %c0_41] : memref<848x64xf32, #tpu.memory_space<vmem>>, vector<8x3xf32>
    %85 = vector.extract_strided_slice %84 {offsets = [0, 0], sizes = [8, 1], strides = [1, 1]} : vector<8x3xf32> to vector<8x1xf32>
    %86 = vector.extract_strided_slice %83 {offsets = [0, 0], sizes = [8, 28], strides = [1, 1]} : vector<8x84xf32> to vector<8x28xf32>
    %87 = vector.broadcast %85 : vector<8x1xf32> to vector<8x28xf32>
    %88 = arith.mulf %87, %86 : vector<8x28xf32>
    %89 = vector.extract_strided_slice %84 {offsets = [0, 1], sizes = [8, 1], strides = [1, 1]} : vector<8x3xf32> to vector<8x1xf32>
    %90 = vector.extract_strided_slice %83 {offsets = [0, 28], sizes = [8, 28], strides = [1, 1]} : vector<8x84xf32> to vector<8x28xf32>
    %91 = vector.broadcast %89 : vector<8x1xf32> to vector<8x28xf32>
    %92 = arith.mulf %91, %90 : vector<8x28xf32>
    %93 = arith.addf %88, %92 : vector<8x28xf32>
    %94 = vector.extract_strided_slice %84 {offsets = [0, 2], sizes = [8, 1], strides = [1, 1]} : vector<8x3xf32> to vector<8x1xf32>
    %95 = vector.extract_strided_slice %83 {offsets = [0, 56], sizes = [8, 28], strides = [1, 1]} : vector<8x84xf32> to vector<8x28xf32>
    %96 = vector.broadcast %94 : vector<8x1xf32> to vector<8x28xf32>
    %97 = arith.mulf %96, %95 : vector<8x28xf32>
    %98 = arith.addf %93, %97 : vector<8x28xf32>
    %c88 = arith.constant 88 : index
    %c0_42 = arith.constant 0 : index
    %99 = vector.load %arg2[%c88, %c0_42] : memref<848x64xf32, #tpu.memory_space<vmem>>, vector<8x8xf32>
    %cst_43 = arith.constant dense<0.000000e+00> : vector<8x28xf32>
    %100 = tpu.matmul %99, %98, %cst_43 {dimension_numbers = #tpu.dot_dimension_numbers<[1], [0], [0], [1], [0, 0, 1, 1], [], []>} : vector<8x8xf32>, vector<8x28xf32>, vector<8x28xf32> -> vector<8x28xf32>
    %c96 = arith.constant 96 : index
    %c0_44 = arith.constant 0 : index
    %101 = vector.load %arg2[%c96, %c0_44] : memref<848x64xf32, #tpu.memory_space<vmem>>, vector<8x1xf32>
    %102 = vector.broadcast %101 : vector<8x1xf32> to vector<8x28xf32>
    %103 = arith.addf %100, %102 : vector<8x28xf32>
    %cst_45 = arith.constant 0.000000e+00 : f32
    %104 = vector.broadcast %cst_45 : f32 to vector<8x28xf32>
    %105 = arith.maximumf %103, %104 : vector<8x28xf32>
    %c448_46 = arith.constant 448 : index
    %c0_47 = arith.constant 0 : index
    %106 = vector.load %arg3[%c448_46, %c0_47] : memref<736x336xf32, #tpu.memory_space<vmem>>, vector<28x84xf32>
    %cst_48 = arith.constant dense<0.000000e+00> : vector<8x84xf32>
    %107 = tpu.matmul %105, %106, %cst_48 {dimension_numbers = #tpu.dot_dimension_numbers<[1], [0], [0], [1], [0, 0, 1, 1], [], []>} : vector<8x28xf32>, vector<28x84xf32>, vector<8x84xf32> -> vector<8x84xf32>
    %c104 = arith.constant 104 : index
    %c0_49 = arith.constant 0 : index
    %108 = vector.load %arg2[%c104, %c0_49] : memref<848x64xf32, #tpu.memory_space<vmem>>, vector<8x3xf32>
    %109 = vector.extract_strided_slice %108 {offsets = [0, 0], sizes = [8, 1], strides = [1, 1]} : vector<8x3xf32> to vector<8x1xf32>
    %110 = vector.extract_strided_slice %107 {offsets = [0, 0], sizes = [8, 28], strides = [1, 1]} : vector<8x84xf32> to vector<8x28xf32>
    %111 = vector.broadcast %109 : vector<8x1xf32> to vector<8x28xf32>
    %112 = arith.mulf %111, %110 : vector<8x28xf32>
    %113 = vector.extract_strided_slice %108 {offsets = [0, 1], sizes = [8, 1], strides = [1, 1]} : vector<8x3xf32> to vector<8x1xf32>
    %114 = vector.extract_strided_slice %107 {offsets = [0, 28], sizes = [8, 28], strides = [1, 1]} : vector<8x84xf32> to vector<8x28xf32>
    %115 = vector.broadcast %113 : vector<8x1xf32> to vector<8x28xf32>
    %116 = arith.mulf %115, %114 : vector<8x28xf32>
    %117 = arith.addf %112, %116 : vector<8x28xf32>
    %118 = vector.extract_strided_slice %108 {offsets = [0, 2], sizes = [8, 1], strides = [1, 1]} : vector<8x3xf32> to vector<8x1xf32>
    %119 = vector.extract_strided_slice %107 {offsets = [0, 56], sizes = [8, 28], strides = [1, 1]} : vector<8x84xf32> to vector<8x28xf32>
    %120 = vector.broadcast %118 : vector<8x1xf32> to vector<8x28xf32>
    %121 = arith.mulf %120, %119 : vector<8x28xf32>
    %122 = arith.addf %117, %121 : vector<8x28xf32>
    %c112 = arith.constant 112 : index
    %c0_50 = arith.constant 0 : index
    %123 = vector.load %arg2[%c112, %c0_50] : memref<848x64xf32, #tpu.memory_space<vmem>>, vector<8x8xf32>
    %cst_51 = arith.constant dense<0.000000e+00> : vector<8x28xf32>
    %124 = tpu.matmul %123, %122, %cst_51 {dimension_numbers = #tpu.dot_dimension_numbers<[1], [0], [0], [1], [0, 0, 1, 1], [], []>} : vector<8x8xf32>, vector<8x28xf32>, vector<8x28xf32> -> vector<8x28xf32>
    %c120 = arith.constant 120 : index
    %c0_52 = arith.constant 0 : index
    %125 = vector.load %arg2[%c120, %c0_52] : memref<848x64xf32, #tpu.memory_space<vmem>>, vector<8x1xf32>
    %126 = vector.broadcast %125 : vector<8x1xf32> to vector<8x28xf32>
    %127 = arith.addf %124, %126 : vector<8x28xf32>
    %128 = arith.addf %127, %79 : vector<8x28xf32>
    %c480 = arith.constant 480 : index
    %c0_53 = arith.constant 0 : index
    %129 = vector.load %arg3[%c480, %c0_53] : memref<736x336xf32, #tpu.memory_space<vmem>>, vector<28x84xf32>
    %cst_54 = arith.constant dense<0.000000e+00> : vector<8x84xf32>
    %130 = tpu.matmul %72, %129, %cst_54 {dimension_numbers = #tpu.dot_dimension_numbers<[1], [0], [0], [1], [0, 0, 1, 1], [], []>} : vector<8x28xf32>, vector<28x84xf32>, vector<8x84xf32> -> vector<8x84xf32>
    %131 = vector.extract_strided_slice %130 {offsets = [0, 0], sizes = [8, 28], strides = [1, 1]} : vector<8x84xf32> to vector<8x28xf32>
    %132 = vector.extract_strided_slice %130 {offsets = [0, 28], sizes = [8, 28], strides = [1, 1]} : vector<8x84xf32> to vector<8x28xf32>
    %133 = arith.maximumf %131, %132 : vector<8x28xf32>
    %134 = vector.extract_strided_slice %130 {offsets = [0, 56], sizes = [8, 28], strides = [1, 1]} : vector<8x84xf32> to vector<8x28xf32>
    %135 = arith.maximumf %133, %134 : vector<8x28xf32>
    %cst_55 = arith.constant 0.000000e+00 : f32
    %136 = vector.broadcast %cst_55 : f32 to vector<8x28xf32>
    %137 = arith.maximumf %79, %136 : vector<8x28xf32>
    %c448_56 = arith.constant 448 : index
    %c0_57 = arith.constant 0 : index
    %138 = vector.load %arg3[%c448_56, %c0_57] : memref<736x336xf32, #tpu.memory_space<vmem>>, vector<28x84xf32>
    %cst_58 = arith.constant dense<0.000000e+00> : vector<8x84xf32>
    %139 = tpu.matmul %137, %138, %cst_58 {dimension_numbers = #tpu.dot_dimension_numbers<[1], [0], [0], [1], [0, 0, 1, 1], [], []>} : vector<8x28xf32>, vector<28x84xf32>, vector<8x84xf32> -> vector<8x84xf32>
    %c128 = arith.constant 128 : index
    %c0_59 = arith.constant 0 : index
    %140 = vector.load %arg2[%c128, %c0_59] : memref<848x64xf32, #tpu.memory_space<vmem>>, vector<8x3xf32>
    %141 = vector.extract_strided_slice %140 {offsets = [0, 0], sizes = [8, 1], strides = [1, 1]} : vector<8x3xf32> to vector<8x1xf32>
    %142 = vector.extract_strided_slice %139 {offsets = [0, 0], sizes = [8, 28], strides = [1, 1]} : vector<8x84xf32> to vector<8x28xf32>
    %143 = vector.broadcast %141 : vector<8x1xf32> to vector<8x28xf32>
    %144 = arith.mulf %143, %142 : vector<8x28xf32>
    %145 = vector.extract_strided_slice %140 {offsets = [0, 1], sizes = [8, 1], strides = [1, 1]} : vector<8x3xf32> to vector<8x1xf32>
    %146 = vector.extract_strided_slice %139 {offsets = [0, 28], sizes = [8, 28], strides = [1, 1]} : vector<8x84xf32> to vector<8x28xf32>
    %147 = vector.broadcast %145 : vector<8x1xf32> to vector<8x28xf32>
    %148 = arith.mulf %147, %146 : vector<8x28xf32>
    %149 = arith.addf %144, %148 : vector<8x28xf32>
    %150 = vector.extract_strided_slice %140 {offsets = [0, 2], sizes = [8, 1], strides = [1, 1]} : vector<8x3xf32> to vector<8x1xf32>
    %151 = vector.extract_strided_slice %139 {offsets = [0, 56], sizes = [8, 28], strides = [1, 1]} : vector<8x84xf32> to vector<8x28xf32>
    %152 = vector.broadcast %150 : vector<8x1xf32> to vector<8x28xf32>
    %153 = arith.mulf %152, %151 : vector<8x28xf32>
    %154 = arith.addf %149, %153 : vector<8x28xf32>
    %c136 = arith.constant 136 : index
    %c0_60 = arith.constant 0 : index
    %155 = vector.load %arg2[%c136, %c0_60] : memref<848x64xf32, #tpu.memory_space<vmem>>, vector<8x8xf32>
    %cst_61 = arith.constant dense<0.000000e+00> : vector<8x28xf32>
    %156 = tpu.matmul %155, %154, %cst_61 {dimension_numbers = #tpu.dot_dimension_numbers<[1], [0], [0], [1], [0, 0, 1, 1], [], []>} : vector<8x8xf32>, vector<8x28xf32>, vector<8x28xf32> -> vector<8x28xf32>
    %c144 = arith.constant 144 : index
    %c0_62 = arith.constant 0 : index
    %157 = vector.load %arg2[%c144, %c0_62] : memref<848x64xf32, #tpu.memory_space<vmem>>, vector<8x1xf32>
    %158 = vector.broadcast %157 : vector<8x1xf32> to vector<8x28xf32>
    %159 = arith.addf %156, %158 : vector<8x28xf32>
    %cst_63 = arith.constant 0.000000e+00 : f32
    %160 = vector.broadcast %cst_63 : f32 to vector<8x28xf32>
    %161 = arith.maximumf %159, %160 : vector<8x28xf32>
    %c448_64 = arith.constant 448 : index
    %c0_65 = arith.constant 0 : index
    %162 = vector.load %arg3[%c448_64, %c0_65] : memref<736x336xf32, #tpu.memory_space<vmem>>, vector<28x84xf32>
    %cst_66 = arith.constant dense<0.000000e+00> : vector<8x84xf32>
    %163 = tpu.matmul %161, %162, %cst_66 {dimension_numbers = #tpu.dot_dimension_numbers<[1], [0], [0], [1], [0, 0, 1, 1], [], []>} : vector<8x28xf32>, vector<28x84xf32>, vector<8x84xf32> -> vector<8x84xf32>
    %c152 = arith.constant 152 : index
    %c0_67 = arith.constant 0 : index
    %164 = vector.load %arg2[%c152, %c0_67] : memref<848x64xf32, #tpu.memory_space<vmem>>, vector<8x3xf32>
    %165 = vector.extract_strided_slice %164 {offsets = [0, 0], sizes = [8, 1], strides = [1, 1]} : vector<8x3xf32> to vector<8x1xf32>
    %166 = vector.extract_strided_slice %163 {offsets = [0, 0], sizes = [8, 28], strides = [1, 1]} : vector<8x84xf32> to vector<8x28xf32>
    %167 = vector.broadcast %165 : vector<8x1xf32> to vector<8x28xf32>
    %168 = arith.mulf %167, %166 : vector<8x28xf32>
    %169 = vector.extract_strided_slice %164 {offsets = [0, 1], sizes = [8, 1], strides = [1, 1]} : vector<8x3xf32> to vector<8x1xf32>
    %170 = vector.extract_strided_slice %163 {offsets = [0, 28], sizes = [8, 28], strides = [1, 1]} : vector<8x84xf32> to vector<8x28xf32>
    %171 = vector.broadcast %169 : vector<8x1xf32> to vector<8x28xf32>
    %172 = arith.mulf %171, %170 : vector<8x28xf32>
    %173 = arith.addf %168, %172 : vector<8x28xf32>
    %174 = vector.extract_strided_slice %164 {offsets = [0, 2], sizes = [8, 1], strides = [1, 1]} : vector<8x3xf32> to vector<8x1xf32>
    %175 = vector.extract_strided_slice %163 {offsets = [0, 56], sizes = [8, 28], strides = [1, 1]} : vector<8x84xf32> to vector<8x28xf32>
    %176 = vector.broadcast %174 : vector<8x1xf32> to vector<8x28xf32>
    %177 = arith.mulf %176, %175 : vector<8x28xf32>
    %178 = arith.addf %173, %177 : vector<8x28xf32>
    %c160 = arith.constant 160 : index
    %c0_68 = arith.constant 0 : index
    %179 = vector.load %arg2[%c160, %c0_68] : memref<848x64xf32, #tpu.memory_space<vmem>>, vector<8x8xf32>
    %cst_69 = arith.constant dense<0.000000e+00> : vector<8x28xf32>
    %180 = tpu.matmul %179, %178, %cst_69 {dimension_numbers = #tpu.dot_dimension_numbers<[1], [0], [0], [1], [0, 0, 1, 1], [], []>} : vector<8x8xf32>, vector<8x28xf32>, vector<8x28xf32> -> vector<8x28xf32>
    %c168 = arith.constant 168 : index
    %c0_70 = arith.constant 0 : index
    %181 = vector.load %arg2[%c168, %c0_70] : memref<848x64xf32, #tpu.memory_space<vmem>>, vector<8x1xf32>
    %182 = vector.broadcast %181 : vector<8x1xf32> to vector<8x28xf32>
    %183 = arith.addf %180, %182 : vector<8x28xf32>
    %184 = arith.addf %135, %183 : vector<8x28xf32>
    %185 = vector.extract_strided_slice %57 {offsets = [0, 0], sizes = [16, 8], strides = [1, 1]} : vector<64x64xf32> to vector<16x8xf32>
    %cst_71 = arith.constant dense<0.000000e+00> : vector<16x28xf32>
    %186 = tpu.matmul %185, %128, %cst_71 {dimension_numbers = #tpu.dot_dimension_numbers<[1], [0], [0], [1], [0, 0, 1, 1], [], []>} : vector<16x8xf32>, vector<8x28xf32>, vector<16x28xf32> -> vector<16x28xf32>
    %187 = vector.extract_strided_slice %57 {offsets = [0, 8], sizes = [16, 8], strides = [1, 1]} : vector<64x64xf32> to vector<16x8xf32>
    %cst_72 = arith.constant dense<0.000000e+00> : vector<16x28xf32>
    %188 = tpu.matmul %187, %184, %cst_72 {dimension_numbers = #tpu.dot_dimension_numbers<[1], [0], [0], [1], [0, 0, 1, 1], [], []>} : vector<16x8xf32>, vector<8x28xf32>, vector<16x28xf32> -> vector<16x28xf32>
    %189 = arith.addf %186, %188 : vector<16x28xf32>
    %c176 = arith.constant 176 : index
    %c0_73 = arith.constant 0 : index
    %190 = vector.load %arg2[%c176, %c0_73] : memref<848x64xf32, #tpu.memory_space<vmem>>, vector<16x8xf32>
    %cst_74 = arith.constant 0.000000e+00 : f32
    %191 = vector.broadcast %cst_74 : f32 to vector<8x28xf32>
    %192 = arith.maximumf %56, %191 : vector<8x28xf32>
    %cst_75 = arith.constant dense<0.000000e+00> : vector<16x28xf32>
    %193 = tpu.matmul %190, %192, %cst_75 {dimension_numbers = #tpu.dot_dimension_numbers<[1], [0], [0], [1], [0, 0, 1, 1], [], []>} : vector<16x8xf32>, vector<8x28xf32>, vector<16x28xf32> -> vector<16x28xf32>
    %c192 = arith.constant 192 : index
    %c0_76 = arith.constant 0 : index
    %194 = vector.load %arg2[%c192, %c0_76] : memref<848x64xf32, #tpu.memory_space<vmem>>, vector<16x1xf32>
    %195 = vector.broadcast %194 : vector<16x1xf32> to vector<16x28xf32>
    %196 = arith.addf %193, %195 : vector<16x28xf32>
    %c208 = arith.constant 208 : index
    %c0_77 = arith.constant 0 : index
    %197 = vector.load %arg2[%c208, %c0_77] : memref<848x64xf32, #tpu.memory_space<vmem>>, vector<16x16xf32>
    %cst_78 = arith.constant 0.000000e+00 : f32
    %198 = vector.broadcast %cst_78 : f32 to vector<16x28xf32>
    %199 = arith.maximumf %189, %198 : vector<16x28xf32>
    %cst_79 = arith.constant dense<0.000000e+00> : vector<16x28xf32>
    %200 = tpu.matmul %197, %199, %cst_79 {dimension_numbers = #tpu.dot_dimension_numbers<[1], [0], [0], [1], [0, 0, 1, 1], [], []>} : vector<16x16xf32>, vector<16x28xf32>, vector<16x28xf32> -> vector<16x28xf32>
    %c224_80 = arith.constant 224 : index
    %c0_81 = arith.constant 0 : index
    %201 = vector.load %arg2[%c224_80, %c0_81] : memref<848x64xf32, #tpu.memory_space<vmem>>, vector<16x1xf32>
    %202 = vector.broadcast %201 : vector<16x1xf32> to vector<16x28xf32>
    %203 = arith.addf %200, %202 : vector<16x28xf32>
    %c512 = arith.constant 512 : index
    %c0_82 = arith.constant 0 : index
    %204 = vector.load %arg3[%c512, %c0_82] : memref<736x336xf32, #tpu.memory_space<vmem>>, vector<28x42xf32>
    %cst_83 = arith.constant dense<0.000000e+00> : vector<16x42xf32>
    %205 = tpu.matmul %196, %204, %cst_83 {dimension_numbers = #tpu.dot_dimension_numbers<[1], [0], [0], [1], [0, 0, 1, 1], [], []>} : vector<16x28xf32>, vector<28x42xf32>, vector<16x42xf32> -> vector<16x42xf32>
    %206 = vector.extract_strided_slice %205 {offsets = [0, 0], sizes = [16, 14], strides = [1, 1]} : vector<16x42xf32> to vector<16x14xf32>
    %207 = vector.extract_strided_slice %205 {offsets = [0, 14], sizes = [16, 14], strides = [1, 1]} : vector<16x42xf32> to vector<16x14xf32>
    %208 = arith.maximumf %206, %207 : vector<16x14xf32>
    %209 = vector.extract_strided_slice %205 {offsets = [0, 28], sizes = [16, 14], strides = [1, 1]} : vector<16x42xf32> to vector<16x14xf32>
    %210 = arith.maximumf %208, %209 : vector<16x14xf32>
    %cst_84 = arith.constant 0.000000e+00 : f32
    %211 = vector.broadcast %cst_84 : f32 to vector<16x28xf32>
    %212 = arith.maximumf %203, %211 : vector<16x28xf32>
    %c544 = arith.constant 544 : index
    %c0_85 = arith.constant 0 : index
    %213 = vector.load %arg3[%c544, %c0_85] : memref<736x336xf32, #tpu.memory_space<vmem>>, vector<28x28xf32>
    %cst_86 = arith.constant dense<0.000000e+00> : vector<16x28xf32>
    %214 = tpu.matmul %212, %213, %cst_86 {dimension_numbers = #tpu.dot_dimension_numbers<[1], [0], [0], [1], [0, 0, 1, 1], [], []>} : vector<16x28xf32>, vector<28x28xf32>, vector<16x28xf32> -> vector<16x28xf32>
    %c240 = arith.constant 240 : index
    %c0_87 = arith.constant 0 : index
    %215 = vector.load %arg2[%c240, %c0_87] : memref<848x64xf32, #tpu.memory_space<vmem>>, vector<16x32xf32>
    %216 = vector.extract_strided_slice %215 {offsets = [0, 0], sizes = [16, 16], strides = [1, 1]} : vector<16x32xf32> to vector<16x16xf32>
    %217 = vector.extract_strided_slice %214 {offsets = [0, 0], sizes = [16, 14], strides = [1, 1]} : vector<16x28xf32> to vector<16x14xf32>
    %cst_88 = arith.constant dense<0.000000e+00> : vector<16x14xf32>
    %218 = tpu.matmul %216, %217, %cst_88 {dimension_numbers = #tpu.dot_dimension_numbers<[1], [0], [0], [1], [0, 0, 1, 1], [], []>} : vector<16x16xf32>, vector<16x14xf32>, vector<16x14xf32> -> vector<16x14xf32>
    %219 = vector.extract_strided_slice %215 {offsets = [0, 16], sizes = [16, 16], strides = [1, 1]} : vector<16x32xf32> to vector<16x16xf32>
    %220 = vector.extract_strided_slice %214 {offsets = [0, 14], sizes = [16, 14], strides = [1, 1]} : vector<16x28xf32> to vector<16x14xf32>
    %cst_89 = arith.constant dense<0.000000e+00> : vector<16x14xf32>
    %221 = tpu.matmul %219, %220, %cst_89 {dimension_numbers = #tpu.dot_dimension_numbers<[1], [0], [0], [1], [0, 0, 1, 1], [], []>} : vector<16x16xf32>, vector<16x14xf32>, vector<16x14xf32> -> vector<16x14xf32>
    %222 = arith.addf %218, %221 : vector<16x14xf32>
    %c256 = arith.constant 256 : index
    %c0_90 = arith.constant 0 : index
    %223 = vector.load %arg2[%c256, %c0_90] : memref<848x64xf32, #tpu.memory_space<vmem>>, vector<16x1xf32>
    %224 = vector.broadcast %223 : vector<16x1xf32> to vector<16x14xf32>
    %225 = arith.addf %222, %224 : vector<16x14xf32>
    %226 = arith.addf %210, %225 : vector<16x14xf32>
    %c576 = arith.constant 576 : index
    %c0_91 = arith.constant 0 : index
    %227 = vector.load %arg3[%c576, %c0_91] : memref<736x336xf32, #tpu.memory_space<vmem>>, vector<28x14xf32>
    %cst_92 = arith.constant dense<0.000000e+00> : vector<16x14xf32>
    %228 = tpu.matmul %203, %227, %cst_92 {dimension_numbers = #tpu.dot_dimension_numbers<[1], [0], [0], [1], [0, 0, 1, 1], [], []>} : vector<16x28xf32>, vector<28x14xf32>, vector<16x14xf32> -> vector<16x14xf32>
    %cst_93 = arith.constant 0.000000e+00 : f32
    %229 = vector.broadcast %cst_93 : f32 to vector<16x28xf32>
    %230 = arith.maximumf %196, %229 : vector<16x28xf32>
    %c608 = arith.constant 608 : index
    %c0_94 = arith.constant 0 : index
    %231 = vector.load %arg3[%c608, %c0_94] : memref<736x336xf32, #tpu.memory_space<vmem>>, vector<28x42xf32>
    %cst_95 = arith.constant dense<0.000000e+00> : vector<16x42xf32>
    %232 = tpu.matmul %230, %231, %cst_95 {dimension_numbers = #tpu.dot_dimension_numbers<[1], [0], [0], [1], [0, 0, 1, 1], [], []>} : vector<16x28xf32>, vector<28x42xf32>, vector<16x42xf32> -> vector<16x42xf32>
    %c272 = arith.constant 272 : index
    %c0_96 = arith.constant 0 : index
    %233 = vector.load %arg2[%c272, %c0_96] : memref<848x64xf32, #tpu.memory_space<vmem>>, vector<16x3xf32>
    %234 = vector.extract_strided_slice %233 {offsets = [0, 0], sizes = [16, 1], strides = [1, 1]} : vector<16x3xf32> to vector<16x1xf32>
    %235 = vector.extract_strided_slice %232 {offsets = [0, 0], sizes = [16, 14], strides = [1, 1]} : vector<16x42xf32> to vector<16x14xf32>
    %236 = vector.broadcast %234 : vector<16x1xf32> to vector<16x14xf32>
    %237 = arith.mulf %236, %235 : vector<16x14xf32>
    %238 = vector.extract_strided_slice %233 {offsets = [0, 1], sizes = [16, 1], strides = [1, 1]} : vector<16x3xf32> to vector<16x1xf32>
    %239 = vector.extract_strided_slice %232 {offsets = [0, 14], sizes = [16, 14], strides = [1, 1]} : vector<16x42xf32> to vector<16x14xf32>
    %240 = vector.broadcast %238 : vector<16x1xf32> to vector<16x14xf32>
    %241 = arith.mulf %240, %239 : vector<16x14xf32>
    %242 = arith.addf %237, %241 : vector<16x14xf32>
    %243 = vector.extract_strided_slice %233 {offsets = [0, 2], sizes = [16, 1], strides = [1, 1]} : vector<16x3xf32> to vector<16x1xf32>
    %244 = vector.extract_strided_slice %232 {offsets = [0, 28], sizes = [16, 14], strides = [1, 1]} : vector<16x42xf32> to vector<16x14xf32>
    %245 = vector.broadcast %243 : vector<16x1xf32> to vector<16x14xf32>
    %246 = arith.mulf %245, %244 : vector<16x14xf32>
    %247 = arith.addf %242, %246 : vector<16x14xf32>
    %c288 = arith.constant 288 : index
    %c0_97 = arith.constant 0 : index
    %248 = vector.load %arg2[%c288, %c0_97] : memref<848x64xf32, #tpu.memory_space<vmem>>, vector<16x16xf32>
    %cst_98 = arith.constant dense<0.000000e+00> : vector<16x14xf32>
    %249 = tpu.matmul %248, %247, %cst_98 {dimension_numbers = #tpu.dot_dimension_numbers<[1], [0], [0], [1], [0, 0, 1, 1], [], []>} : vector<16x16xf32>, vector<16x14xf32>, vector<16x14xf32> -> vector<16x14xf32>
    %c304 = arith.constant 304 : index
    %c0_99 = arith.constant 0 : index
    %250 = vector.load %arg2[%c304, %c0_99] : memref<848x64xf32, #tpu.memory_space<vmem>>, vector<16x1xf32>
    %251 = vector.broadcast %250 : vector<16x1xf32> to vector<16x14xf32>
    %252 = arith.addf %249, %251 : vector<16x14xf32>
    %cst_100 = arith.constant 0.000000e+00 : f32
    %253 = vector.broadcast %cst_100 : f32 to vector<16x14xf32>
    %254 = arith.maximumf %252, %253 : vector<16x14xf32>
    %c640 = arith.constant 640 : index
    %c0_101 = arith.constant 0 : index
    %255 = vector.load %arg3[%c640, %c0_101] : memref<736x336xf32, #tpu.memory_space<vmem>>, vector<14x42xf32>
    %cst_102 = arith.constant dense<0.000000e+00> : vector<16x42xf32>
    %256 = tpu.matmul %254, %255, %cst_102 {dimension_numbers = #tpu.dot_dimension_numbers<[1], [0], [0], [1], [0, 0, 1, 1], [], []>} : vector<16x14xf32>, vector<14x42xf32>, vector<16x42xf32> -> vector<16x42xf32>
    %c320 = arith.constant 320 : index
    %c0_103 = arith.constant 0 : index
    %257 = vector.load %arg2[%c320, %c0_103] : memref<848x64xf32, #tpu.memory_space<vmem>>, vector<16x3xf32>
    %258 = vector.extract_strided_slice %257 {offsets = [0, 0], sizes = [16, 1], strides = [1, 1]} : vector<16x3xf32> to vector<16x1xf32>
    %259 = vector.extract_strided_slice %256 {offsets = [0, 0], sizes = [16, 14], strides = [1, 1]} : vector<16x42xf32> to vector<16x14xf32>
    %260 = vector.broadcast %258 : vector<16x1xf32> to vector<16x14xf32>
    %261 = arith.mulf %260, %259 : vector<16x14xf32>
    %262 = vector.extract_strided_slice %257 {offsets = [0, 1], sizes = [16, 1], strides = [1, 1]} : vector<16x3xf32> to vector<16x1xf32>
    %263 = vector.extract_strided_slice %256 {offsets = [0, 14], sizes = [16, 14], strides = [1, 1]} : vector<16x42xf32> to vector<16x14xf32>
    %264 = vector.broadcast %262 : vector<16x1xf32> to vector<16x14xf32>
    %265 = arith.mulf %264, %263 : vector<16x14xf32>
    %266 = arith.addf %261, %265 : vector<16x14xf32>
    %267 = vector.extract_strided_slice %257 {offsets = [0, 2], sizes = [16, 1], strides = [1, 1]} : vector<16x3xf32> to vector<16x1xf32>
    %268 = vector.extract_strided_slice %256 {offsets = [0, 28], sizes = [16, 14], strides = [1, 1]} : vector<16x42xf32> to vector<16x14xf32>
    %269 = vector.broadcast %267 : vector<16x1xf32> to vector<16x14xf32>
    %270 = arith.mulf %269, %268 : vector<16x14xf32>
    %271 = arith.addf %266, %270 : vector<16x14xf32>
    %c336_104 = arith.constant 336 : index
    %c0_105 = arith.constant 0 : index
    %272 = vector.load %arg2[%c336_104, %c0_105] : memref<848x64xf32, #tpu.memory_space<vmem>>, vector<16x16xf32>
    %cst_106 = arith.constant dense<0.000000e+00> : vector<16x14xf32>
    %273 = tpu.matmul %272, %271, %cst_106 {dimension_numbers = #tpu.dot_dimension_numbers<[1], [0], [0], [1], [0, 0, 1, 1], [], []>} : vector<16x16xf32>, vector<16x14xf32>, vector<16x14xf32> -> vector<16x14xf32>
    %c352 = arith.constant 352 : index
    %c0_107 = arith.constant 0 : index
    %274 = vector.load %arg2[%c352, %c0_107] : memref<848x64xf32, #tpu.memory_space<vmem>>, vector<16x1xf32>
    %275 = vector.broadcast %274 : vector<16x1xf32> to vector<16x14xf32>
    %276 = arith.addf %273, %275 : vector<16x14xf32>
    %277 = arith.addf %228, %276 : vector<16x14xf32>
    %278 = vector.extract_strided_slice %57 {offsets = [0, 0], sizes = [32, 16], strides = [1, 1]} : vector<64x64xf32> to vector<32x16xf32>
    %cst_108 = arith.constant dense<0.000000e+00> : vector<32x14xf32>
    %279 = tpu.matmul %278, %226, %cst_108 {dimension_numbers = #tpu.dot_dimension_numbers<[1], [0], [0], [1], [0, 0, 1, 1], [], []>} : vector<32x16xf32>, vector<16x14xf32>, vector<32x14xf32> -> vector<32x14xf32>
    %280 = vector.extract_strided_slice %57 {offsets = [0, 16], sizes = [32, 16], strides = [1, 1]} : vector<64x64xf32> to vector<32x16xf32>
    %cst_109 = arith.constant dense<0.000000e+00> : vector<32x14xf32>
    %281 = tpu.matmul %280, %277, %cst_109 {dimension_numbers = #tpu.dot_dimension_numbers<[1], [0], [0], [1], [0, 0, 1, 1], [], []>} : vector<32x16xf32>, vector<16x14xf32>, vector<32x14xf32> -> vector<32x14xf32>
    %282 = arith.addf %279, %281 : vector<32x14xf32>
    %cst_110 = arith.constant 0.000000e+00 : f32
    %283 = vector.broadcast %cst_110 : f32 to vector<16x28xf32>
    %284 = arith.maximumf %189, %283 : vector<16x28xf32>
    %c544_111 = arith.constant 544 : index
    %c0_112 = arith.constant 0 : index
    %285 = vector.load %arg3[%c544_111, %c0_112] : memref<736x336xf32, #tpu.memory_space<vmem>>, vector<28x28xf32>
    %cst_113 = arith.constant dense<0.000000e+00> : vector<16x28xf32>
    %286 = tpu.matmul %284, %285, %cst_113 {dimension_numbers = #tpu.dot_dimension_numbers<[1], [0], [0], [1], [0, 0, 1, 1], [], []>} : vector<16x28xf32>, vector<28x28xf32>, vector<16x28xf32> -> vector<16x28xf32>
    %c368 = arith.constant 368 : index
    %c0_114 = arith.constant 0 : index
    %287 = vector.load %arg2[%c368, %c0_114] : memref<848x64xf32, #tpu.memory_space<vmem>>, vector<32x32xf32>
    %288 = vector.extract_strided_slice %287 {offsets = [0, 0], sizes = [32, 16], strides = [1, 1]} : vector<32x32xf32> to vector<32x16xf32>
    %289 = vector.extract_strided_slice %286 {offsets = [0, 0], sizes = [16, 14], strides = [1, 1]} : vector<16x28xf32> to vector<16x14xf32>
    %cst_115 = arith.constant dense<0.000000e+00> : vector<32x14xf32>
    %290 = tpu.matmul %288, %289, %cst_115 {dimension_numbers = #tpu.dot_dimension_numbers<[1], [0], [0], [1], [0, 0, 1, 1], [], []>} : vector<32x16xf32>, vector<16x14xf32>, vector<32x14xf32> -> vector<32x14xf32>
    %291 = vector.extract_strided_slice %287 {offsets = [0, 16], sizes = [32, 16], strides = [1, 1]} : vector<32x32xf32> to vector<32x16xf32>
    %292 = vector.extract_strided_slice %286 {offsets = [0, 14], sizes = [16, 14], strides = [1, 1]} : vector<16x28xf32> to vector<16x14xf32>
    %cst_116 = arith.constant dense<0.000000e+00> : vector<32x14xf32>
    %293 = tpu.matmul %291, %292, %cst_116 {dimension_numbers = #tpu.dot_dimension_numbers<[1], [0], [0], [1], [0, 0, 1, 1], [], []>} : vector<32x16xf32>, vector<16x14xf32>, vector<32x14xf32> -> vector<32x14xf32>
    %294 = arith.addf %290, %293 : vector<32x14xf32>
    %c400 = arith.constant 400 : index
    %c0_117 = arith.constant 0 : index
    %295 = vector.load %arg2[%c400, %c0_117] : memref<848x64xf32, #tpu.memory_space<vmem>>, vector<32x1xf32>
    %296 = vector.broadcast %295 : vector<32x1xf32> to vector<32x14xf32>
    %297 = arith.addf %294, %296 : vector<32x14xf32>
    %c432 = arith.constant 432 : index
    %c0_118 = arith.constant 0 : index
    %298 = vector.load %arg2[%c432, %c0_118] : memref<848x64xf32, #tpu.memory_space<vmem>>, vector<32x32xf32>
    %cst_119 = arith.constant 0.000000e+00 : f32
    %299 = vector.broadcast %cst_119 : f32 to vector<32x14xf32>
    %300 = arith.maximumf %282, %299 : vector<32x14xf32>
    %cst_120 = arith.constant dense<0.000000e+00> : vector<32x14xf32>
    %301 = tpu.matmul %298, %300, %cst_120 {dimension_numbers = #tpu.dot_dimension_numbers<[1], [0], [0], [1], [0, 0, 1, 1], [], []>} : vector<32x32xf32>, vector<32x14xf32>, vector<32x14xf32> -> vector<32x14xf32>
    %c464 = arith.constant 464 : index
    %c0_121 = arith.constant 0 : index
    %302 = vector.load %arg2[%c464, %c0_121] : memref<848x64xf32, #tpu.memory_space<vmem>>, vector<32x1xf32>
    %303 = vector.broadcast %302 : vector<32x1xf32> to vector<32x14xf32>
    %304 = arith.addf %301, %303 : vector<32x14xf32>
    %c656 = arith.constant 656 : index
    %c0_122 = arith.constant 0 : index
    %305 = vector.load %arg3[%c656, %c0_122] : memref<736x336xf32, #tpu.memory_space<vmem>>, vector<14x21xf32>
    %cst_123 = arith.constant dense<0.000000e+00> : vector<32x21xf32>
    %306 = tpu.matmul %297, %305, %cst_123 {dimension_numbers = #tpu.dot_dimension_numbers<[1], [0], [0], [1], [0, 0, 1, 1], [], []>} : vector<32x14xf32>, vector<14x21xf32>, vector<32x21xf32> -> vector<32x21xf32>
    %307 = vector.extract_strided_slice %306 {offsets = [0, 0], sizes = [32, 7], strides = [1, 1]} : vector<32x21xf32> to vector<32x7xf32>
    %308 = vector.extract_strided_slice %306 {offsets = [0, 7], sizes = [32, 7], strides = [1, 1]} : vector<32x21xf32> to vector<32x7xf32>
    %309 = arith.maximumf %307, %308 : vector<32x7xf32>
    %310 = vector.extract_strided_slice %306 {offsets = [0, 14], sizes = [32, 7], strides = [1, 1]} : vector<32x21xf32> to vector<32x7xf32>
    %311 = arith.maximumf %309, %310 : vector<32x7xf32>
    %cst_124 = arith.constant 0.000000e+00 : f32
    %312 = vector.broadcast %cst_124 : f32 to vector<32x14xf32>
    %313 = arith.maximumf %304, %312 : vector<32x14xf32>
    %c672 = arith.constant 672 : index
    %c0_125 = arith.constant 0 : index
    %314 = vector.load %arg3[%c672, %c0_125] : memref<736x336xf32, #tpu.memory_space<vmem>>, vector<14x14xf32>
    %cst_126 = arith.constant dense<0.000000e+00> : vector<32x14xf32>
    %315 = tpu.matmul %313, %314, %cst_126 {dimension_numbers = #tpu.dot_dimension_numbers<[1], [0], [0], [1], [0, 0, 1, 1], [], []>} : vector<32x14xf32>, vector<14x14xf32>, vector<32x14xf32> -> vector<32x14xf32>
    %c496 = arith.constant 496 : index
    %c0_127 = arith.constant 0 : index
    %316 = vector.load %arg2[%c496, %c0_127] : memref<848x64xf32, #tpu.memory_space<vmem>>, vector<32x64xf32>
    %317 = vector.extract_strided_slice %316 {offsets = [0, 0], sizes = [32, 32], strides = [1, 1]} : vector<32x64xf32> to vector<32x32xf32>
    %318 = vector.extract_strided_slice %315 {offsets = [0, 0], sizes = [32, 7], strides = [1, 1]} : vector<32x14xf32> to vector<32x7xf32>
    %cst_128 = arith.constant dense<0.000000e+00> : vector<32x7xf32>
    %319 = tpu.matmul %317, %318, %cst_128 {dimension_numbers = #tpu.dot_dimension_numbers<[1], [0], [0], [1], [0, 0, 1, 1], [], []>} : vector<32x32xf32>, vector<32x7xf32>, vector<32x7xf32> -> vector<32x7xf32>
    %320 = vector.extract_strided_slice %316 {offsets = [0, 32], sizes = [32, 32], strides = [1, 1]} : vector<32x64xf32> to vector<32x32xf32>
    %321 = vector.extract_strided_slice %315 {offsets = [0, 7], sizes = [32, 7], strides = [1, 1]} : vector<32x14xf32> to vector<32x7xf32>
    %cst_129 = arith.constant dense<0.000000e+00> : vector<32x7xf32>
    %322 = tpu.matmul %320, %321, %cst_129 {dimension_numbers = #tpu.dot_dimension_numbers<[1], [0], [0], [1], [0, 0, 1, 1], [], []>} : vector<32x32xf32>, vector<32x7xf32>, vector<32x7xf32> -> vector<32x7xf32>
    %323 = arith.addf %319, %322 : vector<32x7xf32>
    %c528 = arith.constant 528 : index
    %c0_130 = arith.constant 0 : index
    %324 = vector.load %arg2[%c528, %c0_130] : memref<848x64xf32, #tpu.memory_space<vmem>>, vector<32x1xf32>
    %325 = vector.broadcast %324 : vector<32x1xf32> to vector<32x7xf32>
    %326 = arith.addf %323, %325 : vector<32x7xf32>
    %327 = arith.addf %311, %326 : vector<32x7xf32>
    %c688 = arith.constant 688 : index
    %c0_131 = arith.constant 0 : index
    %328 = vector.load %arg3[%c688, %c0_131] : memref<736x336xf32, #tpu.memory_space<vmem>>, vector<14x7xf32>
    %cst_132 = arith.constant dense<0.000000e+00> : vector<32x7xf32>
    %329 = tpu.matmul %304, %328, %cst_132 {dimension_numbers = #tpu.dot_dimension_numbers<[1], [0], [0], [1], [0, 0, 1, 1], [], []>} : vector<32x14xf32>, vector<14x7xf32>, vector<32x7xf32> -> vector<32x7xf32>
    %cst_133 = arith.constant 0.000000e+00 : f32
    %330 = vector.broadcast %cst_133 : f32 to vector<32x14xf32>
    %331 = arith.maximumf %297, %330 : vector<32x14xf32>
    %c704 = arith.constant 704 : index
    %c0_134 = arith.constant 0 : index
    %332 = vector.load %arg3[%c704, %c0_134] : memref<736x336xf32, #tpu.memory_space<vmem>>, vector<14x21xf32>
    %cst_135 = arith.constant dense<0.000000e+00> : vector<32x21xf32>
    %333 = tpu.matmul %331, %332, %cst_135 {dimension_numbers = #tpu.dot_dimension_numbers<[1], [0], [0], [1], [0, 0, 1, 1], [], []>} : vector<32x14xf32>, vector<14x21xf32>, vector<32x21xf32> -> vector<32x21xf32>
    %c560 = arith.constant 560 : index
    %c0_136 = arith.constant 0 : index
    %334 = vector.load %arg2[%c560, %c0_136] : memref<848x64xf32, #tpu.memory_space<vmem>>, vector<32x3xf32>
    %335 = vector.extract_strided_slice %334 {offsets = [0, 0], sizes = [32, 1], strides = [1, 1]} : vector<32x3xf32> to vector<32x1xf32>
    %336 = vector.extract_strided_slice %333 {offsets = [0, 0], sizes = [32, 7], strides = [1, 1]} : vector<32x21xf32> to vector<32x7xf32>
    %337 = vector.broadcast %335 : vector<32x1xf32> to vector<32x7xf32>
    %338 = arith.mulf %337, %336 : vector<32x7xf32>
    %339 = vector.extract_strided_slice %334 {offsets = [0, 1], sizes = [32, 1], strides = [1, 1]} : vector<32x3xf32> to vector<32x1xf32>
    %340 = vector.extract_strided_slice %333 {offsets = [0, 7], sizes = [32, 7], strides = [1, 1]} : vector<32x21xf32> to vector<32x7xf32>
    %341 = vector.broadcast %339 : vector<32x1xf32> to vector<32x7xf32>
    %342 = arith.mulf %341, %340 : vector<32x7xf32>
    %343 = arith.addf %338, %342 : vector<32x7xf32>
    %344 = vector.extract_strided_slice %334 {offsets = [0, 2], sizes = [32, 1], strides = [1, 1]} : vector<32x3xf32> to vector<32x1xf32>
    %345 = vector.extract_strided_slice %333 {offsets = [0, 14], sizes = [32, 7], strides = [1, 1]} : vector<32x21xf32> to vector<32x7xf32>
    %346 = vector.broadcast %344 : vector<32x1xf32> to vector<32x7xf32>
    %347 = arith.mulf %346, %345 : vector<32x7xf32>
    %348 = arith.addf %343, %347 : vector<32x7xf32>
    %c592 = arith.constant 592 : index
    %c0_137 = arith.constant 0 : index
    %349 = vector.load %arg2[%c592, %c0_137] : memref<848x64xf32, #tpu.memory_space<vmem>>, vector<32x32xf32>
    %cst_138 = arith.constant dense<0.000000e+00> : vector<32x7xf32>
    %350 = tpu.matmul %349, %348, %cst_138 {dimension_numbers = #tpu.dot_dimension_numbers<[1], [0], [0], [1], [0, 0, 1, 1], [], []>} : vector<32x32xf32>, vector<32x7xf32>, vector<32x7xf32> -> vector<32x7xf32>
    %c624 = arith.constant 624 : index
    %c0_139 = arith.constant 0 : index
    %351 = vector.load %arg2[%c624, %c0_139] : memref<848x64xf32, #tpu.memory_space<vmem>>, vector<32x1xf32>
    %352 = vector.broadcast %351 : vector<32x1xf32> to vector<32x7xf32>
    %353 = arith.addf %350, %352 : vector<32x7xf32>
    %cst_140 = arith.constant 0.000000e+00 : f32
    %354 = vector.broadcast %cst_140 : f32 to vector<32x7xf32>
    %355 = arith.maximumf %353, %354 : vector<32x7xf32>
    %c720 = arith.constant 720 : index
    %c0_141 = arith.constant 0 : index
    %356 = vector.load %arg3[%c720, %c0_141] : memref<736x336xf32, #tpu.memory_space<vmem>>, vector<7x21xf32>
    %cst_142 = arith.constant dense<0.000000e+00> : vector<32x21xf32>
    %357 = tpu.matmul %355, %356, %cst_142 {dimension_numbers = #tpu.dot_dimension_numbers<[1], [0], [0], [1], [0, 0, 1, 1], [], []>} : vector<32x7xf32>, vector<7x21xf32>, vector<32x21xf32> -> vector<32x21xf32>
    %c656_143 = arith.constant 656 : index
    %c0_144 = arith.constant 0 : index
    %358 = vector.load %arg2[%c656_143, %c0_144] : memref<848x64xf32, #tpu.memory_space<vmem>>, vector<32x3xf32>
    %359 = vector.extract_strided_slice %358 {offsets = [0, 0], sizes = [32, 1], strides = [1, 1]} : vector<32x3xf32> to vector<32x1xf32>
    %360 = vector.extract_strided_slice %357 {offsets = [0, 0], sizes = [32, 7], strides = [1, 1]} : vector<32x21xf32> to vector<32x7xf32>
    %361 = vector.broadcast %359 : vector<32x1xf32> to vector<32x7xf32>
    %362 = arith.mulf %361, %360 : vector<32x7xf32>
    %363 = vector.extract_strided_slice %358 {offsets = [0, 1], sizes = [32, 1], strides = [1, 1]} : vector<32x3xf32> to vector<32x1xf32>
    %364 = vector.extract_strided_slice %357 {offsets = [0, 7], sizes = [32, 7], strides = [1, 1]} : vector<32x21xf32> to vector<32x7xf32>
    %365 = vector.broadcast %363 : vector<32x1xf32> to vector<32x7xf32>
    %366 = arith.mulf %365, %364 : vector<32x7xf32>
    %367 = arith.addf %362, %366 : vector<32x7xf32>
    %368 = vector.extract_strided_slice %358 {offsets = [0, 2], sizes = [32, 1], strides = [1, 1]} : vector<32x3xf32> to vector<32x1xf32>
    %369 = vector.extract_strided_slice %357 {offsets = [0, 14], sizes = [32, 7], strides = [1, 1]} : vector<32x21xf32> to vector<32x7xf32>
    %370 = vector.broadcast %368 : vector<32x1xf32> to vector<32x7xf32>
    %371 = arith.mulf %370, %369 : vector<32x7xf32>
    %372 = arith.addf %367, %371 : vector<32x7xf32>
    %c688_145 = arith.constant 688 : index
    %c0_146 = arith.constant 0 : index
    %373 = vector.load %arg2[%c688_145, %c0_146] : memref<848x64xf32, #tpu.memory_space<vmem>>, vector<32x32xf32>
    %cst_147 = arith.constant dense<0.000000e+00> : vector<32x7xf32>
    %374 = tpu.matmul %373, %372, %cst_147 {dimension_numbers = #tpu.dot_dimension_numbers<[1], [0], [0], [1], [0, 0, 1, 1], [], []>} : vector<32x32xf32>, vector<32x7xf32>, vector<32x7xf32> -> vector<32x7xf32>
    %c720_148 = arith.constant 720 : index
    %c0_149 = arith.constant 0 : index
    %375 = vector.load %arg2[%c720_148, %c0_149] : memref<848x64xf32, #tpu.memory_space<vmem>>, vector<32x1xf32>
    %376 = vector.broadcast %375 : vector<32x1xf32> to vector<32x7xf32>
    %377 = arith.addf %374, %376 : vector<32x7xf32>
    %378 = arith.addf %329, %377 : vector<32x7xf32>
    %379 = vector.extract_strided_slice %57 {offsets = [0, 0], sizes = [64, 32], strides = [1, 1]} : vector<64x64xf32> to vector<64x32xf32>
    %cst_150 = arith.constant dense<0.000000e+00> : vector<64x7xf32>
    %380 = tpu.matmul %379, %327, %cst_150 {dimension_numbers = #tpu.dot_dimension_numbers<[1], [0], [0], [1], [0, 0, 1, 1], [], []>} : vector<64x32xf32>, vector<32x7xf32>, vector<64x7xf32> -> vector<64x7xf32>
    %381 = vector.extract_strided_slice %57 {offsets = [0, 32], sizes = [64, 32], strides = [1, 1]} : vector<64x64xf32> to vector<64x32xf32>
    %cst_151 = arith.constant dense<0.000000e+00> : vector<64x7xf32>
    %382 = tpu.matmul %381, %378, %cst_151 {dimension_numbers = #tpu.dot_dimension_numbers<[1], [0], [0], [1], [0, 0, 1, 1], [], []>} : vector<64x32xf32>, vector<32x7xf32>, vector<64x7xf32> -> vector<64x7xf32>
    %383 = arith.addf %380, %382 : vector<64x7xf32>
    %c728 = arith.constant 728 : index
    %c0_152 = arith.constant 0 : index
    %384 = vector.load %arg3[%c728, %c0_152] : memref<736x336xf32, #tpu.memory_space<vmem>>, vector<7x1xf32>
    %cst_153 = arith.constant dense<0.000000e+00> : vector<64x1xf32>
    %385 = tpu.matmul %383, %384, %cst_153 {dimension_numbers = #tpu.dot_dimension_numbers<[1], [0], [0], [1], [0, 0, 1, 1], [], []>} : vector<64x7xf32>, vector<7x1xf32>, vector<64x1xf32> -> vector<64x1xf32>
    %c752 = arith.constant 752 : index
    %c0_154 = arith.constant 0 : index
    %386 = vector.load %arg2[%c752, %c0_154] : memref<848x64xf32, #tpu.memory_space<vmem>>, vector<10x64xf32>
    %cst_155 = arith.constant dense<0.000000e+00> : vector<10x1xf32>
    %387 = tpu.matmul %386, %385, %cst_155 {dimension_numbers = #tpu.dot_dimension_numbers<[1], [0], [0], [1], [0, 0, 1, 1], [], []>} : vector<10x64xf32>, vector<64x1xf32>, vector<10x1xf32> -> vector<10x1xf32>
    %c768 = arith.constant 768 : index
    %c0_156 = arith.constant 0 : index
    %388 = vector.load %arg2[%c768, %c0_156] : memref<848x64xf32, #tpu.memory_space<vmem>>, vector<10x1xf32>
    %389 = arith.addf %387, %388 : vector<10x1xf32>
    %c0_157 = arith.constant 0 : index
    %c0_158 = arith.constant 0 : index
    %c0_159 = arith.constant 0 : index
    %390 = vector.load %arg4[%c0_157, %c0_158, %c0_159] : memref<1x10x1xf32, #tpu.memory_space<vmem>>, vector<1x10x1xf32>
    %391 = vector.shape_cast %390 : vector<1x10x1xf32> to vector<10x1xf32>
    %392 = vector.shape_cast %389 : vector<10x1xf32> to vector<1x10x1xf32>
    tpu.vector_store %arg4[%c0_157, %c0_158, %c0_159], %392 {strides = array<i32>} : memref<1x10x1xf32, #tpu.memory_space<vmem>>, vector<1x10x1xf32>,
    return
  }
  func.func @transform_0(%arg0: i32) -> (i32, i32, i32) {
    %c0_i32 = arith.constant 0 : i32
    %c0_i32_0 = arith.constant 0 : i32
    %c0_i32_1 = arith.constant 0 : i32
    return %arg0, %c0_i32, %c0_i32_0 : i32, i32, i32
  }
  func.func @transform_1(%arg0: i32) -> (i32, i32) {
    %c0_i32 = arith.constant 0 : i32
    %c0_i32_0 = arith.constant 0 : i32
    %c0_i32_1 = arith.constant 0 : i32
    return %c0_i32, %c0_i32_0 : i32, i32
  }
  func.func @transform_2(%arg0: i32) -> (i32, i32) {
    %c0_i32 = arith.constant 0 : i32
    %c0_i32_0 = arith.constant 0 : i32
    %c0_i32_1 = arith.constant 0 : i32
    return %c0_i32, %c0_i32_0 : i32, i32
  }
  func.func @transform_3(%arg0: i32) -> (i32, i32, i32) {
    %c0_i32 = arith.constant 0 : i32
    %c0_i32_0 = arith.constant 0 : i32
    %c0_i32_1 = arith.constant 0 : i32
    return %arg0, %c0_i32, %c0_i32_0 : i32, i32, i32
  }
}

</mosaic_0001>

<bundles_post_ra>
// kernel: forward.1
= control target key start
LH: loop header
LB: loop body
LE: loop exit
PB: predicated region body
PF: predicated region fallthrough
CT: control target
= control target key end

     0   :  { %s7741_s12 = smov 0   ;;  %s9264_s0 = inlined_call_operand.vmem [shape: f32[2,3,224], index: 0, kind: input, shape index: {}]   ;;  %s9265_s1 = inlined_call_operand.vmem [shape: f32[848,64], index: 1, kind: input, shape index: {}]   ;;  %s9266_s2 = inlined_call_operand.vmem [shape: f32[736,336], index: 2, kind: input, shape index: {}]   ;;  %s9267_s3 = inlined_call_operand.vmem [shape: f32[2,10,1], index: 3, kind: output, shape index: {}]  }
   0x1 LB: > { %s6241_s13 = sadd.s32 4294967295, %s7700_s12   ;;  %p6245_p0 = scmp.ge.s32.totalorder %s7700_s12, 1  ;;  %s7700_s12 = sphi %s7741_s12, %s13_s12  }
   0x2   : > { %p137_p1 = scmp.lt.s32.totalorder %s7700_s12, 3 }
   0x4   : > { %p138_p2 = pnand %p6245_p0, %p137_p1 }
   0x5   : > { %v173_v0 = vld [vmem:[%s9266_s2 + $0x8] sm:$0xff] (!%p138_p2)  ;;  %v176_v1 = vld [vmem:[%s9266_s2 + $0x20] sm:$0xff] (!%p138_p2)  ;;  %v175_v4 = vld [vmem:[%s9266_s2 + $0x18] sm:$0xff] (!%p138_p2)  ;;  %v7702_v7 = vmov (!%p138_p2), 0.0|0.0   ;;  %p7832_p3 = scmp.lt.s32.totalorder (!%p138_p2), %s6241_s13, 1  ;;  %vm258_vm0 = vcmask (!%p138_p2), 785408  }
   0x6   : > { %141 = sbr.rel (%p138_p2) target bundleno = 7492 (0x1d44), region = 32  ;;  %v172_v2 = vld [vmem:[%s9266_s2] sm:$0xff] (!%p138_p2)  ;;  %v7197_v3 = vpack.c.bf16 (!%p138_p2), %v176_v1, %v173_v0  ;;  %v179_v5 = vld [vmem:[%s9266_s2 + $0x38] sm:$0xff] (!%p138_p2)  ;;  %v182_v6 = vld [vmem:[%s9266_s2 + $0x50] sm:$0xff] (!%p138_p2)  ;;  %7253 = vmatprep.subr.bf16.mxu1 (!%p138_p2), %v7702_v7  ;;  %s7703_s6 = smov (!%p138_p2), 125   ;;  %vm7705_vm1 = vmmov (!%p138_p2), 0  }
   0x7   : > { %v7199_v8 = vpack.c.bf16 (!%p138_p2), %v175_v4, %v172_v2  ;;  %v7201_v9 = vpack.c.bf16 (!%p138_p2), %v182_v6, %v179_v5  ;;  %v178_v10 = vld [vmem:[%s9266_s2 + $0x30] sm:$0xff] (!%p138_p2)  ;;  %v181_v11 = vld [vmem:[%s9266_s2 + $0x48] sm:$0xff] (!%p138_p2)  ;;  %v188_v13 = vld [vmem:[%s9266_s2 + $0x80] sm:$0xff] (!%p138_p2)  ;;  %vm417_vm2 = vcmask (!%p138_p2), 1042432   ;;  %vm414_vm3 = vcmask (!%p138_p2), 23552   ;;  %s7707_s27 = smov (!%p138_p2), 16  }
   0x8   : > { %v185_v12 = vld [vmem:[%s9266_s2 + $0x68] sm:$0xff] (!%p138_p2)  ;;  %7198 = vmatprep.subr.bf16.mxu0 (!%p138_p2), %v7197_v3  ;;  %v174_v14 = vld [vmem:[%s9266_s2 + $0x10] sm:$0xff] (!%p138_p2)  ;;  %v7203_v16 = vpack.c.bf16 (!%p138_p2), %v181_v11, %v178_v10  ;;  %v184_v18 = vld [vmem:[%s9266_s2 + $0x60] sm:$0xff] (!%p138_p2)  ;;  %s7708_s5 = smov (!%p138_p2), 32   ;;  %vm412_vm4 = vcmask (!%p138_p2), 130048   ;;  %vm571_vm5 = vcmask (!%p138_p2), 261120  }
   0x9   : > { %v177_v15 = vld [vmem:[%s9266_s2 + $0x28] sm:$0xff] (!%p138_p2)  ;;  %7200 = vmatpush1.bf16.msra.mxu0 (!%p138_p2), %v7199_v8  ;;  %v7205_v19 = vpack.c.bf16 (!%p138_p2), %v188_v13, %v185_v12  ;;  %v187_v20 = vld [vmem:[%s9266_s2 + $0x78] sm:$0xff] (!%p138_p2)  ;;  %v180_v21 = vld [vmem:[%s9266_s2 + $0x40] sm:$0xff] (!%p138_p2)  ;;  %vm684_vm6 = vcmask (!%p138_p2), 916480   ;;  %s7710_s28 = smov (!%p138_p2), 72   ;;  %vm769_vm7 = vcmask (!%p138_p2), 1043456  }
   0xa   : > { %v7254_v17 = vpack.c.bf16 (!%p138_p2), %v177_v15, %v174_v14  ;;  %7202 = vmatprep.subr.bf16.mxu0 (!%p138_p2), %v7201_v9  ;;  %v183_v22 = vld [vmem:[%s9266_s2 + $0x58] sm:$0xff] (!%p138_p2)  ;;  %v194_v24 = vld [vmem:[%s9266_s2 + $0xb0] sm:$0xff] (!%p138_p2)  ;;  %v189_v27 = vld [vmem:[%s9266_s2 + $0x88] sm:$0xff] (!%p138_p2)  ;;  %v7207_v28 = vpack.c.bf16 (!%p138_p2), %v187_v20, %v184_v18  ;;  %vm766_vm8 = vcmask (!%p138_p2), 31744   ;;  %vm1014_vm9 = vcmask (!%p138_p2), 457728   ;;  %s7713_s25 = smov (!%p138_p2), 112  }
   0xb   : > { %v191_v23 = vld [vmem:[%s9266_s2 + $0x98] sm:$0xff] (!%p138_p2)  ;;  %v7257_v25 = vpack.c.bf16 (!%p138_p2), %v183_v22, %v180_v21  ;;  %v186_v26 = vld [vmem:[%s9266_s2 + $0x70] sm:$0xff] (!%p138_p2)  ;;  %v193_v31 = vld [vmem:[%s9266_s2 + $0xa8] sm:$0xff] (!%p138_p2)  ;;  %vm1096_vm10 = vcmask (!%p138_p2), 64512   ;;  %s7715_s15 = smov (!%p138_p2), 100   ;;  %vm7716_vm11 = vmmov (!%p138_p2), 1  }
   0xc   : > { %7255 = vmatpush1.bf16.msra.mxu1 (!%p138_p2), %v7254_v17  ;;  %v7209_v29 = vpack.c.bf16 (!%p138_p2), %v194_v24, %v191_v23  ;;  %v190_v30 = vld [vmem:[%s9266_s2 + $0x90] sm:$0xff] (!%p138_p2)  ;;  %v197_v32 = vld [vmem:[%s9266_s2 + $0xc8] sm:$0xff] (!%p138_p2)  ;;  %v200_v33 = vld [vmem:[%s9266_s2 + $0xe0] sm:$0xff] (!%p138_p2)  ;;  %v7260_v34 = vpack.c.bf16 (!%p138_p2), %v189_v27, %v186_v26  ;;  %vm1656_vm13 = vcmask (!%p138_p2), 228352   ;;  %s7718_s7 = smov (!%p138_p2), 114   ;;  %vm3470_vm14 = vcmask (!%p138_p2), 1045504  }
   0xd   : > { %7256 = vmatprep.subr.bf16.mxu1 %v7702_v7  ;;  %7204 = vmatpush1.bf16.msra.mxu0 %v7203_v16  ;;  %v192_v35 = vld [vmem:[%s9266_s2 + $0xa0] sm:$0xff]  ;;  %v195_v36 = vld [vmem:[%s9266_s2 + $0xb8] sm:$0xff]  ;;  %v7211_v37 = vpack.c.bf16 %v193_v31, %v190_v30  ;;  %v7213_v38 = vpack.c.bf16 %v200_v33, %v197_v32  ;;  %v206_v42 = vld [vmem:[%s9266_s2 + $0x110] sm:$0xff]  ;;  %s9274_s13 = smov (!%p7832_p3, %s6241_s13), 1  ;;  %s7719_s8 = smov 121  }
   0xe   : > { %7206 = vmatprep.subr.bf16.mxu0 %v7205_v19  ;;  %v196_v39 = vld [vmem:[%s9266_s2 + $0xc0] sm:$0xff]  ;;  %v199_v40 = vld [vmem:[%s9266_s2 + $0xd8] sm:$0xff]  ;;  %v7263_v43 = vpack.c.bf16 %v195_v36, %v192_v35  ;;  %v198_v44 = vld [vmem:[%s9266_s2 + $0xd0] sm:$0xff]  ;;  %s6411_s16 = sshll.u32 %s9274_s13, 3  ;;  %s7720_s17 = smov 96  }
   0xf   : > { %v203_v41 = vld [vmem:[%s9266_s2 + $0xf8] sm:$0xff]  ;;  %v201_v45 = vld [vmem:[%s9266_s2 + $0xe8] sm:$0xff]  ;;  %v7215_v46 = vpack.c.bf16 %v199_v40, %v196_v39  ;;  %v202_v48 = vld [vmem:[%s9266_s2 + $0xf0] sm:$0xff]  ;;  %s165_s4 = scalar_lea.vmem %s9264_s0, %s6411_s16  ;;  %s7709_s16 = smov 122  }
  0x10   : > { %7258 = vmatpush1.bf16.msra.mxu1 %v7257_v25  ;;  %v7217_v47 = vpack.c.bf16 %v206_v42, %v203_v41  ;;  %v205_v49 = vld [vmem:[%s9266_s2 + $0x108] sm:$0xff]  ;;  %v212_v51 = vld [vmem:[%s9266_s2 + $0x140] sm:$0xff]  ;;  %v7266_v52 = vpack.c.bf16 %v201_v45, %v198_v44  ;;  %v207_v54 = vld [vmem:[%s9266_s2 + $0x118] sm:$0xff]  ;;  %s6412_s26 = sshll.u32 %s9274_s13, 4 }
  0x11   : > { %7259 = vmatprep.subr.bf16.mxu1 %v7702_v7  ;;  %7208 = vmatpush1.bf16.msra.mxu0 %v7207_v28  ;;  %v209_v50 = vld [vmem:[%s9266_s2 + $0x128] sm:$0xff]  ;;  %v204_v53 = vld [vmem:[%s9266_s2 + $0x100] sm:$0xff]  ;;  %v7219_v55 = vpack.c.bf16 %v205_v49, %v202_v48  ;;  %v211_v58 = vld [vmem:[%s9266_s2 + $0x138] sm:$0xff] }
  0x12   : > { %7210 = vmatprep.subr.bf16.mxu0 %v7209_v29  ;;  %v7221_v56 = vpack.c.bf16 %v212_v51, %v209_v50  ;;  %v208_v57 = vld [vmem:[%s9266_s2 + $0x120] sm:$0xff]  ;;  %v215_v59 = vld [vmem:[%s9266_s2 + $0x158] sm:$0xff]  ;;  %v218_v60 = vld [vmem:[%s9266_s2 + $0x170] sm:$0xff]  ;;  %v7269_v61 = vpack.c.bf16 %v207_v54, %v204_v53 }
  0x13   : > { %v210_v62 = vld [vmem:[%s9266_s2 + $0x130] sm:$0xff]  ;;  %v213_v63 = vld [vmem:[%s9266_s2 + $0x148] sm:$0xff]  ;;  %v7223_v0 = vpack.c.bf16 %v211_v58, %v208_v57  ;;  %v7225_v1 = vpack.c.bf16 %v218_v60, %v215_v59  ;;  %v224_v5 = vld [vmem:[%s9266_s2 + $0x1a0] sm:$0xff] }
  0x14   : > { %7261 = vmatpush1.bf16.msra.mxu1 %v7260_v34  ;;  %v214_v2 = vld [vmem:[%s9266_s2 + $0x150] sm:$0xff]  ;;  %v217_v3 = vld [vmem:[%s9266_s2 + $0x168] sm:$0xff]  ;;  %v7272_v6 = vpack.c.bf16 %v213_v63, %v210_v62  ;;  %v7915_v8 = vld [vmem:[%s165_s4] sm:$0x77]  ;;  %s7711_s4 = smov 124  }
  0x15   : > { %7262 = vmatprep.subr.bf16.mxu1 %v7702_v7  ;;  %7212 = vmatpush1.bf16.msra.mxu0 %v7211_v37  ;;  %v221_v4 = vld [vmem:[%s9266_s2 + $0x188] sm:$0xff]  ;;  %v216_v9 = vld [vmem:[%s9266_s2 + $0x160] sm:$0xff]  ;;  %v219_v10 = vld [vmem:[%s9266_s2 + $0x178] sm:$0xff]  ;;  %v257_v11 = vcombine.high %v7915_v8, %v7915_v8  ;;  %v7227_v12 = vpack.c.bf16 %v217_v3, %v214_v2  ;;  %v7704_v3 = vmov 0.0  }
  0x16   : > { %7214 = vmatprep.subr.bf16.mxu0 %v7213_v38  ;;  %v7929_v13 = vld [vmem:[%s9265_s1] sm:$0xf]  ;;  %v7229_v14 = vpack.c.bf16 %v224_v5, %v221_v4  ;;  %v223_v16 = vld [vmem:[%s9266_s2 + $0x198] sm:$0xff]  ;;  %v230_v18 = vld [vmem:[%s9266_s2 + $0x1d0] sm:$0xff]  ;;  %v7275_v19 = vpack.c.bf16 %v219_v10, %v216_v9 }
  0x17   : > { %v220_v15 = vld [vmem:[%s9266_s2 + $0x180] sm:$0xff]  ;;  %6250 = vmatprep.mubr.msk.f32.mxu0 %vm258_vm0, %v257_v11  ;;  %v227_v17 = vld [vmem:[%s9266_s2 + $0x1b8] sm:$0xff]  ;;  %6251 = vmatprep.mubr.msk.f32.mxu1 %vm258_vm0, %v257_v11  ;;  %v222_v20 = vld [vmem:[%s9266_s2 + $0x190] sm:$0xff]  ;;  %vm3463_vm0 = vcmask 113664  }
  0x18   : > { %7264 = vmatpush1.bf16.msra.mxu1 %v7263_v43  ;;  %v225_v21 = vld [vmem:[%s9266_s2 + $0x1a8] sm:$0xff]  ;;  %404 = vrot.lane.b32.xlu1 %v7929_v13, %s7703_s6  ;;  %v7231_v22 = vpack.c.bf16 %v223_v16, %v220_v15  ;;  %v7233_v23 = vpack.c.bf16 %v230_v18, %v227_v17  ;;  %v226_v24 = vld [vmem:[%s9266_s2 + $0x1b0] sm:$0xff]  ;;  %v236_v27 = vld [vmem:[%s9266_s2 + $0x200] sm:$0xff] }
  0x19   : > { %7265 = vmatprep.subr.bf16.mxu1 %v7702_v7  ;;  %7216 = vmatpush1.bf16.msra.mxu0 %v7215_v46  ;;  %v229_v25 = vld [vmem:[%s9266_s2 + $0x1c8] sm:$0xff]  ;;  %v7278_v28 = vpack.c.bf16 %v225_v21, %v222_v20  ;;  %v228_v29 = vld [vmem:[%s9266_s2 + $0x1c0] sm:$0xff]  ;;  %v231_v30 = vld [vmem:[%s9266_s2 + $0x1d8] sm:$0xff] }
  0x1a   : > { %7218 = vmatprep.subr.bf16.mxu0 %v7217_v47  ;;  %v233_v26 = vld [vmem:[%s9266_s2 + $0x1e8] sm:$0xff]  ;;  %v7235_v31 = vpack.c.bf16 %v229_v25, %v226_v24  ;;  %v232_v33 = vld [vmem:[%s9266_s2 + $0x1e0] sm:$0xff]  ;;  %v235_v34 = vld [vmem:[%s9266_s2 + $0x1f8] sm:$0xff]  ;;  %v7281_v37 = vpack.c.bf16 %v231_v30, %v228_v29 }
  0x1b   : > { %v7237_v32 = vpack.c.bf16 %v236_v27, %v233_v26  ;;  %v239_v35 = vld [vmem:[%s9266_s2 + $0x218] sm:$0xff]  ;;  %v242_v36 = vld [vmem:[%s9266_s2 + $0x230] sm:$0xff]  ;;  %v237_v39 = vld [vmem:[%s9266_s2 + $0x208] sm:$0xff]  ;;  %v7239_v40 = vpack.c.bf16 %v235_v34, %v232_v33 }
  0x1c   : > { %7267 = vmatpush1.bf16.msra.mxu1 %v7266_v52  ;;  %v234_v38 = vld [vmem:[%s9266_s2 + $0x1f0] sm:$0xff]  ;;  %v7241_v41 = vpack.c.bf16 %v242_v36, %v239_v35  ;;  %v241_v43 = vld [vmem:[%s9266_s2 + $0x228] sm:$0xff]  ;;  %v248_v45 = vld [vmem:[%s9266_s2 + $0x260] sm:$0xff] }
  0x1d   : > { %7268 = vmatprep.subr.bf16.mxu1 %v7702_v7  ;;  %7220 = vmatpush1.bf16.msra.mxu0 %v7219_v55  ;;  %v238_v42 = vld [vmem:[%s9266_s2 + $0x210] sm:$0xff]  ;;  %v245_v44 = vld [vmem:[%s9266_s2 + $0x248] sm:$0xff]  ;;  %v7284_v46 = vpack.c.bf16 %v237_v39, %v234_v38  ;;  %v240_v47 = vld [vmem:[%s9266_s2 + $0x220] sm:$0xff] }
  0x1e   : > { %7222 = vmatprep.subr.bf16.mxu0 %v7221_v56  ;;  %v243_v48 = vld [vmem:[%s9266_s2 + $0x238] sm:$0xff]  ;;  %v7243_v49 = vpack.c.bf16 %v241_v43, %v238_v42  ;;  %v7245_v50 = vpack.c.bf16 %v248_v45, %v245_v44  ;;  %v244_v51 = vld [vmem:[%s9266_s2 + $0x240] sm:$0xff]  ;;  %v254_v54 = vld [vmem:[%s9266_s2 + $0x290] sm:$0xff] }
  0x1f   : > { %v247_v52 = vld [vmem:[%s9266_s2 + $0x258] sm:$0xff]  ;;  %v7287_v55 = vpack.c.bf16 %v243_v48, %v240_v47  ;;  %v246_v56 = vld [vmem:[%s9266_s2 + $0x250] sm:$0xff]  ;;  %v249_v57 = vld [vmem:[%s9266_s2 + $0x268] sm:$0xff] }
  0x20   : > { %7270 = vmatpush1.bf16.msra.mxu1 %v7269_v61  ;;  %v251_v53 = vld [vmem:[%s9266_s2 + $0x278] sm:$0xff]  ;;  %v7247_v58 = vpack.c.bf16 %v247_v52, %v244_v51  ;;  %v250_v60 = vld [vmem:[%s9266_s2 + $0x270] sm:$0xff]  ;;  %v253_v61 = vld [vmem:[%s9266_s2 + $0x288] sm:$0xff]  ;;  %v7290_v62 = vpack.c.bf16 %v249_v57, %v246_v56 }
  0x21   : > { %7271 = vmatprep.subr.bf16.mxu1 %v7702_v7  ;;  %7224 = vmatpush1.bf16.msra.mxu0 %v7223_v0  ;;  %v7249_v59 = vpack.c.bf16 %v254_v54, %v251_v53  ;;  %v252_v63 = vld [vmem:[%s9266_s2 + $0x280] sm:$0xff]  ;;  %v255_v0 = vld [vmem:[%s9266_s2 + $0x298] sm:$0xff]  ;;  %v657_v4 = vld [vmem:[%s9266_s2 + $0x2a8] sm:$0xff] }
  0x22   : > { %7226 = vmatprep.subr.bf16.mxu0 %v7225_v1  ;;  %v7251_v1 = vpack.c.bf16 %v253_v61, %v250_v60  ;;  %v7293_v2 = vpack.c.bf16 %v255_v0, %v252_v63  ;;  %v659_v5 = vld [vmem:[%s9266_s2 + $0x2c0] sm:$0xff]  ;;  %v658_v10 = vld [vmem:[%s9266_s2 + $0x2b8] sm:$0xff]  ;;  %v663_v15 = vld [vmem:[%s9266_s2 + $0x2f0] sm:$0xff] }
  0x23   : > { %v656_v9 = vld [vmem:[%s9266_s2 + $0x2a0] sm:$0xff]  ;;  %v661_v11 = vld [vmem:[%s9266_s2 + $0x2d8] sm:$0xff]  ;;  %v660_v18 = vld [vmem:[%s9266_s2 + $0x2d0] sm:$0xff] }
  0x24   : > { %7273 = vmatpush1.bf16.msra.mxu1 %v7272_v6  ;;  %v7706_v6 = vmov 0   ;;  %v7299_v17 = vpack.c.bf16 %v663_v15, %v661_v11  ;;  %v665_v21 = vld [vmem:[%s9266_s2 + $0x308] sm:$0xff]  ;;  %v664_v26 = vld [vmem:[%s9266_s2 + $0x300] sm:$0xff]  ;;  %v666_v27 = vld [vmem:[%s9266_s2 + $0x318] sm:$0xff] }
  0x25   : > { %7274 = vmatprep.subr.bf16.mxu1 %v7702_v7  ;;  %7228 = vmatpush1.bf16.msra.mxu0 %v7227_v12  ;;  %v671_v29 = vld [vmem:[%s9266_s2 + $0x350] sm:$0xff]  ;;  %v7305_v30 = vpack.c.bf16 %v666_v27, %v664_v26  ;;  %v648_v33 = vld [vmem:[%s9265_s1 + $0x8] sm:$0xf]  ;;  %v675_v35 = vld [vmem:[%s9266_s2 + $0x380] sm:$0xff] }
  0x26   : > { %7230 = vmatprep.subr.bf16.mxu0 %v7229_v14  ;;  %7627 = vset.pattern.permute.xlu0 %v7706_v6  ;;  %v7297_v14 = vpack.c.bf16 %v658_v10, %v656_v9  ;;  %v673_v34 = vld [vmem:[%s9266_s2 + $0x368] sm:$0xff]  ;;  %v674_v47 = vld [vmem:[%s9266_s2 + $0x378] sm:$0xff]  ;;  %v676_v52 = vld [vmem:[%s9266_s2 + $0x390] sm:$0xff] }
  0x27   : > { %7628 = vset.pattern.permute.xlu1 %v7706_v6  ;;  %v678_v53 = vld [vmem:[%s9266_s2 + $0x3a8] sm:$0xff]  ;;  %v683_v56 = vld [vmem:[%s9266_s2 + $0x3e0] sm:$0xff]  ;;  %v999_v15 = vld [vmem:[%s9265_s1 + $0x18] sm:$0xff] }
  0x28   : > { %7276 = vmatpush1.bf16.msra.mxu1 %v7275_v19  ;;  %v662_v19 = vld [vmem:[%s9266_s2 + $0x2e8] sm:$0xff]  ;;  %v7317_v54 = vpack.c.bf16 %v678_v53, %v676_v52  ;;  %v1010_v26 = vld [vmem:[%s9266_s2 + $0x438] sm:$0xff]  ;;  %vm8307_vm12 = vmpackc.low %vm769_vm7, %vm7716_vm11 }
  0x29   : > { %7277 = vmatprep.subr.bf16.mxu1 %v7702_v7  ;;  %7232 = vmatpush1.bf16.msra.mxu0 %v7231_v22  ;;  %v667_v22 = vld [vmem:[%s9266_s2 + $0x320] sm:$0xff]  ;;  %v7301_v24 = vpack.c.bf16 %v662_v19, %v660_v18  ;;  %v1319_v53 = vld [vmem:[%s9265_s1 + $0x28] sm:$0xff]  ;;  %vm8638_vm15 = vmpackc.low %vm3470_vm14, %vm7716_vm11 }
  0x2a   : > { %7234 = vmatprep.subr.bf16.mxu0 %v7233_v23  ;;  %v7303_v25 = vpack.c.bf16 %v667_v22, %v665_v21  ;;  %v1007_v22 = vld [vmem:[%s9266_s2 + $0x3f0] sm:$0xff] }
  0x2c   : > { %7279 = vmatpush1.bf16.msra.mxu1 %v7278_v28  ;;  %v669_v28 = vld [vmem:[%s9266_s2 + $0x338] sm:$0xff] }
  0x2d   : > { %7280 = vmatprep.subr.bf16.mxu1 %v7702_v7  ;;  %7236 = vmatpush1.bf16.msra.mxu0 %v7235_v31  ;;  %v7307_v31 = vpack.c.bf16 %v671_v29, %v669_v28  ;;  %v1011_v28 = vld [vmem:[%s9266_s2 + $0x450] sm:$0xff]  ;;  %v1012_v29 = vld [vmem:[%s9266_s2 + $0x468] sm:$0xff] }
  0x2e   : > { %7238 = vmatprep.subr.bf16.mxu0 %v7237_v32  ;;  %v668_v32 = vld [vmem:[%s9266_s2 + $0x330] sm:$0xff] }
  0x30   : > { %7282 = vmatpush1.bf16.msra.mxu1 %v7281_v37  ;;  %v7311_v37 = vpack.c.bf16 %v675_v35, %v673_v34 }
  0x31   : > { %7283 = vmatprep.subr.bf16.mxu1 %v7702_v7  ;;  %7240 = vmatpush1.bf16.msra.mxu0 %v7239_v40 }
  0x32   : > { %7242 = vmatprep.subr.bf16.mxu0 %v7241_v41 }
  0x34   : > { %7285 = vmatpush1.bf16.msra.mxu1 %v7284_v46  ;;  %v672_v46 = vld [vmem:[%s9266_s2 + $0x360] sm:$0xff] }
  0x35   : > { %7286 = vmatprep.subr.bf16.mxu1 %v7702_v7  ;;  %7244 = vmatpush1.bf16.msra.mxu0 %v7243_v49  ;;  %v7313_v48 = vpack.c.bf16 %v674_v47, %v672_v46  ;;  %v677_v49 = vld [vmem:[%s9266_s2 + $0x398] sm:$0xff]  ;;  %v1335_v47 = vld [vmem:[%s9266_s2 + $0x4b0] sm:$0xff] }
  0x36   : > { %7246 = vmatprep.subr.bf16.mxu0 %v7245_v50  ;;  %v679_v50 = vld [vmem:[%s9266_s2 + $0x3b0] sm:$0xff]  ;;  %v1334_v46 = vld [vmem:[%s9266_s2 + $0x498] sm:$0xff] }
  0x37   : > { %v7315_v51 = vpack.c.bf16 %v679_v50, %v677_v49  ;;  %v1336_v50 = vld [vmem:[%s9266_s2 + $0x4c8] sm:$0xff] }
  0x38   : > { %7288 = vmatpush1.bf16.msra.mxu1 %v7287_v55  ;;  %v681_v55 = vld [vmem:[%s9266_s2 + $0x3c8] sm:$0xff] }
  0x39   : > { %7289 = vmatprep.subr.bf16.mxu1 %v7702_v7  ;;  %7248 = vmatpush1.bf16.msra.mxu0 %v7247_v58  ;;  %v7319_v57 = vpack.c.bf16 %v683_v56, %v681_v55  ;;  %v680_v58 = vld [vmem:[%s9266_s2 + $0x3c0] sm:$0xff]  ;;  %v1338_v55 = vld [vmem:[%s9266_s2 + $0x4f8] sm:$0xff]  ;;  %v1339_v56 = vld [vmem:[%s9266_s2 + $0x510] sm:$0xff] }
  0x3a   : > { %7250 = vmatprep.subr.bf16.mxu0 %v7249_v59  ;;  %v682_v59 = vld [vmem:[%s9266_s2 + $0x3d8] sm:$0xff] }
  0x3b   : > { %v7321_v60 = vpack.c.bf16 %v682_v59, %v680_v58  ;;  %v1340_v58 = vld [vmem:[%s9266_s2 + $0x528] sm:$0xff] }
  0x3c   : > { %7291 = vmatpush1.bf16.msra.mxu1 %v7290_v62 }
  0x3d   : > { %7292 = vmatprep.subr.bf16.mxu1 %v7702_v7  ;;  %7252 = vmatpush1.bf16.msra.mxu0 %v7251_v1 }
  0x3e   : > { %6685 = vmatprep.subr.mxu0 %v7704_v3 }
  0x40   : > { %7294 = vmatpush1.bf16.msra.mxu1 %v7293_v2  ;;  %326 = vmatmul.mubr.f32.vlgmr.msra.gmra.mrb[0].mxu0 %v7915_v8 }
  0x41   : > { %6690 = vmatprep.subr.mxu1 %v7704_v3  ;;  %6687 = vmatprep.mubr.msk.f32.mxu0 %vm7705_vm1, %v7704_v3 }
  0x43   : > { %397 = vmatmul.mubr.f32.vlgmr.msra.gmra.mrb[0].mxu1 %v7915_v8  ;;  %v7295_v8 = vpack.c.bf16 %v659_v5, %v657_v4 }
  0x44   : > { %6692 = vmatprep.mubr.msk.f32.mxu1 %vm7705_vm1, %v7704_v3 }
  0x8a   : > { %v405_v38 = vpop.permute.xlu1 %404 }
 0x113   : > { %v327_v12 = vpop.f32.mrb[0].mxu0 }
 0x114   : > { %408 = vrot.lane.b32.xlu0 %v327_v12, %s7707_s27  ;;  %v329_v16 = vpop.f32.mrb[1].mxu0  ;;  %6691 = vmatpush3.msk.msra.mxu1 %vm417_vm2, %v327_v12 }
 0x115   : > { %567 = vrot.lane.b32.xlu1 %v329_v16, %s7708_s5  ;;  %6693 = vmatmul.mubr.msk.f32.vlgmr.msra.gmra.mrb[2].mxu1 %vm414_vm3, %v7929_v13 }
 0x116   : > { %v398_v20 = vpop.f32.mrb[0].mxu1  ;;  %7296 = vmatprep.subr.bf16.mxu1 %v7295_v8  ;;  %752 = vmatprep.mubr.f32.mxu1 %v7704_v3 }
 0x117   : > { %v400_v23 = vpop.f32.mrb[1].mxu1  ;;  %7298 = vmatpush1.bf16.msra.mxu1 %v7297_v14  ;;  %v759_v14 = vld [vmem:[%s9265_s1 + $0x10] sm:$0xff] }
 0x118   : > { %410 = vrot.lane.b32.xlu0 %v329_v16, %s7707_s27  ;;  %7300 = vmatprep.subr.bf16.mxu1 %v7299_v17  ;;  %v1008_v23 = vld [vmem:[%s9266_s2 + $0x408] sm:$0xff] }
 0x119   : > { %564 = vrot.lane.b32.xlu1 %v7929_v13, %s7709_s16  ;;  %v670_v13 = vld [vmem:[%s9266_s2 + $0x348] sm:$0xff] }
 0x11a   : > { %v7309_v36 = vpack.c.bf16 %v670_v13, %v668_v32 }
 0x11b   : > { %7302 = vmatpush1.bf16.msra.mxu1 %v7301_v24  ;;  %v7324_v24 = vpack.c.bf16 %v1008_v23, %v1007_v22 }
 0x11c   : > { %569 = vrot.lane.b32.xlu0 %v398_v20, %s7708_s5  ;;  %7304 = vmatprep.subr.bf16.mxu1 %v7303_v25  ;;  %s7712_s5 = smov 120   ;;  %v1009_v25 = vld [vmem:[%s9266_s2 + $0x420] sm:$0xff] }
 0x11d   : > { %v7327_v27 = vpack.c.bf16 %v1010_v26, %v1009_v25  ;;  %v1655_v25 = vld [vmem:[%s9266_s2 + $0x588] sm:$0xf] }
 0x11f   : > { %7306 = vmatpush1.bf16.msra.mxu1 %v7305_v30  ;;  %v7330_v30 = vpack.c.bf16 %v1012_v29, %v1011_v28  ;;  %v7717_v28 = vmov 2  }
 0x120   : > { %651 = vperm.xlu0 %7627, %v648_v33   ;;  %7308 = vmatprep.subr.bf16.mxu1 %v7307_v31  ;;  %v1013_v31 = vld [vmem:[%s9266_s2 + $0x480] sm:$0xff] }
 0x123   : > { %7310 = vmatpush1.bf16.msra.mxu1 %v7309_v36 }
 0x124   : > { %7312 = vmatprep.subr.bf16.mxu1 %v7311_v37 }
 0x127   : > { %7314 = vmatpush1.bf16.msra.mxu1 %v7313_v48  ;;  %v7333_v48 = vpack.c.bf16 %v1335_v47, %v1334_v46 }
 0x128   : > { %7316 = vmatprep.subr.bf16.mxu1 %v7315_v51  ;;  %v1337_v51 = vld [vmem:[%s9266_s2 + $0x4e0] sm:$0xff] }
 0x12b   : > { %7318 = vmatpush1.bf16.msra.mxu1 %v7317_v54  ;;  %v7336_v54 = vpack.c.bf16 %v1337_v51, %v1336_v50 }
 0x12c   : > { %7320 = vmatprep.subr.bf16.mxu1 %v7319_v57  ;;  %v7339_v57 = vpack.c.bf16 %v1339_v56, %v1338_v55 }
 0x12f   : > { %7322 = vmatpush1.bf16.msra.mxu1 %v7321_v60 }
 0x130   : > { %6732 = vmatprep.subr.mxu1 %v7704_v3 }
 0x186   : > { %v409_v39 = vpop.permute.xlu0 %408 }
 0x187   : > { %v568_v40 = vpop.permute.xlu1 %567 }
 0x18a   : > { %v411_v41 = vpop.permute.xlu0 %410 }
 0x18b   : > { %v413_v42 = vsel %vm412_vm4, %v409_v39, %v411_v41  ;;  %v565_v44 = vpop.permute.xlu1 %564 }
 0x18c   : > { %6686 = vmatpush3.msk.msra.mxu0 %vm417_vm2, %v413_v42  ;;  %v1088_v42 = vld [vmem:[%s9265_s1 + $0x20] sm:$0xff] }
 0x18d   : > { %6688 = vmatmul.mubr.msk.f32.vlgmr.msra.gmra.mrb[2].mxu0 %vm414_vm3, %v405_v38  ;;  %6695 = vmatprep.subr.mxu0 %v7704_v3 }
 0x18e   : > { %v570_v43 = vpop.permute.xlu0 %569  ;;  %6697 = vmatprep.mubr.msk.f32.mxu0 %vm7705_vm1, %v7704_v3 }
 0x18f   : > { %v572_v45 = vsel %vm571_vm5, %v568_v40, %v570_v43  ;;  %v8221_v43 = vld [vmem:[%s9265_s1 + $0x30] sm:$0xff] }
 0x190   : > { %6696 = vmatpush3.msk.msra.mxu0 %vm417_vm2, %v572_v45  ;;  %v8229_v45 = vld [vmem:[%s9265_s1 + $0x50] sm:$0xff]  ;;  %vm5266_vm2 = vcmask 56320  }
 0x191   : > { %6698 = vmatmul.mubr.msk.f32.vlgmr.msra.gmra.mrb[4].mxu0 %vm414_vm3, %v565_v44  ;;  %6700 = vmatprep.subr.mxu0 %v7704_v3  ;;  %v7714_v44 = vmov 1   ;;  %vm6100_vm3 = vcmask 523264  }
 0x192   : > { %6702 = vmatprep.mubr.msk.f32.mxu0 %vm7705_vm1, %v7704_v3 }
 0x19f   : > { %v652_v4 = vpop.permute.xlu0 %651 }
 0x1e8   : > { %v560_v61 = vpop.f32.mrb[2].mxu1 }
 0x1e9   : > { %v6694_v62 = vpop.f32.mrb[3].mxu1 }
 0x260   : > { %v486_v63 = vpop.f32.mrb[2].mxu0 }
 0x261   : > { %v561_v0 = vadd.f32 %v560_v61, %v486_v63  ;;  %v6689_v1 = vpop.f32.mrb[3].mxu0 }
 0x264   : > { %v643_v2 = vpop.f32.mrb[4].mxu0 }
 0x265   : > { %v647_v5 = vadd.f32 %v643_v2, %v561_v0  ;;  %v6699_v8 = vpop.f32.mrb[5].mxu0 }
 0x267   : > { %v654_v9 = vadd.f32 %v652_v4, %v647_v5  ;;  %v1563_v4 = vld [vmem:[%s9265_s1 + $0x38] sm:$0xff] }
 0x269   : > { %v655_v10 = vmax.f32 %v654_v9, 0.0 }
 0x26b   : > { %6258 = vmatmul.mubr.msk.f32.vlgmr.msra.gmra.mrb[4].mxu1 %vm684_vm6, %v655_v10 }
 0x26c   : > { %6734 = vmatprep.mubr.msk.f32.mxu1 %vm7705_vm1, %v7704_v3 }
 0x33e   : > { %v754_v11 = vpop.f32.mrb[4].mxu1 }
 0x33f   : > { %919 = vrot.lane.b32.xlu0 %v754_v11, %s7707_s27  ;;  %764 = vrot.lane.b32.xlu1 %v754_v11, %s7710_s28  ;;  %v756_v12 = vpop.f32.mrb[5].mxu1 }
 0x343   : > { %761 = vrot.lane.b32.xlu1 %v759_v14, %s7711_s4  ;;  %916 = vrot.lane.b32.xlu0 %v759_v14, %s7712_s5  ;;  %s170_s4 = scalar_lea.vmem %s9267_s3, %s6412_s26 }
 0x347   : > { %921 = vrot.lane.b32.xlu1 %v756_v12, %s7707_s27 }
 0x34b   : > { %1002 = vperm.xlu1 %7628, %v999_v15  }
 0x34f   : > { %1090 = vrot.lane.b32.xlu1 %v1088_v42, %s7712_s5 }
 0x350   : > { %7629 = vset.pattern.permute.xlu1 %v7714_v44 }
 0x353   : > { %1241 = vrot.lane.b32.xlu1 %v1088_v42, %s7713_s25 }
 0x357   : > { %1413 = vrot.lane.b32.xlu1 %v8221_v43, %s7712_s5 }
 0x35b   : > { %1741 = vperm.xlu1 %7629, %v8229_v45  }
 0x35f   : > { %7631 = vset.pattern.permute.xlu1 %v7706_v6 }
 0x360   : > { %1322 = vperm.xlu1 %7631, %v1319_v53   ;;  %v1914_v53 = vld [vmem:[%s9265_s1 + $0x68] sm:$0xff] }
 0x364   : > { %1736 = vperm.xlu1 %7631, %v8229_v45  }
 0x3b1   : > { %v765_v16 = vpop.permute.xlu1 %764  ;;  %v920_v18 = vpop.permute.xlu0 %919 }
 0x3b2   : > { %6701 = vmatpush3.msk.msra.mxu0 %vm769_vm7, %v765_v16 }
 0x3b3   : > { %6705 = vmatprep.subr.mxu0 %v7704_v3 }
 0x3b5   : > { %v762_v17 = vpop.permute.xlu1 %761  ;;  %v917_v21 = vpop.permute.xlu0 %916 }
 0x3b6   : > { %6703 = vmatmul.mubr.msk.f32.vlgmr.msra.gmra.mrb[6].mxu0 %vm766_vm8, %v762_v17 }
 0x3b7   : > { %6706 = vmatpush3.msk.msra.mxu0 %vm769_vm7, %v754_v11  ;;  %6707 = vmatprep.mubr.msk.f32.mxu0 %vm7705_vm1, %v7704_v3 }
 0x3b8   : > { %6710 = vmatprep.subr.mxu0 %v7704_v3 }
 0x3b9   : > { %v922_v19 = vpop.permute.xlu1 %921 }
 0x3ba   : > { %v923_v20 = vsel %vm412_vm4, %v920_v18, %v922_v19  ;;  %6708 = vmatmul.mubr.msk.f32.vlgmr.msra.gmra.mrb[8].mxu0 %vm766_vm8, %v759_v14 }
 0x3bb   : > { %6711 = vmatpush3.msk.msra.mxu0 %vm769_vm7, %v923_v20  ;;  %6712 = vmatprep.mubr.msk.f32.mxu0 %vm7705_vm1, %v7704_v3  ;;  %v1652_v20 = vld [vmem:[%s9266_s2 + $0x540] sm:$0xff] }
 0x3bc   : > { %7323 = vmatprep.subr.bf16.mxu0 %v7702_v7 }
 0x3be   : > { %6713 = vmatmul.mubr.msk.f32.vlgmr.msra.gmra.mrb[10].mxu0 %vm766_vm8, %v917_v21  ;;  %v1653_v21 = vld [vmem:[%s9266_s2 + $0x558] sm:$0xff] }
 0x3bf   : > { %6729 = vmatprep.mubr.msk.f32.mxu0 %vm7705_vm1, %v7704_v3  ;;  %7325 = vmatpush3.bf16.msra.mxu0 %v7324_v24  ;;  %v8302_v22 = vpack.c.bf16 %v1653_v21, %v1652_v20  ;;  %v1654_v24 = vld [vmem:[%s9266_s2 + $0x570] sm:$0xff]  ;;  %v2022_v20 = vld [vmem:[%s9266_s2 + $0x5a0] sm:$0xff]  ;;  %v2023_v21 = vld [vmem:[%s9266_s2 + $0x5b8] sm:$0xff] }
 0x3c0   : > { %7326 = vmatprep.subr.bf16.mxu0 %v7702_v7  ;;  %v8318_v26 = vpack.c.bf16 %v1655_v25, %v1654_v24 }
 0x3c3   : > { %7328 = vmatpush3.bf16.msra.mxu0 %v7327_v27  ;;  %v1570_v27 = vld [vmem:[%s9265_s1 + $0x40] sm:$0xff] }
 0x3c4   : > { %7329 = vmatprep.subr.bf16.mxu0 %v7702_v7 }
 0x3c7   : > { %7331 = vmatpush3.bf16.msra.mxu0 %v7330_v30 }
 0x3c8   : > { %6727 = vmatprep.subr.mxu0 %v7704_v3 }
 0x3ca   : > { %v1003_v37 = vpop.permute.xlu1 %1002 }
 0x3cb   : > { %6728 = vmatpush3.msra.mxu0 %v1013_v31 }
 0x3cc   : > { %6737 = vmatprep.subr.mxu0 %v7704_v3 }
 0x3ce   : > { %v1091_v59 = vpop.permute.xlu1 %1090 }
 0x3d2   : > { %v1242_v61 = vpop.permute.xlu1 %1241 }
 0x3d6   : > { %v1414_v5 = vpop.permute.xlu1 %1413 }
 0x3da   : > { %v1742_v15 = vpop.permute.xlu1 %1741 }
 0x3df   : > { %v1323_v16 = vpop.permute.xlu1 %1322 }
 0x3e3   : > { %v1737_v46 = vpop.permute.xlu1 %1736 }
 0x489   : > { %v838_v32 = vpop.f32.mrb[6].mxu0 }
 0x48a   : > { %v6704_v13 = vpop.f32.mrb[7].mxu0 }
 0x48d   : > { %v912_v33 = vpop.f32.mrb[8].mxu0 }
 0x48e   : > { %v913_v34 = vadd.f32 %v912_v33, %v838_v32  ;;  %v6709_v35 = vpop.f32.mrb[9].mxu0 }
 0x491   : > { %v994_v36 = vpop.f32.mrb[10].mxu0 }
 0x492   : > { %v998_v38 = vadd.f32 %v994_v36, %v913_v34  ;;  %v6714_v39 = vpop.f32.mrb[11].mxu0 }
 0x494   : > { %v1005_v40 = vadd.f32 %v1003_v37, %v998_v38 }
 0x496   : > { %v1006_v41 = vmax.f32 %v1005_v40, 0.0 }
 0x498   : > { %6730 = vmatmul.mubr.msk.f32.vlgmr.msra.gmra.mrb[12].mxu0 %vm1014_vm9, %v1006_v41 }
 0x499   : > { %6739 = vmatprep.mubr.msk.f32.mxu0 %vm7705_vm1, %v7704_v3 }
 0x56b   : > { %v1084_v49 = vpop.f32.mrb[12].mxu0 }
 0x56c   : > { %1093 = vrot.lane.b32.xlu0 %v1084_v49, %s7715_s15  ;;  %v6731_v52 = vpop.f32.mrb[13].mxu0  ;;  %6738 = vmatpush3.msra.mxu0 %v1084_v49 }
 0x56d   : > { %6740 = vmatmul.mubr.msk.f32.vlgmr.msra.gmra.mrb[14].mxu0 %vm1096_vm10, %v1088_v42  ;;  %7332 = vmatprep.subr.bf16.mxu0 %v7702_v7  ;;  %v1760_v52 = vld [vmem:[%s9265_s1 + $0x58] sm:$0xff] }
 0x56e   : > { %7334 = vmatpush3.bf16.msra.mxu0 %v7333_v48  ;;  %6761 = vmatprep.mubr.msk.f32.mxu0 %vm7705_vm1, %v7704_v3 }
 0x56f   : > { %7335 = vmatprep.subr.bf16.mxu0 %v7702_v7 }
 0x570   : > { %1243 = vrot.lane.b32.xlu0 %v1084_v49, %s7710_s28 }
 0x572   : > { %7337 = vmatpush3.bf16.msra.mxu0 %v7336_v54  ;;  %v2185_v54 = vld [vmem:[%s9265_s1 + $0x80] sm:$0xff] }
 0x573   : > { %7338 = vmatprep.subr.bf16.mxu0 %v7702_v7 }
 0x576   : > { %7340 = vmatpush3.bf16.msra.mxu0 %v7339_v57 }
 0x577   : > { %6759 = vmatprep.subr.mxu0 %v7704_v3 }
 0x57a   : > { %6760 = vmatpush3.msra.mxu0 %v1340_v58 }
 0x57b   : > { %6762 = vmatmul.mubr.msk.f32.vlgmr.msra.gmra.mrb[16].mxu0 %vm1014_vm9, %v1006_v41  ;;  %7341 = vmatprep.subr.bf16.mxu0 %v7702_v7 }
 0x57c   : > { %6787 = vmatprep.mubr.msk.f32.mxu0 %vm7705_vm1, %v7704_v3  ;;  %7343 = vmatpush3.bf16.msra.mxu0 %v8302_v22 }
 0x57d   : > { %7344 = vmatprep.subr.bf16.mxu0 %v7702_v7 }
 0x580   : > { %7347 = vmatpush3.bf16.msk.msra.mxu0 %vm8307_vm12, %v8318_v26 }
 0x581   : > { %6806 = vmatprep.subr.mxu0 %v7704_v3 }
 0x5de   : > { %v1094_v60 = vpop.permute.xlu0 %1093 }
 0x5df   : > { %6733 = vmatpush3.msra.mxu1 %v1094_v60 }
 0x5e0   : > { %6735 = vmatmul.mubr.msk.f32.vlgmr.msra.gmra.mrb[6].mxu1 %vm1096_vm10, %v1091_v59  ;;  %6742 = vmatprep.subr.mxu1 %v7704_v3 }
 0x5e1   : > { %6744 = vmatprep.mubr.msk.f32.mxu1 %vm7705_vm1, %v7704_v3 }
 0x5e2   : > { %v1244_v62 = vpop.permute.xlu0 %1243 }
 0x5e3   : > { %6743 = vmatpush3.msra.mxu1 %v1244_v62 }
 0x5e4   : > { %6745 = vmatmul.mubr.msk.f32.vlgmr.msra.gmra.mrb[8].mxu1 %vm1096_vm10, %v1242_v61  ;;  %6764 = vmatprep.subr.mxu1 %v7704_v3 }
 0x5e5   : > { %6766 = vmatprep.mubr.msk.f32.mxu1 %vm7705_vm1, %v7704_v3 }
 0x640   : > { %v1237_v63 = vpop.f32.mrb[14].mxu0 }
 0x641   : > { %v6741_v0 = vpop.f32.mrb[15].mxu0 }
 0x64e   : > { %v1407_v1 = vpop.f32.mrb[16].mxu0 }
 0x64f   : > { %1416 = vrot.lane.b32.xlu0 %v1407_v1, %s7715_s15  ;;  %v6763_v2 = vpop.f32.mrb[17].mxu0 }
 0x653   : > { %1566 = vperm.xlu0 %7627, %v1563_v4  }
 0x657   : > { %7630 = vset.pattern.permute.xlu0 %v7717_v28 }
 0x658   : > { %1751 = vperm.xlu0 %7630, %v8229_v45   ;;  %v1761_v45 = vld [vmem:[%s9265_s1 + $0x60] sm:$0xff] }
 0x65c   : > { %7632 = vset.pattern.permute.xlu0 %v7706_v6 }
 0x6b3   : > { %v1165_v8 = vpop.f32.mrb[6].mxu1 }
 0x6b4   : > { %v1238_v9 = vadd.f32 %v1237_v63, %v1165_v8  ;;  %v6736_v10 = vpop.f32.mrb[7].mxu1 }
 0x6b7   : > { %v1314_v11 = vpop.f32.mrb[8].mxu1 }
 0x6b8   : > { %v1318_v12 = vadd.f32 %v1314_v11, %v1238_v9  ;;  %v6746_v14 = vpop.f32.mrb[9].mxu1 }
 0x6ba   : > { %v1325_v18 = vadd.f32 %v1323_v16, %v1318_v12 }
 0x6bc   : > { %v8288_v19 = vmax.f32 %v1325_v18, 0.0 }
 0x6c1   : > { %v1417_v17 = vpop.permute.xlu0 %1416 }
 0x6c2   : > { %6765 = vmatpush3.msra.mxu1 %v1417_v17 }
 0x6c3   : > { %6767 = vmatmul.mubr.msk.f32.vlgmr.msra.gmra.mrb[10].mxu1 %vm1096_vm10, %v1414_v5  ;;  %6769 = vmatprep.subr.mxu1 %v7704_v3 }
 0x6c4   : > { %6770 = vmatpush3.msra.mxu1 %v1407_v1  ;;  %6771 = vmatprep.mubr.msk.f32.mxu1 %vm7705_vm1, %v7704_v3 }
 0x6c5   : > { %6774 = vmatprep.subr.mxu1 %v7704_v3 }
 0x6c7   : > { %6772 = vmatmul.mubr.msk.f32.vlgmr.msra.gmra.mrb[12].mxu1 %vm1096_vm10, %v8221_v43  ;;  %v1572_v43 = vld [vmem:[%s9265_s1 + $0x48] sm:$0xff] }
 0x6c8   : > { %6775 = vmatpush3.msra.mxu1 %v8288_v19  ;;  %6776 = vmatprep.mubr.msk.f32.mxu1 %vm7705_vm1, %v7704_v3 }
 0x6c9   : > { %6790 = vmatprep.subr.mxu1 %v7704_v3 }
 0x6cb   : > { %6777 = vmatmul.mubr.msk.f32.vlgmr.msra.gmra.mrb[14].mxu1 %vm1096_vm10, %v1570_v27  ;;  %v7356_v27 = vpack.c.bf16 %v2023_v21, %v2022_v20 }
 0x6cc   : > { %6792 = vmatprep.mubr.msk.f32.mxu1 %vm7705_vm1, %v7704_v3 }
 0x6d2   : > { %v1567_v33 = vpop.permute.xlu0 %1566 }
 0x6d7   : > { %v1752_v38 = vpop.permute.xlu0 %1751 }
 0x796   : > { %v1487_v29 = vpop.f32.mrb[10].mxu1 }
 0x797   : > { %v6768_v30 = vpop.f32.mrb[11].mxu1 }
 0x798   : > { %v2024_v30 = vld [vmem:[%s9266_s2 + $0x5d0] sm:$0xff] }
 0x79a   : > { %v1559_v31 = vpop.f32.mrb[12].mxu1 }
 0x79b   : > { %v1560_v32 = vadd.f32 %v1559_v31, %v1487_v29  ;;  %v6773_v13 = vpop.f32.mrb[13].mxu1  ;;  %v2025_v31 = vld [vmem:[%s9266_s2 + $0x5e8] sm:$0xf] }
 0x79d   : > { %v8333_v34 = vadd.f32 %v1567_v33, %v1560_v32  ;;  %v7359_v33 = vpack.c.bf16 %v2025_v31, %v2024_v30 }
 0x79e   : > { %v1647_v36 = vpop.f32.mrb[14].mxu1 }
 0x79f   : > { %v1651_v35 = vmax.f32 %v8333_v34, 0.0  ;;  %v6778_v37 = vpop.f32.mrb[15].mxu1 }
 0x7a1   : > { %6788 = vmatmul.mubr.msk.f32.vlgmr.msra.gmra.mrb[18].mxu0 %vm1656_vm13, %v1651_v35 }
 0x7a2   : > { %6808 = vmatprep.mubr.msk.f32.mxu0 %vm7705_vm1, %v7704_v3 }
 0x874   : > { %v1729_v39 = vpop.f32.mrb[18].mxu0 }
 0x875   : > { %v1744_v40 = vmul.f32 %v1742_v15, %v1729_v39  ;;  %v1754_v41 = vmul.f32 %v1752_v38, %v1729_v39  ;;  %v6789_v42 = vpop.f32.mrb[19].mxu0  ;;  %v1739_v47 = vmul.f32 %v1737_v46, %v1729_v39  ;;  %v2213_v15 = vld [vmem:[%s9265_s1 + $0x90] sm:$0xff]  ;;  %v2212_v38 = vld [vmem:[%s9265_s1 + $0x88] sm:$0xff] }
 0x877   : > { %1756 = vrot.lane.b32.xlu1 %v1754_v41, %s7710_s28  ;;  %1746 = vrot.lane.b32.xlu0 %v1744_v40, %s7715_s15 }
 0x87b   : > { %1575 = vperm.xlu1 %7631, %v1572_v43   ;;  %1764 = vperm.xlu0 %7632, %v1761_v45  }
 0x87f   : > { %7633 = vset.pattern.permute.xlu1 %v7714_v44  ;;  %7634 = vset.pattern.permute.xlu0 %v7717_v28 }
 0x880   : > { %1932 = vperm.xlu0 %7634, %v1914_v53   ;;  %1922 = vperm.xlu1 %7633, %v1914_v53  }
 0x884   : > { %7636 = vset.pattern.permute.xlu0 %v7706_v6  ;;  %2193 = vperm.xlu1 %7633, %v2185_v54  }
 0x885   : > { %1917 = vperm.xlu0 %7636, %v1914_v53  }
 0x888   : > { %7635 = vset.pattern.permute.xlu1 %v7717_v28 }
 0x889   : > { %2203 = vperm.xlu1 %7635, %v2185_v54   ;;  %2188 = vperm.xlu0 %7636, %v2185_v54  }
 0x88d   : > { %7637 = vset.pattern.permute.xlu1 %v7706_v6  ;;  %7638 = vset.pattern.permute.xlu0 %v7714_v44 }
 0x8e9   : > { %v1747_v48 = vpop.permute.xlu0 %1746  ;;  %v1757_v50 = vpop.permute.xlu1 %1756 }
 0x8ea   : > { %v1749_v49 = vadd.f32 %v1747_v48, %v1739_v47  ;;  %v2638_v47 = vld [vmem:[%s9265_s1 + $0xb0] sm:$0xff]  ;;  %v2639_v48 = vld [vmem:[%s9265_s1 + $0xb8] sm:$0xff] }
 0x8ec   : > { %v1759_v51 = vadd.f32 %v1757_v50, %v1749_v49 }
 0x8ee   : > { %6791 = vmatpush3.msra.mxu1 %v1759_v51 }
 0x8ef   : > { %6793 = vmatmul.mubr.msk.f32.vlgmr.msra.gmra.mrb[16].mxu1 %vm1096_vm10, %v1760_v52  ;;  %7348 = vmatprep.subr.bf16.mxu1 %v7702_v7 }
 0x8f0   : > { %7350 = vmatpush3.bf16.msra.mxu1 %v8302_v22  ;;  %6803 = vmatprep.mubr.msk.f32.mxu1 %vm7705_vm1, %v7704_v3 }
 0x8f1   : > { %7351 = vmatprep.subr.bf16.mxu1 %v7702_v7 }
 0x8f4   : > { %7354 = vmatpush3.bf16.msk.msra.mxu1 %vm8307_vm12, %v8318_v26 }
 0x8f5   : > { %7362 = vmatprep.subr.bf16.mxu1 %v7702_v7 }
 0x8fa   : > { %v1765_v55 = vpop.permute.xlu0 %1764  ;;  %v1576_v60 = vpop.permute.xlu1 %1575 }
 0x8fb   : > { %v8376_v61 = vadd.f32 %v1647_v36, %v1576_v60  ;;  %v2640_v60 = vld [vmem:[%s9265_s1 + $0xc0] sm:$0xff] }
 0x8fd   : > { %v2111_v62 = vmax.f32 %v8376_v61, 0.0 }
 0x8ff   : > { %v1923_v63 = vpop.permute.xlu1 %1922  ;;  %v1933_v5 = vpop.permute.xlu0 %1932 }
 0x903   : > { %v2194_v4 = vpop.permute.xlu1 %2193 }
 0x904   : > { %v1918_v16 = vpop.permute.xlu0 %1917 }
 0x908   : > { %v2204_v9 = vpop.permute.xlu1 %2203  ;;  %v2189_v29 = vpop.permute.xlu0 %2188 }
 0x9c2   : > { %v1836_v56 = vpop.f32.mrb[16].mxu1 }
 0x9c3   : > { %v1837_v57 = vadd.f32 %v1836_v56, %v1765_v55  ;;  %v6794_v58 = vpop.f32.mrb[17].mxu1  ;;  %v1942_v55 = vld [vmem:[%s9265_s1 + $0x78] sm:$0xff]  ;;  %v8465_v56 = vld [vmem:[%s9265_s1 + $0x310] sm:$0xff] }
 0x9c5   : > { %v1840_v59 = vmax.f32 %v1837_v57, 0.0  ;;  %v2737_v57 = vld [vmem:[%s9265_s1 + $0xe0] sm:$0xff] }
 0x9c7   : > { %6804 = vmatmul.mubr.msk.f32.vlgmr.msra.gmra.mrb[18].mxu1 %vm1656_vm13, %v1840_v59 }
 0x9c8   : > { %7364 = vmatpush3.bf16.msra.mxu1 %v8302_v22  ;;  %6830 = vmatprep.mubr.msk.f32.mxu1 %vm7705_vm1, %v7704_v3 }
 0x9c9   : > { %7365 = vmatprep.subr.bf16.mxu1 %v7702_v7 }
 0x9cc   : > { %7368 = vmatpush3.bf16.msk.msra.mxu1 %vm8307_vm12, %v8318_v26 }
 0x9cd   : > { %7369 = vmatprep.subr.bf16.mxu1 %v7702_v7 }
 0x9cf   : > { %6831 = vmatmul.mubr.msk.f32.vlgmr.msra.gmra.mrb[20].mxu1 %vm1656_vm13, %v2111_v62  ;;  %v8478_v62 = vld [vmem:[%s9265_s1 + $0x318] sm:$0xff] }
 0x9d0   : > { %7371 = vmatpush3.bf16.msra.mxu1 %v8302_v22  ;;  %6846 = vmatprep.mubr.msk.f32.mxu1 %vm7705_vm1, %v7704_v3 }
 0x9d1   : > { %7372 = vmatprep.subr.bf16.mxu1 %v7702_v7 }
 0x9d4   : > { %7375 = vmatpush3.bf16.msk.msra.mxu1 %vm8307_vm12, %v8318_v26  ;;  %v1941_v26 = vld [vmem:[%s9265_s1 + $0x70] sm:$0xff] }
 0x9d5   : > { %6864 = vmatprep.subr.mxu1 %v8288_v19 }
 0xa9a   : > { %v1910_v0 = vpop.f32.mrb[18].mxu1 }
 0xa9b   : > { %v1925_v1 = vmul.f32 %v1923_v63, %v1910_v0  ;;  %v6805_v2 = vpop.f32.mrb[19].mxu1  ;;  %v1935_v8 = vmul.f32 %v1933_v5, %v1910_v0  ;;  %v1920_v18 = vmul.f32 %v1918_v16, %v1910_v0  ;;  %v2738_v63 = vld [vmem:[%s9265_s1 + $0xe8] sm:$0xff] }
 0xa9c   : > { %v2641_v0 = vld [vmem:[%s9265_s1 + $0xc8] sm:$0xff] }
 0xa9d   : > { %1927 = vrot.lane.b32.xlu1 %v1925_v1, %s7715_s15 }
 0xaa1   : > { %1937 = vrot.lane.b32.xlu1 %v1935_v8, %s7710_s28 }
 0xaa2   : > { %v2181_v10 = vpop.f32.mrb[20].mxu1 }
 0xaa3   : > { %v2196_v11 = vmul.f32 %v2194_v4, %v2181_v10  ;;  %v2206_v12 = vmul.f32 %v2204_v9, %v2181_v10  ;;  %v6832_v14 = vpop.f32.mrb[21].mxu1  ;;  %v2191_v13 = vmul.f32 %v2189_v29, %v2181_v10  ;;  %v2393_v10 = vld [vmem:[%s9265_s1 + $0xa0] sm:$0xff] }
 0xaa5   : > { %2208 = vrot.lane.b32.xlu0 %v2206_v12, %s7710_s28  ;;  %2198 = vrot.lane.b32.xlu1 %v2196_v11, %s7715_s15 }
 0xaa9   : > { %2216 = vperm.xlu1 %7637, %v2213_v15  }
 0xaad   : > { %7639 = vset.pattern.permute.xlu1 %v7717_v28 }
 0xb0f   : > { %v1928_v17 = vpop.permute.xlu1 %1927 }
 0xb10   : > { %v1930_v22 = vadd.f32 %v1928_v17, %v1920_v18 }
 0xb13   : > { %v1938_v24 = vpop.permute.xlu1 %1937 }
 0xb14   : > { %v1940_v25 = vadd.f32 %v1938_v24, %v1930_v22 }
 0xb16   : > { %6807 = vmatpush3.msra.mxu0 %v1940_v25  ;;  %v2830_v25 = vld [vmem:[%s9266_s2 + $0x600] sm:$0xff] }
 0xb17   : > { %6809 = vmatmul.mubr.msk.f32.vlgmr.msra.gmra.mrb[20].mxu0 %vm1096_vm10, %v1941_v26  ;;  %7355 = vmatprep.subr.bf16.mxu0 %v7702_v7  ;;  %v2199_v32 = vpop.permute.xlu1 %2198  ;;  %v2209_v36 = vpop.permute.xlu0 %2208  ;;  %v2831_v26 = vld [vmem:[%s9266_s2 + $0x618] sm:$0xff] }
 0xb18   : > { %7357 = vmatpush3.bf16.msra.mxu0 %v7356_v27  ;;  %6819 = vmatprep.mubr.msk.f32.mxu0 %vm7705_vm1, %v7704_v3  ;;  %v2201_v35 = vadd.f32 %v2199_v32, %v2191_v13  ;;  %v7380_v31 = vpack.c.bf16 %v2831_v26, %v2830_v25  ;;  %v2832_v13 = vld [vmem:[%s9266_s2 + $0x630] sm:$0xff] }
 0xb19   : > { %7358 = vmatprep.subr.bf16.mxu0 %v7702_v7  ;;  %v2366_v7 = vld [vmem:[%s9265_s1 + $0x98] sm:$0xff] }
 0xb1a   : > { %v2211_v37 = vadd.f32 %v2209_v36, %v2201_v35  ;;  %2384 = vperm.xlu1 %7639, %v2366_v7   ;;  %2374 = vperm.xlu0 %7638, %v2366_v7  }
 0xb1c   : > { %7361 = vmatpush3.bf16.msk.msra.mxu0 %vm8307_vm12, %v7359_v33 }
 0xb1d   : > { %6833 = vmatprep.subr.mxu0 %v7704_v3 }
 0xb1e   : > { %7640 = vset.pattern.permute.xlu1 %v7706_v6  ;;  %7641 = vset.pattern.permute.xlu0 %v7706_v6 }
 0xb1f   : > { %6820 = vmatmul.mubr.msk.f32.vlgmr.msra.gmra.mrb[22].mxu0 %vm1656_vm13, %v8333_v34  ;;  %2369 = vperm.xlu1 %7640, %v2366_v7  }
 0xb20   : > { %6834 = vmatpush3.msra.mxu0 %v2211_v37  ;;  %6835 = vmatprep.mubr.msk.f32.mxu0 %vm7705_vm1, %v7704_v3 }
 0xb21   : > { %6849 = vmatprep.subr.mxu0 %v7704_v3 }
 0xb23   : > { %6836 = vmatmul.mubr.msk.f32.vlgmr.msra.gmra.mrb[24].mxu0 %vm1096_vm10, %v2212_v38 }
 0xb24   : > { %6851 = vmatprep.mubr.msk.f32.mxu0 %vm7705_vm1, %v7704_v3  ;;  %vm5279_vm1 = vcmask 1046528  }
 0xb28   : > { %v2217_v42 = vpop.permute.xlu1 %2216 }
 0xb99   : > { %v2375_v49 = vpop.permute.xlu0 %2374  ;;  %v2385_v50 = vpop.permute.xlu1 %2384 }
 0xb9e   : > { %v2370_v1 = vpop.permute.xlu1 %2369 }
 0xbea   : > { %v8440_v34 = vpop.f32.mrb[20].mxu0 }
 0xbeb   : > { %v6810_v39 = vpop.f32.mrb[21].mxu0 }
 0xbf2   : > { %v2098_v40 = vpop.f32.mrb[22].mxu0 }
 0xbf3   : > { %v6821_v41 = vpop.f32.mrb[23].mxu0 }
 0xbf6   : > { %v2288_v43 = vpop.f32.mrb[24].mxu0 }
 0xbf7   : > { %v2289_v45 = vadd.f32 %v2288_v43, %v2217_v42  ;;  %v6837_v3 = vpop.f32.mrb[25].mxu0  ;;  %v2938_v42 = vld [vmem:[%s9266_s2 + $0x660] sm:$0xff]  ;;  %v2939_v43 = vld [vmem:[%s9266_s2 + $0x678] sm:$0xff] }
 0xbf9   : > { %v2292_v46 = vmax.f32 %v2289_v45, 0.0 }
 0xbfb   : > { %6847 = vmatmul.mubr.msk.f32.vlgmr.msra.gmra.mrb[22].mxu1 %vm1656_vm13, %v2292_v46  ;;  %v8542_v46 = vpack.c.bf16 %v2939_v43, %v2938_v42 }
 0xbfc   : > { %6865 = vmatpush3.msra.mxu1 %v8288_v19  ;;  %6866 = vmatprep.mubr.msk.f32.mxu1 %vm1096_vm10, %v2638_v47  ;;  %v2394_v19 = vld [vmem:[%s9265_s1 + $0xa8] sm:$0xff]  ;;  %v2734_v47 = vld [vmem:[%s9265_s1 + $0xd8] sm:$0xff] }
 0xbff   : > { %6867 = vmatmul.mubr.msk.f32.vlgmr.msra.gmra.mrb[24].mxu1 %vm1096_vm10, %v2639_v48 }
 0xcce   : > { %v2362_v51 = vpop.f32.mrb[22].mxu1 }
 0xccf   : > { %v2377_v52 = vmul.f32 %v2375_v49, %v2362_v51  ;;  %v2387_v53 = vmul.f32 %v2385_v50, %v2362_v51  ;;  %v6848_v54 = vpop.f32.mrb[23].mxu1  ;;  %v2372_v2 = vmul.f32 %v2370_v1, %v2362_v51  ;;  %v2940_v50 = vld [vmem:[%s9266_s2 + $0x690] sm:$0xff]  ;;  %v2941_v51 = vld [vmem:[%s9266_s2 + $0x6a8] sm:$0xf] }
 0xcd0   : > { %v3223_v54 = vld [vmem:[%s9266_s2 + $0x738] sm:$0xff]  ;;  %v3225_v1 = vld [vmem:[%s9266_s2 + $0x768] sm:$0xf] }
 0xcd1   : > { %2379 = vrot.lane.b32.xlu0 %v2377_v52, %s7715_s15  ;;  %2389 = vrot.lane.b32.xlu1 %v2387_v53, %s7710_s28  ;;  %v8560_v52 = vpack.c.bf16 %v2941_v51, %v2940_v50  ;;  %v3222_v53 = vld [vmem:[%s9266_s2 + $0x720] sm:$0xff] }
 0xcd2   : > { %v6868_v58 = vpop.f32.mrb[24].mxu1 }
 0xcd3   : > { %v2724_v59 = vpop.f32.mrb[25].mxu1 }
 0xcd5   : > { %2397 = vperm.xlu0 %7641, %v2394_v19   ;;  %2103 = vrot.lane.b32.xlu1 %v2098_v40, %s7715_s15  ;;  %v7408_v19 = vpack.c.bf16 %v3223_v54, %v3222_v53 }
 0xcd9   : > { %1945 = vperm.xlu0 %7641, %v1942_v55   ;;  %2107 = vrot.lane.b32.xlu1 %v2098_v40, %s7710_s28  ;;  %v3310_v55 = vld [vmem:[%s9265_s1 + $0x110] sm:$0xff] }
 0xcdd   : > { %2476 = vrot.lane.b32.xlu1 %v8465_v56, %s7712_s5  ;;  %2478 = vrot.lane.b32.xlu0 %v8478_v62, %s7712_s5 }
 0xce1   : > { %2741 = vperm.xlu1 %7640, %v2737_v57   ;;  %2746 = vperm.xlu0 %7641, %v2738_v63   ;;  %v3311_v57 = vld [vmem:[%s9265_s1 + $0x118] sm:$0xff] }
 0xce5   : > { %2644 = vperm.xlu1 %7640, %v2640_v60   ;;  %2649 = vperm.xlu0 %7641, %v2641_v0   ;;  %v3224_v0 = vld [vmem:[%s9266_s2 + $0x750] sm:$0xff] }
 0xce9   : > { %7642 = vset.pattern.permute.xlu1 %v7714_v44  ;;  %7643 = vset.pattern.permute.xlu0 %v7714_v44 }
 0xcea   : > { %3325 = vperm.xlu1 %7642, %v3310_v55   ;;  %3329 = vperm.xlu0 %7643, %v3311_v57  }
 0xcee   : > { %7644 = vset.pattern.permute.xlu1 %v7717_v28  ;;  %7645 = vset.pattern.permute.xlu0 %v7706_v6 }
 0xcef   : > { %3345 = vperm.xlu1 %7644, %v3310_v55   ;;  %3314 = vperm.xlu0 %7645, %v3310_v55   ;;  %v3364_v55 = vld [vmem:[%s9265_s1 + $0x120] sm:$0xff] }
 0xcf3   : > { %3349 = vperm.xlu1 %7644, %v3311_v57  }
 0xcf7   : > { %7646 = vset.pattern.permute.xlu1 %v7706_v6 }
 0xcf8   : > { %3319 = vperm.xlu1 %7646, %v3311_v57   ;;  %v3365_v57 = vld [vmem:[%s9265_s1 + $0x128] sm:$0xff] }
 0xd43   : > { %v2380_v4 = vpop.permute.xlu0 %2379  ;;  %v2390_v5 = vpop.permute.xlu1 %2389 }
 0xd44   : > { %v2382_v8 = vadd.f32 %v2380_v4, %v2372_v2 }
 0xd46   : > { %v2392_v9 = vadd.f32 %v2390_v5, %v2382_v8  ;;  %v7412_v5 = vpack.c.bf16 %v3225_v1, %v3224_v0  ;;  %v3462_v0 = vld [vmem:[%s9266_s2 + $0x798] sm:$0x3f] }
 0xd47   : > { %v2104_v11 = vpop.permute.xlu1 %2103 }
 0xd48   : > { %6850 = vmatpush3.msra.mxu0 %v2392_v9  ;;  %v2106_v17 = vmax.f32 %v2098_v40, %v2104_v11 }
 0xd49   : > { %6852 = vmatmul.mubr.msk.f32.vlgmr.msra.gmra.mrb[26].mxu0 %vm1096_vm10, %v2393_v10  ;;  %v3026_v10 = vld [vmem:[%s9265_s1 + $0xf0] sm:$0xff] }
 0xd4a   : > { %3030 = vrot.lane.b32.xlu0 %v3026_v10, %s7713_s25 }
 0xd4b   : > { %v2108_v12 = vpop.permute.xlu1 %2107 }
 0xd4c   : > { %v2110_v20 = vmax.f32 %v2106_v17, %v2108_v12 }
 0xd4f   : > { %v2477_v14 = vpop.permute.xlu1 %2476 }
 0xd50   : > { %6856 = vmatprep.mubr.msk.f32.mxu0 %vm1096_vm10, %v2477_v14 }
 0xd54   : > { %v2398_v15 = vpop.permute.xlu0 %2397 }
 0xd58   : > { %v1946_v16 = vpop.permute.xlu0 %1945 }
 0xd59   : > { %v2018_v21 = vadd.f32 %v8440_v34, %v1946_v16  ;;  %v2733_v34 = vld [vmem:[%s9265_s1 + $0xd0] sm:$0xff] }
 0xd5a   : > { %6873 = vmatprep.mubr.msk.f32.mxu1 %vm412_vm4, %v2733_v34 }
 0xd5b   : > { %v2021_v29 = vadd.f32 %v2018_v21, %v8376_v61  ;;  %v2833_v61 = vld [vmem:[%s9266_s2 + $0x648] sm:$0xf]  ;;  %v3027_v21 = vld [vmem:[%s9265_s1 + $0xf8] sm:$0xff] }
 0xd5c   : > { %v2479_v32 = vpop.permute.xlu0 %2478  ;;  %v7384_v36 = vpack.c.bf16 %v2833_v61, %v2832_v13  ;;  %v3367_v13 = vld [vmem:[%s9265_s1 + $0x138] sm:$0xff] }
 0xd60   : > { %v8503_v30 = vpop.permute.xlu1 %2741  ;;  %v2747_v35 = vpop.permute.xlu0 %2746 }
 0xd64   : > { %v2645_v33 = vpop.permute.xlu1 %2644  ;;  %v2650_v38 = vpop.permute.xlu0 %2649 }
 0xd65   : > { %v2725_v37 = vadd.f32 %v2724_v59, %v2645_v33  ;;  %v2730_v7 = vadd.f32 %v6868_v58, %v2650_v38 }
 0xd67   : > { %v3220_v8 = vmax.f32 %v2725_v37, 0.0  ;;  %v3221_v9 = vmax.f32 %v2730_v7, 0.0 }
 0xd69   : > { %v3330_v11 = vpop.permute.xlu0 %3329  ;;  %v3326_v16 = vpop.permute.xlu1 %3325 }
 0xd6e   : > { %v3315_v12 = vpop.permute.xlu0 %3314 }
 0xdbc   : > { %v3031_v14 = vpop.permute.xlu0 %3030 }
 0xe1c   : > { %v2469_v18 = vpop.f32.mrb[26].mxu0 }
 0xe1d   : > { %v2470_v22 = vadd.f32 %v2469_v18, %v2398_v15  ;;  %v6853_v24 = vpop.f32.mrb[27].mxu0 }
 0xe1f   : > { %v2473_v27 = vadd.f32 %v2470_v22, %v2110_v20  ;;  %v3346_v22 = vpop.permute.xlu1 %3345 }
 0xe21   : > { %6854 = vmatprep.subr.mxu0 %v2473_v27 }
 0xe22   : > { %6855 = vmatpush3.msra.mxu0 %v2473_v27 }
 0xe23   : > { %6857 = vmatmul.mubr.msk.f32.vlgmr.msra.gmra.mrb[28].mxu0 %vm1096_vm10, %v2479_v32  ;;  %6859 = vmatprep.subr.mxu0 %v2021_v29  ;;  %v3366_v32 = vld [vmem:[%s9265_s1 + $0x130] sm:$0xff] }
 0xe24   : > { %6860 = vmatpush3.msra.mxu0 %v2021_v29  ;;  %6861 = vmatprep.mubr.msk.f32.mxu0 %vm1096_vm10, %v8465_v56  ;;  %v3350_v29 = vpop.permute.xlu1 %3349 }
 0xe25   : > { %7381 = vmatprep.subr.bf16.mxu0 %v7380_v31 }
 0xe28   : > { %v3320_v61 = vpop.permute.xlu1 %3319 }
 0xe2b   : > { %6862 = vmatmul.mubr.msk.f32.vlgmr.msra.gmra.mrb[28].mxu0 %vm1096_vm10, %v8478_v62 }
 0xe2c   : > { %7383 = vmatpush3.bf16.msra.mxu0 %v7380_v31  ;;  %6884 = vmatprep.mubr.msk.f32.mxu0 %vm1656_vm13, %v2725_v37 }
 0xe2d   : > { %7386 = vmatprep.subr.msk.bf16.mxu0 %vm8307_vm12, %v7384_v36 }
 0xe30   : > { %7389 = vmatpush3.bf16.msk.msra.mxu0 %vm8307_vm12, %v7384_v36 }
 0xe33   : > { %6885 = vmatmul.mubr.msk.f32.vlgmr.msra.gmra.mrb[30].mxu0 %vm1656_vm13, %v2730_v7 }
 0xe34   : > { %6902 = vmatprep.mubr.msk.f32.mxu0 %vm412_vm4, %v3031_v14 }
 0xefe   : > { %v8526_v39 = vpop.f32.mrb[28].mxu0 }
 0xeff   : > { %v2736_v40 = vmax.f32 %v8526_v39, 0.0  ;;  %v8529_v41 = vpop.f32.mrb[29].mxu0 }
 0xf00   : > { %v2735_v45 = vmax.f32 %v8529_v41, 0.0 }
 0xf02   : > { %v7376_v3 = vpack.c.bf16 %v2736_v40, %v2735_v45 }
 0xf04   : > { %7377 = vmatprep.subr.bf16.mxu1 %v7376_v3 }
 0xf05   : > { %7379 = vmatpush3.bf16.msra.mxu1 %v7376_v3 }
 0xf06   : > { %v8547_v48 = vpop.f32.mrb[30].mxu0  ;;  %7391 = vmatprep.subr.bf16.mxu1 %v8542_v46 }
 0xf07   : > { %v8550_v49 = vpop.f32.mrb[31].mxu0 }
 0xf08   : > { %6874 = vmatmul.mubr.msk.f32.vlgmr.msra.gmra.mrb[26].mxu1 %vm412_vm4, %v2734_v47 }
 0xf09   : > { %7393 = vmatpush3.bf16.msra.mxu1 %v8542_v46 }
 0xf0a   : > { %7396 = vmatprep.subr.msk.bf16.mxu1 %vm8307_vm12, %v8560_v52 }
 0xf0d   : > { %7399 = vmatpush3.bf16.msk.msra.mxu1 %vm8307_vm12, %v8560_v52 }
 0xf0e   : > { %7409 = vmatprep.subr.bf16.mxu1 %v7408_v19 }
 0xfdb   : > { %v6875_v58 = vpop.f32.mrb[26].mxu1 }
 0xfdc   : > { %v8583_v59 = vadd.f32 %v6875_v58, %v2747_v35  ;;  %v2821_v60 = vpop.f32.mrb[27].mxu1 }
 0xfdd   : > { %v8586_v63 = vadd.f32 %v2821_v60, %v8503_v30  ;;  %v3461_v60 = vld [vmem:[%s9266_s2 + $0x780] sm:$0xff] }
 0xfde   : > { %v2937_v4 = vmax.f32 %v8583_v59, 0.0  ;;  %v7422_v1 = vpack.c.bf16 %v3462_v0, %v3461_v60 }
 0xfdf   : > { %v2936_v2 = vmax.f32 %v8586_v63, 0.0 }
 0xfe1   : > { %6895 = vmatprep.mubr.msk.f32.mxu1 %vm1656_vm13, %v2936_v2  ;;  %v3550_v2 = vld [vmem:[%s9265_s1 + $0x148] sm:$0xff] }
 0xfe2   : > { %6896 = vmatmul.mubr.msk.f32.vlgmr.msra.gmra.mrb[28].mxu1 %vm1656_vm13, %v2937_v4  ;;  %v3549_v4 = vld [vmem:[%s9265_s1 + $0x140] sm:$0xff] }
 0xfe3   : > { %7411 = vmatpush3.bf16.msra.mxu1 %v7408_v19  ;;  %6920 = vmatprep.mubr.msk.f32.mxu1 %vm1656_vm13, %v3220_v8 }
 0xfe4   : > { %7414 = vmatprep.subr.msk.bf16.mxu1 %vm8307_vm12, %v7412_v5 }
 0xfe7   : > { %7417 = vmatpush3.bf16.msk.msra.mxu1 %vm8307_vm12, %v7412_v5 }
 0xfe8   : > { %7424 = vmatprep.subr.msk.bf16.mxu1 %vm8638_vm15, %v7422_v1 }
 0xfea   : > { %6921 = vmatmul.mubr.msk.f32.vlgmr.msra.gmra.mrb[30].mxu1 %vm1656_vm13, %v3221_v9 }
 0xfeb   : > { %7427 = vmatpush3.bf16.msk.msra.mxu1 %vm8638_vm15, %v7422_v1  ;;  %v3216_v1 = vld [vmem:[%s9266_s2 + $0x6c0] sm:$0xff] }
0x10b5   : > { %v6897_v15 = vpop.f32.mrb[28].mxu1 }
0x10b6   : > { %v3017_v17 = vpop.f32.mrb[29].mxu1 }
0x10b7   : > { %v7647_v18 = vpack.i.bf16 %v6897_v15, %v3017_v17  ;;  %v7404_v20 = vpack.c.bf16 %v6897_v15, %v3017_v17 }
0x10b9   : > { %7648 = vrot.lane.b32.xlu1 %v7647_v18, %s7718_s7 }
0x10bd   : > { %v6922_v24 = vpop.f32.mrb[30].mxu1  ;;  %3032 = vrot.lane.b32.xlu1 %v3027_v21, %s7713_s25 }
0x10be   : > { %v3301_v25 = vpop.f32.mrb[31].mxu1  ;;  %v3333_v26 = vmul.f32 %v6922_v24, %v3330_v11  ;;  %v3353_v30 = vmul.f32 %v6922_v24, %v3350_v29  ;;  %v3323_v42 = vmul.f32 %v6922_v24, %v3320_v61  ;;  %v3200_v61 = vld [vmem:[%s9265_s1 + $0x100] sm:$0xff] }
0x10bf   : > { %v3332_v27 = vmul.f32 %v3326_v16, %v3301_v25  ;;  %v3352_v31 = vmul.f32 %v3346_v22, %v3301_v25  ;;  %v3322_v43 = vmul.f32 %v3315_v12, %v3301_v25  ;;  %v3603_v22 = vld [vmem:[%s9265_s1 + $0x150] sm:$0xff] }
0x10c1   : > { %3336 = vrot.lane.b32.xlu0 %v3332_v27, %s7718_s7  ;;  %3338 = vrot.lane.b32.xlu1 %v3333_v26, %s7718_s7 }
0x10c5   : > { %3356 = vrot.lane.b32.xlu0 %v3352_v31, %s7715_s15  ;;  %3358 = vrot.lane.b32.xlu1 %v3353_v30, %s7715_s15 }
0x10c9   : > { %3370 = vperm.xlu0 %7645, %v3366_v32   ;;  %3375 = vperm.xlu1 %7646, %v3367_v13   ;;  %v3606_v32 = vld [vmem:[%s9265_s1 + $0x168] sm:$0xff]  ;;  %v3605_v13 = vld [vmem:[%s9265_s1 + $0x160] sm:$0xff] }
0x10cd   : > { %7653 = vset.pattern.permute.xlu1 %v7714_v44  ;;  %7652 = vset.pattern.permute.xlu0 %v7714_v44 }
0x10ce   : > { %3568 = vperm.xlu1 %7653, %v3550_v2   ;;  %3564 = vperm.xlu0 %7652, %v3549_v4  }
0x10d2   : > { %7654 = vset.pattern.permute.xlu1 %v7717_v28  ;;  %7655 = vset.pattern.permute.xlu0 %v7717_v28 }
0x10d3   : > { %3584 = vperm.xlu1 %7654, %v3549_v4   ;;  %3588 = vperm.xlu0 %7655, %v3550_v2  }
0x10d7   : > { %7656 = vset.pattern.permute.xlu1 %v7706_v6  ;;  %7657 = vset.pattern.permute.xlu0 %v7706_v6 }
0x10d8   : > { %3553 = vperm.xlu1 %7656, %v3549_v4  }
0x10dc   : > { %3558 = vperm.xlu1 %7656, %v3550_v2   ;;  %v3217_v2 = vld [vmem:[%s9266_s2 + $0x6d8] sm:$0xff] }
0x112b   : > { %v7649_v33 = vpop.permute.xlu1 %7648 }
0x112c   : > { %v7651_v35 = vunpack.i.h.bf16 %v7649_v33  ;;  %v7650_v36 = vunpack.i.l.bf16 %v7649_v33  ;;  %v3201_v33 = vld [vmem:[%s9265_s1 + $0x108] sm:$0xff] }
0x112e   : > { %v7400_v37 = vpack.c.bf16 %v7651_v35, %v7650_v36  ;;  %v8703_v35 = vld [vmem:[%s9265_s1 + $0x320] sm:$0xff]  ;;  %v8708_v36 = vld [vmem:[%s9265_s1 + $0x328] sm:$0xff] }
0x112f   : > { %v3033_v38 = vpop.permute.xlu1 %3032 }
0x1130   : > { %7401 = vmatprep.subr.bf16.mxu0 %v7400_v37 }
0x1131   : > { %7403 = vmatpush3.bf16.msra.mxu0 %v7400_v37  ;;  %v8717_v37 = vld [vmem:[%s9265_s1 + $0x170] sm:$0xff] }
0x1132   : > { %7405 = vmatprep.subr.bf16.mxu0 %v7404_v20 }
0x1133   : > { %v3337_v7 = vpop.permute.xlu0 %3336  ;;  %v3339_v34 = vpop.permute.xlu1 %3338 }
0x1134   : > { %6903 = vmatmul.mubr.msk.f32.vlgmr.msra.gmra.mrb[32].mxu0 %vm412_vm4, %v3033_v38  ;;  %v3342_v3 = vadd.f32 %v3337_v7, %v3322_v43  ;;  %v3343_v47 = vadd.f32 %v3339_v34, %v3323_v42  ;;  %v8724_v38 = vld [vmem:[%s9265_s1 + $0x180] sm:$0xff]  ;;  %v4305_v7 = vld [vmem:[%s9265_s1 + $0x1d0] sm:$0xff] }
0x1135   : > { %7407 = vmatpush3.bf16.msra.mxu0 %v7404_v20  ;;  %6909 = vmatprep.mubr.msk.f32.mxu0 %vm412_vm4, %v3026_v10  ;;  %v4307_v34 = vld [vmem:[%s9265_s1 + $0x1e0] sm:$0xff]  ;;  %v4269_v42 = vld [vmem:[%s9265_s1 + $0x190] sm:$0xff] }
0x1136   : > { %v4271_v43 = vld [vmem:[%s9265_s1 + $0x1a0] sm:$0xff] }
0x1137   : > { %v3357_v50 = vpop.permute.xlu0 %3356  ;;  %v3359_v51 = vpop.permute.xlu1 %3358 }
0x1138   : > { %v3362_v53 = vadd.f32 %v3357_v50, %v3342_v3  ;;  %v3363_v54 = vadd.f32 %v3359_v51, %v3343_v47 }
0x113a   : > { %v7418_v19 = vpack.c.bf16 %v3363_v54, %v3362_v53 }
0x113c   : > { %6910 = vmatmul.mubr.msk.f32.vlgmr.msra.gmra.mrb[32].mxu0 %vm412_vm4, %v3027_v21  ;;  %7419 = vmatprep.subr.bf16.mxu0 %v7418_v19 }
0x113d   : > { %7421 = vmatpush3.bf16.msra.mxu0 %v7418_v19  ;;  %6927 = vmatprep.mubr.msk.f32.mxu0 %vm412_vm4, %v3364_v55 }
0x1140   : > { %6928 = vmatmul.mubr.msk.f32.vlgmr.msra.gmra.mrb[34].mxu0 %vm412_vm4, %v3365_v57 }
0x1141   : > { %6941 = vmatprep.mubr.msk.f32.mxu0 %vm412_vm4, %v3603_v22 }
0x1148   : > { %v3376_v9 = vpop.permute.xlu1 %3375  ;;  %v3371_v11 = vpop.permute.xlu0 %3370 }
0x114d   : > { %v3565_v18 = vpop.permute.xlu0 %3564  ;;  %v3569_v20 = vpop.permute.xlu1 %3568 }
0x1152   : > { %v3589_v26 = vpop.permute.xlu0 %3588  ;;  %v3585_v29 = vpop.permute.xlu1 %3584 }
0x1157   : > { %v3554_v3 = vpop.permute.xlu1 %3553 }
0x115b   : > { %v3559_v47 = vpop.permute.xlu1 %3558 }
0x120f   : > { %v8662_v5 = vpop.f32.mrb[32].mxu0 }
0x1210   : > { %v8664_v8 = vpop.f32.mrb[33].mxu0 }
0x1213   : > { %v6929_v10 = vpop.f32.mrb[34].mxu0 }
0x1214   : > { %v3456_v12 = vadd.f32 %v6929_v10, %v3376_v9  ;;  %v3450_v14 = vpop.f32.mrb[35].mxu0  ;;  %v7432_v10 = vpack.c.bf16 %v3217_v2, %v3216_v1 }
0x1215   : > { %v3451_v15 = vadd.f32 %v3450_v14, %v3371_v11  ;;  %v3218_v11 = vld [vmem:[%s9266_s2 + $0x6f0] sm:$0xff]  ;;  %v3604_v14 = vld [vmem:[%s9265_s1 + $0x158] sm:$0xff] }
0x1216   : > { %v3460_v17 = vmax.f32 %v3456_v12, 0.0  ;;  %v3219_v12 = vld [vmem:[%s9266_s2 + $0x708] sm:$0xf] }
0x1217   : > { %v3459_v16 = vmax.f32 %v3451_v15, 0.0  ;;  %v7436_v15 = vpack.c.bf16 %v3219_v12, %v3218_v11  ;;  %v4426_v12 = vld [vmem:[%s9266_s2 + $0x7b0] sm:$0xff] }
0x1219   : > { %6934 = vmatprep.mubr.msk.f32.mxu1 %vm3463_vm0, %v3459_v16 }
0x121a   : > { %6935 = vmatmul.mubr.msk.f32.vlgmr.msra.gmra.mrb[32].mxu1 %vm3463_vm0, %v3460_v17 }
0x12ed   : > { %v6936_v21 = vpop.f32.mrb[32].mxu1 }
0x12ee   : > { %v3572_v24 = vmul.f32 %v6936_v21, %v3569_v20  ;;  %v3540_v25 = vpop.f32.mrb[33].mxu1  ;;  %v3592_v30 = vmul.f32 %v6936_v21, %v3589_v26  ;;  %v3562_v51 = vmul.f32 %v6936_v21, %v3559_v47  ;;  %v4297_v47 = vld [vmem:[%s9265_s1 + $0x1b0] sm:$0xff] }
0x12ef   : > { %v3571_v27 = vmul.f32 %v3565_v18, %v3540_v25  ;;  %v3591_v31 = vmul.f32 %v3585_v29, %v3540_v25  ;;  %v3561_v54 = vmul.f32 %v3554_v3, %v3540_v25  ;;  %v4272_v3 = vld [vmem:[%s9265_s1 + $0x1a8] sm:$0xff] }
0x12f0   : > { %3577 = vrot.lane.b32.xlu1 %v3572_v24, %s7718_s7 }
0x12f1   : > { %3575 = vrot.lane.b32.xlu0 %v3571_v27, %s7718_s7 }
0x12f4   : > { %3597 = vrot.lane.b32.xlu1 %v3592_v30, %s7715_s15 }
0x12f5   : > { %3595 = vrot.lane.b32.xlu0 %v3591_v31, %s7715_s15 }
0x12f8   : > { %3614 = vperm.xlu1 %7656, %v3606_v32  }
0x12f9   : > { %3609 = vperm.xlu0 %7657, %v3605_v13  }
0x12fc   : > { %3204 = vperm.xlu1 %7656, %v3200_v61  }
0x12fd   : > { %3209 = vperm.xlu0 %7657, %v3201_v33  }
0x1300   : > { %2920 = vrot.lane.b32.xlu1 %v8550_v49, %s7718_s7 }
0x1301   : > { %2922 = vrot.lane.b32.xlu0 %v8547_v48, %s7718_s7 }
0x1304   : > { %2928 = vrot.lane.b32.xlu1 %v8550_v49, %s7715_s15 }
0x1305   : > { %2930 = vrot.lane.b32.xlu0 %v8547_v48, %s7715_s15 }
0x1308   : > { %3784 = vrot.lane.b32.xlu1 %v8465_v56, %s7713_s25 }
0x1309   : > { %3786 = vrot.lane.b32.xlu0 %v8478_v62, %s7713_s25 }
0x130c   : > { %3788 = vrot.lane.b32.xlu1 %v8703_v35, %s7713_s25 }
0x130d   : > { %3790 = vrot.lane.b32.xlu0 %v8708_v36, %s7713_s25 }
0x1311   : > { %4067 = vrot.lane.b32.xlu0 %v8717_v37, %s7713_s25 }
0x1315   : > { %4071 = vrot.lane.b32.xlu0 %v8724_v38, %s7713_s25 }
0x1319   : > { %4311 = vperm.xlu0 %7657, %v4305_v7   ;;  %v4060_v7 = vld [vmem:[%s9265_s1 + $0x178] sm:$0xff] }
0x131d   : > { %4321 = vperm.xlu0 %7657, %v4307_v34   ;;  %v4062_v34 = vld [vmem:[%s9265_s1 + $0x188] sm:$0xff] }
0x1321   : > { %4275 = vperm.xlu0 %7657, %v4269_v42   ;;  %v4306_v42 = vld [vmem:[%s9265_s1 + $0x1d8] sm:$0xff] }
0x1325   : > { %4285 = vperm.xlu0 %7657, %v4271_v43  }
0x1329   : > { %7663 = vset.pattern.permute.xlu0 %v7714_v44 }
0x1362   : > { %v3578_v50 = vpop.permute.xlu1 %3577 }
0x1363   : > { %v3576_v53 = vpop.permute.xlu0 %3575  ;;  %v3582_v19 = vadd.f32 %v3578_v50, %v3562_v51 }
0x1364   : > { %v3581_v55 = vadd.f32 %v3576_v53, %v3561_v54 }
0x1366   : > { %v3598_v57 = vpop.permute.xlu1 %3597 }
0x1367   : > { %v3602_v60 = vadd.f32 %v3598_v57, %v3582_v19  ;;  %v3596_v0 = vpop.permute.xlu0 %3595 }
0x1368   : > { %v3601_v4 = vadd.f32 %v3596_v0, %v3581_v55 }
0x136a   : > { %v7428_v9 = vpack.c.bf16 %v3602_v60, %v3601_v4 }
0x136c   : > { %7429 = vmatprep.subr.bf16.mxu0 %v7428_v9 }
0x136d   : > { %7431 = vmatpush3.bf16.msra.mxu0 %v7428_v9 }
0x136e   : > { %7433 = vmatprep.subr.bf16.mxu0 %v7432_v10 }
0x1370   : > { %6942 = vmatmul.mubr.msk.f32.vlgmr.msra.gmra.mrb[36].mxu0 %vm412_vm4, %v3604_v14 }
0x1371   : > { %7435 = vmatpush3.bf16.msra.mxu0 %v7432_v10  ;;  %6952 = vmatprep.mubr.msk.f32.mxu0 %vm1656_vm13, %v8586_v63 }
0x1372   : > { %7438 = vmatprep.subr.msk.bf16.mxu0 %vm8307_vm12, %v7436_v15 }
0x1375   : > { %7441 = vmatpush3.bf16.msk.msra.mxu0 %vm8307_vm12, %v7436_v15 }
0x1376   : > { %7451 = vmatprep.subr.bf16.mxu0 %v8542_v46 }
0x1377   : > { %v3615_v16 = vpop.permute.xlu1 %3614 }
0x1378   : > { %v3610_v17 = vpop.permute.xlu0 %3609  ;;  %6953 = vmatmul.mubr.msk.f32.vlgmr.msra.gmra.mrb[36].mxu0 %vm1656_vm13, %v8583_v59 }
0x1379   : > { %7453 = vmatpush3.bf16.msra.mxu0 %v8542_v46  ;;  %6983 = vmatprep.mubr.msk.f32.mxu0 %vm1656_vm13, %v2735_v45 }
0x137a   : > { %7456 = vmatprep.subr.msk.bf16.mxu0 %vm8307_vm12, %v8560_v52 }
0x137b   : > { %v3205_v63 = vpop.permute.xlu1 %3204 }
0x137c   : > { %v3210_v18 = vpop.permute.xlu0 %3209  ;;  %v3212_v59 = vadd.f32 %v3205_v63, %v8664_v8  ;;  %v4300_v63 = vld [vmem:[%s9265_s1 + $0x1c8] sm:$0xff] }
0x137d   : > { %7459 = vmatpush3.bf16.msk.msra.mxu0 %vm8307_vm12, %v8560_v52  ;;  %v3213_v25 = vadd.f32 %v8662_v5, %v3210_v18  ;;  %v4568_v18 = vld [vmem:[%s9266_s2 + $0x7e0] sm:$0xff] }
0x137f   : > { %v2921_v20 = vpop.permute.xlu1 %2920 }
0x1380   : > { %v2923_v21 = vpop.permute.xlu0 %2922  ;;  %6984 = vmatmul.mubr.msk.f32.vlgmr.msra.gmra.mrb[38].mxu0 %vm1656_vm13, %v2736_v40  ;;  %v2926_v41 = vmax.f32 %v8550_v49, %v2921_v20  ;;  %v4569_v20 = vld [vmem:[%s9266_s2 + $0x7f8] sm:$0x3f] }
0x1381   : > { %v2927_v45 = vmax.f32 %v8547_v48, %v2923_v21  ;;  %7014 = vmatprep.mubr.msk.f32.mxu0 %vm571_vm5, %v4297_v47  ;;  %v7482_v21 = vpack.c.bf16 %v4569_v20, %v4568_v18 }
0x1383   : > { %v2929_v46 = vpop.permute.xlu1 %2928 }
0x1384   : > { %v2934_v22 = vmax.f32 %v2926_v41, %v2929_v46  ;;  %v2931_v24 = vpop.permute.xlu0 %2930  ;;  %v4926_v41 = vld [vmem:[%s9266_s2 + $0x840] sm:$0xff] }
0x1385   : > { %v2935_v26 = vmax.f32 %v2927_v45, %v2931_v24  ;;  %v4927_v45 = vld [vmem:[%s9266_s2 + $0x858] sm:$0x3f] }
0x1386   : > { %v3214_v23 = vadd.f32 %v3212_v59, %v2934_v22  ;;  %v7504_v46 = vpack.c.bf16 %v4927_v45, %v4926_v41  ;;  %v5029_v24 = vld [vmem:[%s9265_s1 + $0x238] sm:$0xff] }
0x1387   : > { %v3215_v52 = vadd.f32 %v3213_v25, %v2935_v26  ;;  %v3785_v29 = vpop.permute.xlu1 %3784  ;;  %v5028_v25 = vld [vmem:[%s9265_s1 + $0x230] sm:$0xff] }
0x1388   : > { %6959 = vmatprep.mubr.msk.f32.mxu1 %vm412_vm4, %v3785_v29  ;;  %v3787_v48 = vpop.permute.xlu0 %3786  ;;  %5057 = vperm.xlu0 %7663, %v5028_v25  }
0x1389   : > { %v7446_v27 = vpack.c.bf16 %v3215_v52, %v3214_v23 }
0x138b   : > { %v3789_v32 = vpop.permute.xlu1 %3788 }
0x138c   : > { %v3791_v33 = vpop.permute.xlu0 %3790  ;;  %7666 = vset.pattern.permute.xlu0 %v7717_v28 }
0x138d   : > { %5101 = vperm.xlu0 %7666, %v5029_v24  }
0x1390   : > { %v4068_v43 = vpop.permute.xlu0 %4067 }
0x1394   : > { %v4072_v55 = vpop.permute.xlu0 %4071 }
0x1398   : > { %v4312_v59 = vpop.permute.xlu0 %4311 }
0x139c   : > { %v4322_v26 = vpop.permute.xlu0 %4321 }
0x13a0   : > { %v4276_v52 = vpop.permute.xlu0 %4275 }
0x144b   : > { %v6954_v39 = vpop.f32.mrb[36].mxu0 }
0x144c   : > { %v7564_v40 = vadd.f32 %v6954_v39, %v3615_v16  ;;  %v3773_v30 = vpop.f32.mrb[37].mxu0  ;;  %v4298_v16 = vld [vmem:[%s9265_s1 + $0x1b8] sm:$0xff] }
0x144d   : > { %v7565_v49 = vadd.f32 %v3773_v30, %v3610_v17  ;;  %v4299_v17 = vld [vmem:[%s9265_s1 + $0x1c0] sm:$0xff] }
0x144f   : > { %v7442_v31 = vpack.c.bf16 %v7564_v40, %v7565_v49 }
0x1451   : > { %7443 = vmatprep.subr.bf16.mxu1 %v7442_v31 }
0x1452   : > { %7445 = vmatpush3.bf16.msra.mxu1 %v7442_v31  ;;  %v5031_v31 = vld [vmem:[%s9265_s1 + $0x248] sm:$0xff] }
0x1453   : > { %7447 = vmatprep.subr.bf16.mxu1 %v7446_v27  ;;  %v6985_v8 = vpop.f32.mrb[38].mxu0 }
0x1454   : > { %v4050_v13 = vpop.f32.mrb[39].mxu0 }
0x1455   : > { %v7658_v5 = vpack.i.bf16 %v6985_v8, %v4050_v13  ;;  %v7464_v61 = vpack.c.bf16 %v6985_v8, %v4050_v13  ;;  %6960 = vmatmul.mubr.msk.f32.vlgmr.msra.gmra.mrb[34].mxu1 %vm412_vm4, %v3787_v48  ;;  %v4286_v8 = vpop.permute.xlu0 %4285 }
0x1456   : > { %7449 = vmatpush3.bf16.msra.mxu1 %v7446_v27  ;;  %6962 = vmatprep.mubr.msk.f32.mxu1 %vm412_vm4, %v3789_v32  ;;  %v5030_v27 = vld [vmem:[%s9265_s1 + $0x240] sm:$0xff] }
0x1457   : > { %7659 = vrot.lane.b32.xlu1 %v7658_v5, %s7718_s7  ;;  %5105 = vperm.xlu0 %7666, %v5030_v27  }
0x1459   : > { %6963 = vmatmul.mubr.msk.f32.gmra.mrb[36].mxu1 %vm412_vm4, %v3791_v33 }
0x145a   : > { %6969 = vmatprep.mubr.msk.f32.mxu1 %vm412_vm4, %v8465_v56  ;;  %v4308_v56 = vld [vmem:[%s9265_s1 + $0x1e8] sm:$0xff] }
0x145b   : > { %4069 = vrot.lane.b32.xlu1 %v4060_v7, %s7713_s25  ;;  %7669 = vset.pattern.permute.xlu0 %v7706_v6 }
0x145c   : > { %5034 = vperm.xlu0 %7669, %v5028_v25  }
0x145d   : > { %6970 = vmatmul.mubr.msk.f32.vlgmr.msra.gmra.mrb[34].mxu1 %vm412_vm4, %v8478_v62  ;;  %v4270_v62 = vld [vmem:[%s9265_s1 + $0x198] sm:$0xff] }
0x145e   : > { %6972 = vmatprep.mubr.msk.f32.mxu1 %vm412_vm4, %v8703_v35 }
0x145f   : > { %4073 = vrot.lane.b32.xlu1 %v4062_v34, %s7713_s25 }
0x1460   : > { %5049 = vperm.xlu0 %7669, %v5031_v31  }
0x1461   : > { %6973 = vmatmul.mubr.msk.f32.gmra.mrb[36].mxu1 %vm412_vm4, %v8708_v36 }
0x1462   : > { %6990 = vmatprep.mubr.msk.f32.mxu1 %vm412_vm4, %v4068_v43 }
0x1463   : > { %4316 = vperm.xlu1 %7656, %v4306_v42  }
0x1467   : > { %4326 = vperm.xlu1 %7656, %v4308_v56  }
0x146b   : > { %4280 = vperm.xlu1 %7656, %v4270_v62  }
0x146f   : > { %4290 = vperm.xlu1 %7656, %v4272_v3  }
0x1473   : > { %7664 = vset.pattern.permute.xlu1 %v7714_v44 }
0x1474   : > { %5061 = vperm.xlu1 %7664, %v5029_v24  }
0x1478   : > { %7665 = vset.pattern.permute.xlu1 %v7717_v28 }
0x1479   : > { %5097 = vperm.xlu1 %7665, %v5028_v25  }
0x147d   : > { %7667 = vset.pattern.permute.xlu1 %v7714_v44 }
0x147e   : > { %5065 = vperm.xlu1 %7667, %v5030_v27  }
0x1482   : > { %5069 = vperm.xlu1 %7667, %v5031_v31  }
0x1486   : > { %7668 = vset.pattern.permute.xlu1 %v7717_v28 }
0x1487   : > { %5109 = vperm.xlu1 %7668, %v5031_v31   ;;  %v8958_v31 = vld [vmem:[%s9265_s1 + $0x208] sm:$0xff] }
0x148b   : > { %7670 = vset.pattern.permute.xlu1 %v7706_v6 }
0x148c   : > { %5039 = vperm.xlu1 %7670, %v5029_v24  }
0x1490   : > { %5044 = vperm.xlu1 %7670, %v5030_v27  }
0x14c9   : > { %v7660_v50 = vpop.permute.xlu1 %7659 }
0x14ca   : > { %v7662_v51 = vunpack.i.h.bf16 %v7660_v50  ;;  %v7661_v53 = vunpack.i.l.bf16 %v7660_v50 }
0x14cc   : > { %v7460_v54 = vpack.c.bf16 %v7662_v51, %v7661_v53 }
0x14cd   : > { %v4070_v19 = vpop.permute.xlu1 %4069 }
0x14ce   : > { %7461 = vmatprep.subr.bf16.mxu1 %v7460_v54 }
0x14cf   : > { %7463 = vmatpush3.bf16.msra.mxu1 %v7460_v54 }
0x14d0   : > { %7465 = vmatprep.subr.bf16.mxu1 %v7464_v61 }
0x14d1   : > { %v4074_v57 = vpop.permute.xlu1 %4073 }
0x14d2   : > { %6991 = vmatmul.mubr.msk.f32.vlgmr.msra.gmra.mrb[38].mxu1 %vm412_vm4, %v4070_v19 }
0x14d3   : > { %7467 = vmatpush3.bf16.msra.mxu1 %v7464_v61  ;;  %6993 = vmatprep.mubr.msk.f32.mxu1 %vm412_vm4, %v4072_v55 }
0x14d4   : > { %7484 = vmatprep.subr.msk.bf16.mxu1 %vm8638_vm15, %v7482_v21 }
0x14d6   : > { %6994 = vmatmul.mubr.msk.f32.gmra.mrb[40].mxu1 %vm412_vm4, %v4074_v57 }
0x14d7   : > { %7000 = vmatprep.mubr.msk.f32.mxu1 %vm412_vm4, %v8717_v37  ;;  %v4427_v37 = vld [vmem:[%s9266_s2 + $0x7c8] sm:$0x3f] }
0x14d8   : > { %v7476_v15 = vpack.c.bf16 %v4427_v37, %v4426_v12 }
0x14da   : > { %7001 = vmatmul.mubr.msk.f32.vlgmr.msra.gmra.mrb[38].mxu1 %vm412_vm4, %v4060_v7 }
0x14db   : > { %7003 = vmatprep.mubr.msk.f32.mxu1 %vm412_vm4, %v8724_v38  ;;  %7487 = vmatpush3.bf16.msk.msra.mxu1 %vm8638_vm15, %v7482_v21 }
0x14dc   : > { %7506 = vmatprep.subr.msk.bf16.mxu1 %vm8638_vm15, %v7504_v46 }
0x14de   : > { %7004 = vmatmul.mubr.msk.f32.gmra.mrb[40].mxu1 %vm412_vm4, %v4062_v34  ;;  %vm6184_vm4 = vcmask 1024  }
0x14e2   : > { %v4317_v22 = vpop.permute.xlu1 %4316 }
0x14e6   : > { %v4327_v23 = vpop.permute.xlu1 %4326 }
0x14ea   : > { %v4281_v29 = vpop.permute.xlu1 %4280 }
0x14ee   : > { %v4291_v13 = vpop.permute.xlu1 %4290 }
0x1530   : > { %v6971_v60 = vpop.f32.mrb[34].mxu1 }
0x1531   : > { %v4302_v0 = vmax.f32 %v6971_v60, 0.0  ;;  %v3959_v1 = vpop.f32.mrb[35].mxu1 }
0x1532   : > { %v4301_v2 = vmax.f32 %v3959_v1, 0.0 }
0x1534   : > { %v7468_v4 = vpack.c.bf16 %v4302_v0, %v4301_v2  ;;  %v6974_v9 = vpop.f32.mrb[36].mxu1 }
0x1535   : > { %v4304_v10 = vmax.f32 %v6974_v9, 0.0  ;;  %v3969_v11 = vpop.f32.mrb[37].mxu1 }
0x1536   : > { %v4303_v14 = vmax.f32 %v3969_v11, 0.0  ;;  %7469 = vmatprep.subr.bf16.mxu0 %v7468_v4 }
0x1537   : > { %7471 = vmatpush3.bf16.msra.mxu0 %v7468_v4  ;;  %v5062_v4 = vpop.permute.xlu1 %5061 }
0x1538   : > { %v7472_v38 = vpack.c.bf16 %v4304_v10, %v4303_v14 }
0x153a   : > { %7473 = vmatprep.subr.bf16.mxu0 %v7472_v38 }
0x153b   : > { %7475 = vmatpush3.bf16.msra.mxu0 %v7472_v38  ;;  %v5098_v11 = vpop.permute.xlu1 %5097 }
0x153c   : > { %7478 = vmatprep.subr.msk.bf16.mxu0 %vm8638_vm15, %v7476_v15 }
0x153e   : > { %7015 = vmatmul.mubr.msk.f32.vlgmr.msra.gmra.mrb[40].mxu0 %vm571_vm5, %v4298_v16 }
0x153f   : > { %7017 = vmatprep.mubr.msk.f32.mxu0 %vm571_vm5, %v4299_v17  ;;  %7481 = vmatpush3.bf16.msk.msra.mxu0 %vm8638_vm15, %v7476_v15  ;;  %v5058_v15 = vpop.permute.xlu0 %5057 }
0x1542   : > { %7018 = vmatmul.mubr.msk.f32.gmra.mrb[42].mxu0 %vm571_vm5, %v4300_v63  ;;  %v5066_v63 = vpop.permute.xlu1 %5065 }
0x1543   : > { %v5102_v45 = vpop.permute.xlu0 %5101 }
0x1546   : > { %v5070_v24 = vpop.permute.xlu1 %5069 }
0x154a   : > { %v5110_v27 = vpop.permute.xlu1 %5109 }
0x15ad   : > { %v7002_v39 = vpop.f32.mrb[38].mxu1 }
0x15ae   : > { %v4250_v40 = vpop.f32.mrb[39].mxu1  ;;  %v4294_v49 = vadd.f32 %v7002_v39, %v4281_v29  ;;  %v5106_v29 = vpop.permute.xlu0 %5105 }
0x15af   : > { %v4293_v30 = vadd.f32 %v4276_v52, %v4250_v40 }
0x15b0   : > { %v4923_v19 = vmax.f32 %v4294_v49, 0.0 }
0x15b1   : > { %v7005_v48 = vpop.f32.mrb[40].mxu1  ;;  %7024 = vmatprep.mubr.msk.f32.mxu0 %vm3463_vm0, %v4293_v30  ;;  %v4922_v54 = vmax.f32 %v4293_v30, 0.0  ;;  %v8944_v30 = vld [vmem:[%s9265_s1 + $0x1f8] sm:$0xff] }
0x15b2   : > { %v4260_v32 = vpop.f32.mrb[41].mxu1  ;;  %7025 = vmatmul.mubr.msk.f32.vlgmr.msra.gmra.mrb[44].mxu0 %vm3463_vm0, %v4294_v49  ;;  %v4296_v61 = vadd.f32 %v7005_v48, %v4291_v13  ;;  %v8949_v49 = vld [vmem:[%s9265_s1 + $0x1f0] sm:$0xff]  ;;  %v8963_v48 = vld [vmem:[%s9265_s1 + $0x200] sm:$0xff]  ;;  %v5143_v13 = vld [vmem:[%s9265_s1 + $0x288] sm:$0xff] }
0x15b3   : > { %v4295_v5 = vadd.f32 %v4286_v8, %v4260_v32  ;;  %v5141_v8 = vld [vmem:[%s9265_s1 + $0x278] sm:$0xff]  ;;  %v5140_v32 = vld [vmem:[%s9265_s1 + $0x270] sm:$0xff] }
0x15b4   : > { %v4925_v57 = vmax.f32 %v4296_v61, 0.0 }
0x15b5   : > { %7027 = vmatprep.mubr.msk.f32.mxu0 %vm3463_vm0, %v4295_v5  ;;  %v4924_v55 = vmax.f32 %v4295_v5, 0.0  ;;  %v5142_v5 = vld [vmem:[%s9265_s1 + $0x280] sm:$0xff] }
0x15b6   : > { %7028 = vmatmul.mubr.msk.f32.gmra.mrb[46].mxu0 %vm3463_vm0, %v4296_v61  ;;  %v5035_v61 = vpop.permute.xlu0 %5034 }
0x1611   : > { %v7016_v33 = vpop.f32.mrb[40].mxu0 }
0x1612   : > { %v8893_v7 = vadd.f32 %v7016_v33, %v4317_v22  ;;  %v4407_v34 = vpop.f32.mrb[41].mxu0  ;;  %v5040_v33 = vpop.permute.xlu1 %5039 }
0x1613   : > { %v8895_v42 = vadd.f32 %v4407_v34, %v4312_v59  ;;  %v5050_v34 = vpop.permute.xlu0 %5049 }
0x1614   : > { %v4565_v62 = vmax.f32 %v8893_v7, 0.0 }
0x1615   : > { %v4564_v43 = vmax.f32 %v8895_v42, 0.0  ;;  %v7019_v56 = vpop.f32.mrb[42].mxu0 }
0x1616   : > { %v8899_v3 = vadd.f32 %v7019_v56, %v4327_v23  ;;  %v4417_v47 = vpop.f32.mrb[43].mxu0  ;;  %v5136_v23 = vld [vmem:[%s9265_s1 + $0x250] sm:$0xff] }
0x1617   : > { %v8901_v50 = vadd.f32 %v4417_v47, %v4322_v26  ;;  %7034 = vmatprep.mubr.msk.f32.mxu1 %vm3463_vm0, %v4564_v43  ;;  %v5045_v43 = vpop.permute.xlu1 %5044 }
0x1618   : > { %7035 = vmatmul.mubr.msk.f32.vlgmr.msra.gmra.mrb[42].mxu1 %vm3463_vm0, %v4565_v62  ;;  %v4567_v53 = vmax.f32 %v8899_v3, 0.0 }
0x1619   : > { %v4566_v51 = vmax.f32 %v8901_v50, 0.0  ;;  %7509 = vmatpush3.bf16.msk.msra.mxu1 %vm8638_vm15, %v7504_v46 }
0x161b   : > { %7037 = vmatprep.mubr.msk.f32.mxu1 %vm3463_vm0, %v4566_v51 }
0x161c   : > { %7038 = vmatmul.mubr.msk.f32.gmra.mrb[44].mxu1 %vm3463_vm0, %v4567_v53 }
0x161d   : > { %7072 = vmatprep.mubr.msk.f32.mxu1 %vm3463_vm0, %v4922_v54 }
0x1620   : > { %7073 = vmatmul.mubr.msk.f32.vlgmr.msra.gmra.mrb[46].mxu1 %vm3463_vm0, %v4923_v19 }
0x1621   : > { %7075 = vmatprep.mubr.msk.f32.mxu1 %vm3463_vm0, %v4924_v55 }
0x1624   : > { %7076 = vmatmul.mubr.msk.f32.gmra.mrb[48].mxu1 %vm3463_vm0, %v4925_v57 }
0x1625   : > { %7086 = vmatprep.mubr.msk.f32.mxu1 %vm571_vm5, %v5136_v23  ;;  %v5138_v23 = vld [vmem:[%s9265_s1 + $0x260] sm:$0xff] }
0x1685   : > { %v8915_v60 = vpop.f32.mrb[44].mxu0 }
0x1686   : > { %v8917_v0 = vpop.f32.mrb[45].mxu0 }
0x1689   : > { %v8919_v1 = vpop.f32.mrb[46].mxu0 }
0x168a   : > { %v8921_v2 = vpop.f32.mrb[47].mxu0 }
0x16eb   : > { %v7036_v9 = vpop.f32.mrb[42].mxu1 }
0x16ec   : > { %v4651_v10 = vpop.f32.mrb[43].mxu1 }
0x16ed   : > { %v7671_v12 = vpack.i.bf16 %v7036_v9, %v4651_v10  ;;  %v8923_v37 = vpack.c.bf16 %v7036_v9, %v4651_v10 }
0x16ef   : > { %v7039_v14 = vpop.f32.mrb[44].mxu1 }
0x16f0   : > { %v4661_v38 = vpop.f32.mrb[45].mxu1 }
0x16f1   : > { %v7676_v16 = vpack.i.bf16 %v7039_v14, %v4661_v38  ;;  %v8925_v17 = vpack.c.bf16 %v7039_v14, %v4661_v38 }
0x16f3   : > { %v7074_v18 = vpop.f32.mrb[46].mxu1 }
0x16f4   : > { %v5073_v20 = vmul.f32 %v7074_v18, %v5062_v4  ;;  %v5009_v21 = vpop.f32.mrb[47].mxu1  ;;  %v5113_v59 = vmul.f32 %v7074_v18, %v5102_v45  ;;  %v5053_v62 = vmul.f32 %v7074_v18, %v5040_v33 }
0x16f5   : > { %v5072_v41 = vmul.f32 %v5058_v15, %v5009_v21  ;;  %v5112_v25 = vmul.f32 %v5098_v11, %v5009_v21  ;;  %v5052_v51 = vmul.f32 %v5035_v61, %v5009_v21 }
0x16f6   : > { %5082 = vrot.lane.b32.xlu0 %v5073_v20, %s7719_s8 }
0x16f7   : > { %5080 = vrot.lane.b32.xlu1 %v5072_v41, %s7719_s8  ;;  %v7077_v46 = vpop.f32.mrb[48].mxu1 }
0x16f8   : > { %v5019_v22 = vpop.f32.mrb[49].mxu1  ;;  %v5075_v26 = vmul.f32 %v7077_v46, %v5070_v24  ;;  %v5115_v39 = vmul.f32 %v7077_v46, %v5110_v27  ;;  %v5055_v11 = vmul.f32 %v7077_v46, %v5050_v34  ;;  %v5137_v46 = vld [vmem:[%s9265_s1 + $0x258] sm:$0xff] }
0x16f9   : > { %v5074_v52 = vmul.f32 %v5066_v63, %v5019_v22  ;;  %v5114_v40 = vmul.f32 %v5106_v29, %v5019_v22  ;;  %v5054_v14 = vmul.f32 %v5045_v43, %v5019_v22  ;;  %v5139_v29 = vld [vmem:[%s9265_s1 + $0x268] sm:$0xff] }
0x16fa   : > { %5122 = vrot.lane.b32.xlu0 %v5113_v59, %s7718_s7 }
0x16fb   : > { %5120 = vrot.lane.b32.xlu1 %v5112_v25, %s7718_s7 }
0x16fe   : > { %5086 = vrot.lane.b32.xlu0 %v5075_v26, %s7719_s8 }
0x16ff   : > { %5084 = vrot.lane.b32.xlu1 %v5074_v52, %s7719_s8 }
0x1702   : > { %5126 = vrot.lane.b32.xlu0 %v5115_v39, %s7718_s7 }
0x1703   : > { %5124 = vrot.lane.b32.xlu1 %v5114_v40, %s7718_s7 }
0x1706   : > { %7677 = vrot.lane.b32.xlu0 %v7676_v16, %s7719_s8 }
0x1707   : > { %7672 = vrot.lane.b32.xlu1 %v7671_v12, %s7719_s8 }
0x170a   : > { %4680 = vrot.lane.b32.xlu0 %v8944_v30, %s7720_s17 }
0x170b   : > { %4678 = vrot.lane.b32.xlu1 %v8949_v49, %s7720_s17 }
0x170e   : > { %4684 = vrot.lane.b32.xlu0 %v8958_v31, %s7720_s17 }
0x170f   : > { %4682 = vrot.lane.b32.xlu1 %v8963_v48, %s7720_s17 }
0x1712   : > { %5151 = vperm.xlu0 %7669, %v5141_v8  }
0x1713   : > { %5146 = vperm.xlu1 %7670, %v5140_v32  }
0x1716   : > { %5161 = vperm.xlu0 %7669, %v5143_v13  }
0x1717   : > { %5156 = vperm.xlu1 %7670, %v5142_v5  }
0x171a   : > { %7682 = vset.pattern.permute.xlu0 %v7714_v44 }
0x171b   : > { %7681 = vset.pattern.permute.xlu1 %v7714_v44 }
0x1768   : > { %v5083_v56 = vpop.permute.xlu0 %5082 }
0x1769   : > { %v5081_v47 = vpop.permute.xlu1 %5080  ;;  %v5093_v53 = vadd.f32 %v5083_v56, %v5053_v62 }
0x176a   : > { %v5092_v54 = vadd.f32 %v5081_v47, %v5052_v51 }
0x176c   : > { %v5123_v19 = vpop.permute.xlu0 %5122 }
0x176d   : > { %v5133_v55 = vadd.f32 %v5123_v19, %v5093_v53  ;;  %v5121_v57 = vpop.permute.xlu1 %5120 }
0x176e   : > { %v5132_v4 = vadd.f32 %v5121_v57, %v5092_v54 }
0x1770   : > { %v7510_v9 = vpack.c.bf16 %v5133_v55, %v5132_v4  ;;  %v5087_v10 = vpop.permute.xlu0 %5086 }
0x1771   : > { %v5085_v12 = vpop.permute.xlu1 %5084  ;;  %v5095_v38 = vadd.f32 %v5087_v10, %v5055_v11 }
0x1772   : > { %7511 = vmatprep.subr.bf16.mxu1 %v7510_v9  ;;  %v5094_v15 = vadd.f32 %v5085_v12, %v5054_v14 }
0x1773   : > { %7513 = vmatpush3.bf16.msra.mxu1 %v7510_v9 }
0x1774   : > { %v5127_v16 = vpop.permute.xlu0 %5126 }
0x1775   : > { %v5135_v63 = vadd.f32 %v5127_v16, %v5095_v38  ;;  %v5125_v18 = vpop.permute.xlu1 %5124 }
0x1776   : > { %v5134_v20 = vadd.f32 %v5125_v18, %v5094_v15 }
0x1778   : > { %v7514_v21 = vpack.c.bf16 %v5135_v63, %v5134_v20  ;;  %v7678_v41 = vpop.permute.xlu0 %7677 }
0x1779   : > { %v7673_v45 = vpop.permute.xlu1 %7672  ;;  %v7680_v59 = vunpack.i.h.bf16 %v7678_v41  ;;  %v7679_v24 = vunpack.i.l.bf16 %v7678_v41 }
0x177a   : > { %v7675_v25 = vunpack.i.h.bf16 %v7673_v45  ;;  %v7674_v26 = vunpack.i.l.bf16 %v7673_v45  ;;  %7515 = vmatprep.subr.bf16.mxu1 %v7514_v21  ;;  %v5476_v45 = vld [vmem:[%s9265_s1 + $0x2b0] sm:$0xff] }
0x177b   : > { %7517 = vmatpush3.bf16.msra.mxu1 %v7514_v21  ;;  %v7492_v27 = vpack.c.bf16 %v7680_v59, %v7679_v24 }
0x177c   : > { %v7488_v22 = vpack.c.bf16 %v7675_v25, %v7674_v26  ;;  %v4681_v39 = vpop.permute.xlu0 %4680 }
0x177d   : > { %v4679_v52 = vpop.permute.xlu1 %4678 }
0x177e   : > { %7489 = vmatprep.subr.bf16.mxu0 %v7488_v22  ;;  %7087 = vmatmul.mubr.msk.f32.vlgmr.msra.gmra.mrb[50].mxu1 %vm571_vm5, %v5137_v46 }
0x177f   : > { %7491 = vmatpush3.bf16.msra.mxu0 %v7488_v22  ;;  %7089 = vmatprep.mubr.msk.f32.mxu1 %vm571_vm5, %v5138_v23  ;;  %v5481_v23 = vld [vmem:[%s9265_s1 + $0x2d8] sm:$0xff] }
0x1780   : > { %7493 = vmatprep.subr.bf16.mxu0 %v7492_v27  ;;  %7048 = vmatprep.mubr.msk.f32.mxu0 %vm571_vm5, %v4679_v52  ;;  %v4685_v8 = vpop.permute.xlu0 %4684  ;;  %v5480_v52 = vld [vmem:[%s9265_s1 + $0x2d0] sm:$0xff] }
0x1781   : > { %v4683_v40 = vpop.permute.xlu1 %4682 }
0x1782   : > { %7090 = vmatmul.mubr.msk.f32.gmra.mrb[52].mxu1 %vm571_vm5, %v5139_v29  ;;  %v5482_v29 = vld [vmem:[%s9265_s1 + $0x2e0] sm:$0xff] }
0x1783   : > { %7495 = vmatpush3.bf16.msra.mxu0 %v7492_v27  ;;  %7108 = vmatprep.mubr.msk.f32.mxu1 %vm571_vm5, %v5476_v45  ;;  %v5483_v27 = vld [vmem:[%s9265_s1 + $0x2e8] sm:$0xff]  ;;  %v5478_v45 = vld [vmem:[%s9265_s1 + $0x2c0] sm:$0xff] }
0x1784   : > { %7497 = vmatprep.subr.bf16.mxu0 %v8923_v37 }
0x1786   : > { %7049 = vmatmul.mubr.msk.f32.vlgmr.msra.gmra.mrb[48].mxu0 %vm571_vm5, %v4681_v39  ;;  %v4889_v39 = vld [vmem:[%s9265_s1 + $0x218] sm:$0xff] }
0x1787   : > { %7499 = vmatpush3.bf16.msra.mxu0 %v8923_v37  ;;  %7051 = vmatprep.mubr.msk.f32.mxu0 %vm571_vm5, %v4683_v40  ;;  %v5265_v37 = vld [vmem:[%s9266_s2 + $0x870] sm:$0x7f] }
0x1788   : > { %7501 = vmatprep.subr.bf16.mxu0 %v8925_v17  ;;  %v4888_v40 = vld [vmem:[%s9265_s1 + $0x210] sm:$0xff] }
0x178a   : > { %7052 = vmatmul.mubr.msk.f32.gmra.mrb[50].mxu0 %vm571_vm5, %v4685_v8  ;;  %v4891_v8 = vld [vmem:[%s9265_s1 + $0x228] sm:$0xff] }
0x178b   : > { %7503 = vmatpush3.bf16.msra.mxu0 %v8925_v17  ;;  %7062 = vmatprep.mubr.msk.f32.mxu0 %vm571_vm5, %v8949_v49  ;;  %v5368_v17 = vld [vmem:[%s9265_s1 + $0x290] sm:$0xff]  ;;  %v5370_v49 = vld [vmem:[%s9265_s1 + $0x2a0] sm:$0xff] }
0x178c   : > { %7092 = vmatprep.subr.msk.mxu0 %vm5279_vm1, %v5265_v37  ;;  %5397 = vperm.xlu1 %7681, %v5368_v17  }
0x178e   : > { %7063 = vmatmul.mubr.msk.f32.vlgmr.msra.gmra.mrb[48].mxu0 %vm571_vm5, %v8944_v30  ;;  %v5369_v30 = vld [vmem:[%s9265_s1 + $0x298] sm:$0xff] }
0x178f   : > { %7065 = vmatprep.mubr.msk.f32.mxu0 %vm571_vm5, %v8963_v48  ;;  %7093 = vmatpush3.msk.msra.mxu0 %vm5279_vm1, %v5265_v37  ;;  %v4890_v37 = vld [vmem:[%s9265_s1 + $0x220] sm:$0xff] }
0x1790   : > { %5401 = vperm.xlu0 %7682, %v5369_v30   ;;  %7683 = vset.pattern.permute.xlu1 %v7717_v28 }
0x1791   : > { %5437 = vperm.xlu1 %7683, %v5368_v17   ;;  %v5152_v48 = vpop.permute.xlu0 %5151 }
0x1792   : > { %7066 = vmatmul.mubr.msk.f32.gmra.mrb[50].mxu0 %vm571_vm5, %v8958_v31  ;;  %v5371_v31 = vld [vmem:[%s9265_s1 + $0x2a8] sm:$0xff]  ;;  %v5147_v32 = vpop.permute.xlu1 %5146 }
0x1794   : > { %5405 = vperm.xlu0 %7682, %v5370_v49  }
0x1795   : > { %5441 = vperm.xlu1 %7683, %v5369_v30  }
0x1796   : > { %v5157_v56 = vpop.permute.xlu1 %5156 }
0x1798   : > { %7685 = vset.pattern.permute.xlu0 %v7717_v28 }
0x1799   : > { %5445 = vperm.xlu0 %7685, %v5370_v49   ;;  %7684 = vset.pattern.permute.xlu1 %v7714_v44  ;;  %v5162_v44 = vpop.permute.xlu0 %5161 }
0x179a   : > { %5409 = vperm.xlu1 %7684, %v5371_v31  }
0x179d   : > { %7688 = vset.pattern.permute.xlu0 %v7706_v6 }
0x179e   : > { %5379 = vperm.xlu0 %7688, %v5369_v30   ;;  %7686 = vset.pattern.permute.xlu1 %v7717_v28  ;;  %v9110_v30 = vld [vmem:[%s9265_s1 + $0x318] sm:$0xff] }
0x179f   : > { %5449 = vperm.xlu1 %7686, %v5371_v31  }
0x17a3   : > { %7687 = vset.pattern.permute.xlu1 %v7706_v6 }
0x17a4   : > { %5374 = vperm.xlu1 %7687, %v5368_v17   ;;  %v9103_v17 = vld [vmem:[%s9265_s1 + $0x310] sm:$0xff] }
0x17a8   : > { %5384 = vperm.xlu1 %7687, %v5370_v49   ;;  %v9135_v49 = vld [vmem:[%s9265_s1 + $0x330] sm:$0xff] }
0x17ac   : > { %5389 = vperm.xlu1 %7687, %v5371_v31   ;;  %v9154_v31 = vld [vmem:[%s9265_s1 + $0x340] sm:$0xff] }
0x180b   : > { %v5398_v4 = vpop.permute.xlu1 %5397 }
0x180f   : > { %v5402_v10 = vpop.permute.xlu0 %5401 }
0x1810   : > { %v5438_v9 = vpop.permute.xlu1 %5437 }
0x1813   : > { %v5406_v41 = vpop.permute.xlu0 %5405 }
0x1814   : > { %v5442_v11 = vpop.permute.xlu1 %5441 }
0x1818   : > { %v5446_v26 = vpop.permute.xlu0 %5445 }
0x1819   : > { %v5410_v20 = vpop.permute.xlu1 %5409 }
0x181e   : > { %v5450_v25 = vpop.permute.xlu1 %5449 }
0x1851   : > { %v7088_v13 = vpop.f32.mrb[50].mxu1 }
0x1852   : > { %v5248_v5 = vadd.f32 %v7088_v13, %v5152_v48  ;;  %v5242_v61 = vpop.f32.mrb[51].mxu1  ;;  %v5375_v48 = vpop.permute.xlu1 %5374 }
0x1853   : > { %v5243_v33 = vadd.f32 %v5242_v61, %v5147_v32 }
0x1854   : > { %v5262_v62 = vmax.f32 %v5248_v5, 0.0  ;;  %v5380_v5 = vpop.permute.xlu0 %5379 }
0x1855   : > { %v5261_v34 = vmax.f32 %v5243_v33, 0.0  ;;  %v7091_v43 = vpop.f32.mrb[52].mxu1 }
0x1856   : > { %v5258_v47 = vadd.f32 %v7091_v43, %v5162_v44  ;;  %v5252_v28 = vpop.f32.mrb[53].mxu1  ;;  %v5385_v32 = vpop.permute.xlu1 %5384 }
0x1857   : > { %v5253_v51 = vadd.f32 %v5252_v28, %v5157_v56  ;;  %7094 = vmatprep.mubr.msk.f32.mxu0 %vm5266_vm2, %v5261_v34 }
0x1858   : > { %7095 = vmatmul.mubr.msk.f32.vlgmr.msra.gmra.mrb[52].mxu0 %vm5266_vm2, %v5262_v62  ;;  %v5264_v53 = vmax.f32 %v5258_v47, 0.0 }
0x1859   : > { %v5263_v6 = vmax.f32 %v5253_v51, 0.0 }
0x185a   : > { %v5390_v13 = vpop.permute.xlu1 %5389 }
0x185b   : > { %7097 = vmatprep.mubr.msk.f32.mxu0 %vm5266_vm2, %v5263_v6 }
0x185c   : > { %7098 = vmatmul.mubr.msk.f32.gmra.mrb[54].mxu0 %vm5266_vm2, %v5264_v53 }
0x1861   : > { %v9038_v54 = vpop.f32.mrb[48].mxu0 }
0x1862   : > { %v9040_v19 = vpop.f32.mrb[49].mxu0 }
0x1865   : > { %v9042_v55 = vpop.f32.mrb[50].mxu0 }
0x1866   : > { %v9044_v57 = vpop.f32.mrb[51].mxu0 }
0x192b   : > { %v9046_v12 = vpop.f32.mrb[52].mxu0 }
0x192c   : > { %v5413_v14 = vmul.f32 %v9046_v12, %v5402_v10  ;;  %v9049_v38 = vpop.f32.mrb[53].mxu0  ;;  %v5453_v63 = vmul.f32 %v9046_v12, %v5442_v11  ;;  %v5393_v33 = vmul.f32 %v9046_v12, %v5380_v5 }
0x192d   : > { %v5412_v15 = vmul.f32 %v5398_v4, %v9049_v38  ;;  %v5452_v21 = vmul.f32 %v5438_v9, %v9049_v38  ;;  %v5392_v34 = vmul.f32 %v5375_v48, %v9049_v38 }
0x192e   : > { %5422 = vrot.lane.b32.xlu1 %v5413_v14, %s7719_s8 }
0x192f   : > { %5420 = vrot.lane.b32.xlu0 %v5412_v15, %s7719_s8  ;;  %v9054_v16 = vpop.f32.mrb[54].mxu0 }
0x1930   : > { %v9057_v18 = vpop.f32.mrb[55].mxu0  ;;  %v5415_v59 = vmul.f32 %v9054_v16, %v5410_v20  ;;  %v5455_v46 = vmul.f32 %v9054_v16, %v5450_v25  ;;  %v5395_v4 = vmul.f32 %v9054_v16, %v5390_v13  ;;  %v4921_v20 = vld [vmem:[%s9266_s2 + $0x828] sm:$0x3f] }
0x1931   : > { %v5414_v24 = vmul.f32 %v5406_v41, %v9057_v18  ;;  %v5454_v22 = vmul.f32 %v5446_v26, %v9057_v18  ;;  %v5394_v10 = vmul.f32 %v5385_v32, %v9057_v18  ;;  %v5477_v18 = vld [vmem:[%s9265_s1 + $0x2b8] sm:$0xff] }
0x1932   : > { %5462 = vrot.lane.b32.xlu1 %v5453_v63, %s7718_s7  ;;  %v4920_v63 = vld [vmem:[%s9266_s2 + $0x810] sm:$0xff] }
0x1933   : > { %5460 = vrot.lane.b32.xlu0 %v5452_v21, %s7718_s7  ;;  %v7526_v41 = vpack.c.bf16 %v4921_v20, %v4920_v63 }
0x1936   : > { %5426 = vrot.lane.b32.xlu1 %v5415_v59, %s7719_s8  ;;  %v5479_v59 = vld [vmem:[%s9265_s1 + $0x2c8] sm:$0xff] }
0x1937   : > { %5424 = vrot.lane.b32.xlu0 %v5414_v24, %s7719_s8 }
0x193a   : > { %5466 = vrot.lane.b32.xlu1 %v5455_v46, %s7718_s7 }
0x193b   : > { %5464 = vrot.lane.b32.xlu0 %v5454_v22, %s7718_s7 }
0x193e   : > { %5491 = vperm.xlu1 %7687, %v5481_v23  }
0x193f   : > { %5486 = vperm.xlu0 %7688, %v5480_v52  }
0x1942   : > { %5501 = vperm.xlu1 %7687, %v5483_v27  }
0x1943   : > { %5496 = vperm.xlu0 %7688, %v5482_v29  }
0x1946   : > { %4899 = vperm.xlu1 %7687, %v4889_v39  }
0x1947   : > { %4894 = vperm.xlu0 %7688, %v4888_v40  }
0x194a   : > { %4909 = vperm.xlu1 %7687, %v4891_v8  }
0x194b   : > { %4904 = vperm.xlu0 %7688, %v4890_v37  }
0x194e   : > { %4532 = vrot.lane.b32.xlu1 %v8917_v0, %s7719_s8 }
0x194f   : > { %5705 = vrot.lane.b32.xlu0 %v9103_v17, %s7720_s17 }
0x1952   : > { %5707 = vrot.lane.b32.xlu1 %v9110_v30, %s7720_s17 }
0x1953   : > { %4534 = vrot.lane.b32.xlu0 %v8915_v60, %s7719_s8 }
0x1956   : > { %4550 = vrot.lane.b32.xlu1 %v8915_v60, %s7718_s7 }
0x1957   : > { %4548 = vrot.lane.b32.xlu0 %v8917_v0, %s7718_s7 }
0x195a   : > { %4536 = vrot.lane.b32.xlu1 %v8921_v2, %s7719_s8 }
0x195b   : > { %5709 = vrot.lane.b32.xlu0 %v8703_v35, %s7720_s17  ;;  %v9140_v35 = vld [vmem:[%s9265_s1 + $0x338] sm:$0xff] }
0x195e   : > { %5711 = vrot.lane.b32.xlu1 %v8708_v36, %s7720_s17  ;;  %v9149_v36 = vld [vmem:[%s9265_s1 + $0x348] sm:$0xff] }
0x195f   : > { %4538 = vrot.lane.b32.xlu0 %v8919_v1, %s7719_s8 }
0x1962   : > { %4554 = vrot.lane.b32.xlu1 %v8919_v1, %s7718_s7 }
0x1963   : > { %4552 = vrot.lane.b32.xlu0 %v8921_v2, %s7718_s7 }
0x1966   : > { %5715 = vrot.lane.b32.xlu1 %v9140_v35, %s7720_s17 }
0x1967   : > { %5713 = vrot.lane.b32.xlu0 %v9135_v49, %s7720_s17 }
0x196a   : > { %5719 = vrot.lane.b32.xlu1 %v9149_v36, %s7720_s17 }
0x196b   : > { %5717 = vrot.lane.b32.xlu0 %v9154_v31, %s7720_s17 }
0x19a0   : > { %v5423_v61 = vpop.permute.xlu1 %5422 }
0x19a1   : > { %v5421_v44 = vpop.permute.xlu0 %5420  ;;  %v5433_v43 = vadd.f32 %v5423_v61, %v5393_v33 }
0x19a2   : > { %v5432_v56 = vadd.f32 %v5421_v44, %v5392_v34 }
0x19a4   : > { %v5463_v62 = vpop.permute.xlu1 %5462 }
0x19a5   : > { %v5473_v47 = vadd.f32 %v5463_v62, %v5433_v43  ;;  %v5461_v28 = vpop.permute.xlu0 %5460 }
0x19a6   : > { %v5472_v51 = vadd.f32 %v5461_v28, %v5432_v56 }
0x19a8   : > { %v7518_v6 = vpack.c.bf16 %v5473_v47, %v5472_v51  ;;  %v5427_v53 = vpop.permute.xlu1 %5426 }
0x19a9   : > { %v5425_v9 = vpop.permute.xlu0 %5424  ;;  %v5435_v11 = vadd.f32 %v5427_v53, %v5395_v4  ;;  %v5963_v53 = vld [vmem:[%s9266_s2 + $0x888] sm:$0x7f] }
0x19aa   : > { %7519 = vmatprep.subr.bf16.mxu1 %v7518_v6  ;;  %v5434_v12 = vadd.f32 %v5425_v9, %v5394_v10 }
0x19ab   : > { %7521 = vmatpush3.bf16.msra.mxu1 %v7518_v6 }
0x19ac   : > { %v5467_v14 = vpop.permute.xlu1 %5466 }
0x19ad   : > { %v5475_v15 = vadd.f32 %v5467_v14, %v5435_v11  ;;  %v5465_v38 = vpop.permute.xlu0 %5464 }
0x19ae   : > { %v5474_v21 = vadd.f32 %v5465_v38, %v5434_v12 }
0x19b0   : > { %v7522_v16 = vpack.c.bf16 %v5475_v15, %v5474_v21 }
0x19b2   : > { %7523 = vmatprep.subr.bf16.mxu1 %v7522_v16 }
0x19b3   : > { %7525 = vmatpush3.bf16.msra.mxu1 %v7522_v16  ;;  %v7692_v16 = vld [vmem:[%s9265_s1 + $0x320] sm:$0xff] }
0x19b4   : > { %7528 = vmatprep.subr.msk.bf16.mxu1 %vm8638_vm15, %v7526_v41 }
0x19b6   : > { %7109 = vmatmul.mubr.msk.f32.vlgmr.msra.gmra.mrb[54].mxu1 %vm571_vm5, %v5477_v18 }
0x19b7   : > { %7111 = vmatprep.mubr.msk.f32.mxu1 %vm571_vm5, %v5478_v45  ;;  %7531 = vmatpush3.bf16.msk.msra.mxu1 %vm8638_vm15, %v7526_v41  ;;  %v7693_v41 = vld [vmem:[%s9265_s1 + $0x328] sm:$0xff] }
0x19b8   : > { %7164 = vmatprep.subr.msk.mxu1 %vm5279_vm1, %v5963_v53 }
0x19ba   : > { %7112 = vmatmul.mubr.msk.f32.gmra.mrb[56].mxu1 %vm571_vm5, %v5479_v59  ;;  %v6096_v59 = vld [vmem:[%s9265_s1 + $0x2f0] sm:$0xff] }
0x19bb   : > { %7118 = vmatprep.mubr.msk.f32.mxu1 %vm3463_vm0, %v8895_v42 }
0x19bd   : > { %v5492_v24 = vpop.permute.xlu1 %5491 }
0x19be   : > { %v5487_v25 = vpop.permute.xlu0 %5486  ;;  %7119 = vmatmul.mubr.msk.f32.vlgmr.msra.gmra.mrb[54].mxu1 %vm3463_vm0, %v8893_v7 }
0x19bf   : > { %7121 = vmatprep.mubr.msk.f32.mxu1 %vm3463_vm0, %v8901_v50  ;;  %7165 = vmatpush3.msk.msra.mxu1 %vm5279_vm1, %v5963_v53 }
0x19c1   : > { %v5502_v26 = vpop.permute.xlu1 %5501 }
0x19c2   : > { %v5497_v58 = vpop.permute.xlu0 %5496  ;;  %7122 = vmatmul.mubr.msk.f32.gmra.mrb[56].mxu1 %vm3463_vm0, %v8899_v3 }
0x19c5   : > { %v4900_v46 = vpop.permute.xlu1 %4899 }
0x19c6   : > { %v4895_v22 = vpop.permute.xlu0 %4894  ;;  %v4913_v3 = vadd.f32 %v9038_v54, %v4900_v46 }
0x19c7   : > { %v4912_v23 = vadd.f32 %v4895_v22, %v9040_v19 }
0x19c9   : > { %v4910_v52 = vpop.permute.xlu1 %4909 }
0x19ca   : > { %v4905_v27 = vpop.permute.xlu0 %4904 }
0x19cb   : > { %v4914_v42 = vadd.f32 %v4905_v27, %v9044_v57 }
0x19cd   : > { %v4533_v29 = vpop.permute.xlu1 %4532 }
0x19ce   : > { %v5706_v39 = vpop.permute.xlu0 %5705  ;;  %v4544_v8 = vmax.f32 %v8917_v0, %v4533_v29  ;;  %v4915_v0 = vadd.f32 %v9042_v55, %v4910_v52 }
0x19cf   : > { %7132 = vmatprep.mubr.msk.f32.mxu0 %vm571_vm5, %v5706_v39 }
0x19d1   : > { %v5708_v7 = vpop.permute.xlu1 %5707 }
0x19d2   : > { %v4535_v40 = vpop.permute.xlu0 %4534 }
0x19d3   : > { %v4545_v50 = vmax.f32 %v8915_v60, %v4535_v40  ;;  %v6099_v40 = vld [vmem:[%s9265_s1 + $0x308] sm:$0x3] }
0x19d5   : > { %v4551_v37 = vpop.permute.xlu1 %4550 }
0x19d6   : > { %v4561_v48 = vmax.f32 %v4545_v50, %v4551_v37  ;;  %v4549_v32 = vpop.permute.xlu0 %4548  ;;  %v6098_v50 = vld [vmem:[%s9265_s1 + $0x300] sm:$0xff] }
0x19d7   : > { %v4560_v19 = vmax.f32 %v4544_v8, %v4549_v32 }
0x19d8   : > { %v4917_v13 = vadd.f32 %v4913_v3, %v4561_v48 }
0x19d9   : > { %v4916_v5 = vadd.f32 %v4912_v23, %v4560_v19  ;;  %v4537_v61 = vpop.permute.xlu1 %4536 }
0x19da   : > { %v5710_v57 = vpop.permute.xlu0 %5709  ;;  %v4546_v56 = vmax.f32 %v8921_v2, %v4537_v61 }
0x19db   : > { %v7540_v33 = vpack.c.bf16 %v4917_v13, %v4916_v5 }
0x19dd   : > { %v5712_v44 = vpop.permute.xlu1 %5711 }
0x19de   : > { %v4539_v34 = vpop.permute.xlu0 %4538 }
0x19df   : > { %v4547_v43 = vmax.f32 %v8919_v1, %v4539_v34 }
0x19e1   : > { %v4555_v60 = vpop.permute.xlu1 %4554 }
0x19e2   : > { %v4563_v62 = vmax.f32 %v4547_v43, %v4555_v60  ;;  %v4553_v47 = vpop.permute.xlu0 %4552 }
0x19e3   : > { %v4562_v54 = vmax.f32 %v4546_v56, %v4553_v47 }
0x19e4   : > { %v4919_v28 = vadd.f32 %v4915_v0, %v4563_v62 }
0x19e5   : > { %v4918_v51 = vadd.f32 %v4914_v42, %v4562_v54  ;;  %v5716_v63 = vpop.permute.xlu1 %5715 }
0x19e6   : > { %v5714_v38 = vpop.permute.xlu0 %5713 }
0x19e7   : > { %v7544_v6 = vpack.c.bf16 %v4919_v28, %v4918_v51 }
0x19e9   : > { %v5720_v21 = vpop.permute.xlu1 %5719 }
0x19ea   : > { %v5718_v20 = vpop.permute.xlu0 %5717 }
0x1a91   : > { %v7120_v1 = vpop.f32.mrb[54].mxu1 }
0x1a92   : > { %v7566_v4 = vadd.f32 %v7120_v1, %v5492_v24  ;;  %v5682_v2 = vpop.f32.mrb[55].mxu1 }
0x1a93   : > { %v7567_v9 = vadd.f32 %v5682_v2, %v5487_v25 }
0x1a95   : > { %v7532_v10 = vpack.c.bf16 %v7566_v4, %v7567_v9  ;;  %v7123_v55 = vpop.f32.mrb[56].mxu1 }
0x1a96   : > { %v7568_v11 = vadd.f32 %v7123_v55, %v5502_v26  ;;  %v5692_v12 = vpop.f32.mrb[57].mxu1 }
0x1a97   : > { %v7569_v14 = vadd.f32 %v5692_v12, %v5497_v58  ;;  %7533 = vmatprep.subr.bf16.mxu0 %v7532_v10 }
0x1a98   : > { %7535 = vmatpush3.bf16.msra.mxu0 %v7532_v10 }
0x1a99   : > { %v7536_v15 = vpack.c.bf16 %v7568_v11, %v7569_v14 }
0x1a9b   : > { %7537 = vmatprep.subr.bf16.mxu0 %v7536_v15 }
0x1a9c   : > { %7539 = vmatpush3.bf16.msra.mxu0 %v7536_v15 }
0x1a9d   : > { %7541 = vmatprep.subr.bf16.mxu0 %v7540_v33 }
0x1a9f   : > { %7133 = vmatmul.mubr.msk.f32.vlgmr.msra.gmra.mrb[56].mxu0 %vm571_vm5, %v5708_v7  ;;  %v6097_v7 = vld [vmem:[%s9265_s1 + $0x2f8] sm:$0x3] }
0x1aa0   : > { %7135 = vmatprep.mubr.msk.f32.mxu0 %vm571_vm5, %v5710_v57  ;;  %7543 = vmatpush3.bf16.msra.mxu0 %v7540_v33 }
0x1aa1   : > { %7545 = vmatprep.subr.bf16.mxu0 %v7544_v6 }
0x1aa3   : > { %7136 = vmatmul.mubr.msk.f32.gmra.mrb[58].mxu0 %vm571_vm5, %v5712_v44 }
0x1aa4   : > { %7547 = vmatpush3.bf16.msra.mxu0 %v7544_v6  ;;  %7138 = vmatprep.mubr.msk.f32.mxu0 %vm571_vm5, %v5714_v38 }
0x1aa7   : > { %7139 = vmatmul.mubr.msk.f32.gmra.mrb[60].mxu0 %vm571_vm5, %v5716_v63 }
0x1aa8   : > { %7141 = vmatprep.mubr.msk.f32.mxu0 %vm571_vm5, %v5718_v20 }
0x1aab   : > { %7142 = vmatmul.mubr.msk.f32.gmra.mrb[62].mxu0 %vm571_vm5, %v5720_v21 }
0x1aac   : > { %7152 = vmatprep.mubr.msk.f32.mxu0 %vm571_vm5, %v9103_v17 }
0x1aaf   : > { %7153 = vmatmul.mubr.msk.f32.vlgmr.msra.gmra.mrb[56].mxu0 %vm571_vm5, %v9110_v30 }
0x1ab0   : > { %7155 = vmatprep.mubr.msk.f32.mxu0 %vm571_vm5, %v7692_v16 }
0x1ab3   : > { %7156 = vmatmul.mubr.msk.f32.gmra.mrb[58].mxu0 %vm571_vm5, %v7693_v41 }
0x1ab4   : > { %7158 = vmatprep.mubr.msk.f32.mxu0 %vm571_vm5, %v9135_v49 }
0x1ab7   : > { %7159 = vmatmul.mubr.msk.f32.gmra.mrb[60].mxu0 %vm571_vm5, %v9140_v35 }
0x1ab8   : > { %7161 = vmatprep.mubr.msk.f32.mxu0 %vm571_vm5, %v9154_v31 }
0x1abb   : > { %7162 = vmatmul.mubr.msk.f32.gmra.mrb[62].mxu0 %vm571_vm5, %v9149_v36  ;;  %vm6182_vm5 = vcmask 7168  }
0x1b82   : > { %v7154_v17 = vpop.f32.mrb[56].mxu0 }
0x1b83   : > { %v5924_v30 = vpop.f32.mrb[57].mxu0 }
0x1b84   : > { %7166 = vmatprep.mubr.msk.f32.mxu1 %vm5266_vm2, %v5924_v30 }
0x1b85   : > { %7167 = vmatmul.mubr.msk.f32.vlgmr.msra.gmra.mrb[58].mxu1 %vm5266_vm2, %v7154_v17 }
0x1b86   : > { %v7157_v18 = vpop.f32.mrb[58].mxu0 }
0x1b87   : > { %v5934_v45 = vpop.f32.mrb[59].mxu0 }
0x1b88   : > { %7169 = vmatprep.mubr.msk.f32.mxu1 %vm5266_vm2, %v5934_v45 }
0x1b89   : > { %7170 = vmatmul.mubr.msk.f32.gmra.mrb[60].mxu1 %vm5266_vm2, %v7157_v18 }
0x1b8a   : > { %v7160_v49 = vpop.f32.mrb[60].mxu0 }
0x1b8b   : > { %v5944_v35 = vpop.f32.mrb[61].mxu0 }
0x1b8c   : > { %7172 = vmatprep.mubr.msk.f32.mxu1 %vm5266_vm2, %v5944_v35 }
0x1b8d   : > { %7173 = vmatmul.mubr.msk.f32.gmra.mrb[62].mxu1 %vm5266_vm2, %v7160_v49 }
0x1b8e   : > { %v7163_v31 = vpop.f32.mrb[62].mxu0 }
0x1b8f   : > { %v5954_v36 = vpop.f32.mrb[63].mxu0 }
0x1b90   : > { %7175 = vmatprep.mubr.msk.f32.mxu1 %vm5266_vm2, %v5954_v36 }
0x1b91   : > { %7176 = vmatmul.mubr.msk.f32.gmra.mrb[64].mxu1 %vm5266_vm2, %v7163_v31 }
0x1b92   : > { %7194 = vmatprep.mubr.msk.f32.mxu1 %vm6100_vm3, %v6096_v59 }
0x1c58   : > { %v7168_v24 = vpop.f32.mrb[58].mxu1 }
0x1c59   : > { %v6057_v25 = vpop.f32.mrb[59].mxu1 }
0x1c5a   : > { %v7548_v26 = vpack.c.bf16 %v7168_v24, %v6057_v25 }
0x1c5c   : > { %v7171_v58 = vpop.f32.mrb[60].mxu1  ;;  %7549 = vmatprep.subr.bf16.mxu1 %v7548_v26 }
0x1c5d   : > { %v6067_v46 = vpop.f32.mrb[61].mxu1  ;;  %7551 = vmatpush3.bf16.msra.mxu1 %v7548_v26 }
0x1c5e   : > { %v7552_v22 = vpack.c.bf16 %v7171_v58, %v6067_v46 }
0x1c60   : > { %v7174_v23 = vpop.f32.mrb[62].mxu1  ;;  %7553 = vmatprep.subr.bf16.mxu1 %v7552_v22 }
0x1c61   : > { %v6077_v52 = vpop.f32.mrb[63].mxu1  ;;  %7555 = vmatpush3.bf16.msra.mxu1 %v7552_v22 }
0x1c62   : > { %v7556_v27 = vpack.c.bf16 %v7174_v23, %v6077_v52 }
0x1c64   : > { %v7177_v42 = vpop.f32.mrb[64].mxu1  ;;  %7557 = vmatprep.subr.bf16.mxu1 %v7556_v27 }
0x1c65   : > { %v6087_v29 = vpop.f32.mrb[65].mxu1  ;;  %7559 = vmatpush3.bf16.msra.mxu1 %v7556_v27 }
0x1c66   : > { %v7560_v39 = vpack.c.bf16 %v7177_v42, %v6087_v29 }
0x1c68   : > { %7561 = vmatprep.subr.bf16.mxu1 %v7560_v39 }
0x1c69   : > { %7563 = vmatpush3.bf16.msra.mxu1 %v7560_v39 }
0x1c6c   : > { %7195 = vmatmul.mubr.msk.f32.vlgmr.msra.gmra.mrb[66].mxu1 %vm6100_vm3, %v6097_v7 }
0x1d3f   : > { %v7196_v8 = vpop.f32.mrb[66].mxu1 }
0x1d40   : > { %v6179_v37 = vadd.f32 %v7196_v8, %v6099_v40  ;;  %v6173_v3 = vpop.f32.mrb[67].mxu1 }
0x1d41   : > { %v6174_v48 = vadd.f32 %v6173_v3, %v6098_v50 }
0x1d42   : > { %6185 = vst.msk [vmem:[%s170_s4 + $0x8] sm:$0x3] %vm6184_vm4, %v6179_v37 }
0x1d43   : > { %6183 = vst.msk [vmem:[%s170_s4] sm:$0xff] %vm6182_vm5, %v6174_v48 }
0x1d44 PF: > { %s13_s12 = sadd.s32 1, %s7700_s12  }
0x1d45   : > { %p10_p4 = scmp.ge.s32.totalorder %s13_s12, 4  }
0x1d47   :  { %12 = sbr.rel (!%p10_p4) target bundleno = 1 (0x1), region = 62 }

</bundles_post_ra>
